<compile_context>
chip_gen: v6e
topology: v6e:2x2x1
jax: 0.10.0
libtpu: 0.0.40
codegen_flags: <defaults>
</compile_context>

<pallas_src>
import functools

import jax
import jax.numpy as jnp
from jax.experimental import pallas as pl
from jax.experimental.pallas import tpu as pltpu

D_MODEL = 32
NUM_HEADS = 4
FF_HIDDEN = 64
NUM_LAYERS = 2
EPS = 1e-5

VEC_ROWS_PER_LAYER = 16     # 8 attn biases + 6 LN rows + ff_b1 + ff_b2


# ---------------------------------------------------------------------------
# in-kernel helpers (traced inside the single fused Pallas kernel body)
# ---------------------------------------------------------------------------
def _layernorm(x, gamma, beta):
    mean = jnp.mean(x, axis=-1, keepdims=True)
    cent = x - mean
    var = jnp.mean(cent * cent, axis=-1, keepdims=True)
    return cent * jax.lax.rsqrt(var + EPS) * gamma + beta


def _mha(xq_bf, xkv_bf, batch, num_heads, wq, wk, wv, wo, bq, bk, bv, bo):
    """Multi-head attention on flattened (B*T, D) activations.

    Full-width bf16 projections (one MXU dot each), per-head score / p@v as
    leading-batch-dim einsums, lane concat of heads, single output projection.
    """
    n_q = xq_bf.shape[0]
    n_kv = xkv_bf.shape[0]
    d_model = wq.shape[1]
    hd = d_model // num_heads
    t_q = n_q // batch
    t_kv = n_kv // batch
    scale = 1.0 / (hd ** 0.5)

    # Full-width projections: M = B*T (or B*S), K = N = D.  bf16 in, f32 accumulate.
    q = jnp.dot(xq_bf, wq, preferred_element_type=jnp.float32) + bq
    k = jnp.dot(xkv_bf, wk, preferred_element_type=jnp.float32) + bk
    v = jnp.dot(xkv_bf, wv, preferred_element_type=jnp.float32) + bv
    q = q * scale                                        # fold 1/sqrt(hd) into q once

    head_outs = []
    for h in range(num_heads):                           # static; lane-slice the heads
        sl = slice(h * hd, (h + 1) * hd)
        q3 = q[:, sl].reshape(batch, t_q, hd).astype(jnp.bfloat16)
        k3 = k[:, sl].reshape(batch, t_kv, hd).astype(jnp.bfloat16)
        v3 = v[:, sl].reshape(batch, t_kv, hd).astype(jnp.bfloat16)
        s = jnp.einsum("bqd,bkd->bqk", q3, k3, preferred_element_type=jnp.float32)
        s = s - jnp.max(s, axis=-1, keepdims=True)       # f32 softmax
        p = jnp.exp(s)
        p = p * pl.reciprocal(jnp.sum(p, axis=-1, keepdims=True), approx=True)
        o3 = jnp.einsum("bqk,bkd->bqd", p.astype(jnp.bfloat16), v3,
                        preferred_element_type=jnp.float32)
        head_outs.append(o3.reshape(n_q, hd))

    # Lane concat of heads (XLU has slack) -> ONE full-width output projection.
    o = jnp.concatenate(head_outs, axis=-1).astype(jnp.bfloat16)
    return jnp.dot(o, wo, preferred_element_type=jnp.float32) + bo


# ---------------------------------------------------------------------------
# single fused Pallas kernel: all layers + final LayerNorm
# ---------------------------------------------------------------------------
def fused_decoder_kernel(tgt_ref, mem_ref, wd_ref, w1_ref, vec_ref, out_ref, *,
                         batch, num_layers, num_heads, d_model, ff_hidden):
    x = tgt_ref[...]                                   # (B*T, D) f32 lane-dense slab
    mem_bf = mem_ref[...].astype(jnp.bfloat16)         # (B*S, D) cast once, reused per layer

    w_rows = 8 * d_model + ff_hidden                   # packed (., D)-wide rows per layer

    def attn_w(layer, i):                              # i-th (D, D) attention weight
        off = layer * w_rows + i * d_model
        return wd_ref[off:off + d_model, :]

    def ffw2(layer):                                   # (F, D)
        off = layer * w_rows + 8 * d_model
        return wd_ref[off:off + ff_hidden, :]

    def ffw1(layer):                                   # (D, F)
        return w1_ref[layer * d_model:(layer + 1) * d_model, :]

    def vec(layer, i, width=d_model):                  # (1, width) bias / LN row
        r = layer * VEC_ROWS_PER_LAYER + i
        return vec_ref[r:r + 1, :width]

    # Static unroll over layers: fine at num_layers=2, D=32.
    # TODO(synk): at larger sizes, switch to lax.fori_loop over layers (dynamic pl.ds into
    # the packed weight buffers) to bound vreg live-ranges, add a "parallel" row-chunk grid
    # axis over B*T for v7x's 2 TCs, and re-derive tiling against v7x's 64 MiB VMEM.
    for layer in range(num_layers):
        # masked self-attention (tgt_mask=None) + residual + LayerNorm
        x_bf = x.astype(jnp.bfloat16)
        a = _mha(x_bf, x_bf, batch, num_heads,
                 attn_w(layer, 0), attn_w(layer, 1), attn_w(layer, 2), attn_w(layer, 3),
                 vec(layer, 0), vec(layer, 1), vec(layer, 2), vec(layer, 3))
        x = _layernorm(x + a, vec(layer, 8), vec(layer, 9))

        # cross-attention against encoder memory + residual + LayerNorm
        a = _mha(x.astype(jnp.bfloat16), mem_bf, batch, num_heads,
                 attn_w(layer, 4), attn_w(layer, 5), attn_w(layer, 6), attn_w(layer, 7),
                 vec(layer, 4), vec(layer, 5), vec(layer, 6), vec(layer, 7))
        x = _layernorm(x + a, vec(layer, 10), vec(layer, 11))

        # feed-forward: Linear -> ReLU -> (Dropout=identity) -> Linear, residual + LN
        h = jnp.dot(x.astype(jnp.bfloat16), ffw1(layer),
                    preferred_element_type=jnp.float32) + vec(layer, 14, ff_hidden)
        h = jnp.maximum(h, 0.0)
        f = jnp.dot(h.astype(jnp.bfloat16), ffw2(layer),
                    preferred_element_type=jnp.float32) + vec(layer, 15)
        x = _layernorm(x + f, vec(layer, 12), vec(layer, 13))

    fin = num_layers * VEC_ROWS_PER_LAYER
    out_ref[...] = _layernorm(x, vec_ref[fin:fin + 1, :d_model],
                              vec_ref[fin + 1:fin + 2, :d_model])


# ---------------------------------------------------------------------------
# host-side parameter packing: 3 lane-dense buffers instead of 26 tiny operands
# ---------------------------------------------------------------------------
def pack_params(p):
    num_layers, d_model, _ = p["sa_wq"].shape
    ff_hidden = p["ff_w1"].shape[-1]

    def pad_row(v):                      # pad a (k,) vector to the packed lane width
        return jnp.pad(v, (0, ff_hidden - v.shape[0]))

    wd_blocks, w1_blocks, vec_rows = [], [], []
    for l in range(num_layers):
        for name in ("sa_wq", "sa_wk", "sa_wv", "sa_wo",
                     "ca_wq", "ca_wk", "ca_wv", "ca_wo"):
            wd_blocks.append(p[name][l])                  # (D, D)
        wd_blocks.append(p["ff_w2"][l])                   # (F, D)
        w1_blocks.append(p["ff_w1"][l])                   # (D, F)
        for name in ("sa_bq", "sa_bk", "sa_bv", "sa_bo",
                     "ca_bq", "ca_bk", "ca_bv", "ca_bo"):
            vec_rows.append(pad_row(p[name][l]))
        for i in range(3):
            vec_rows.append(pad_row(p["ln_g"][l, i]))
            vec_rows.append(pad_row(p["ln_b"][l, i]))
        vec_rows.append(p["ff_b1"][l])                    # already width F
        vec_rows.append(pad_row(p["ff_b2"][l]))
    vec_rows.append(pad_row(p["fin_g"]))
    vec_rows.append(pad_row(p["fin_b"]))

    wd = jnp.concatenate(wd_blocks, axis=0).astype(jnp.bfloat16)   # (L*(8D+F), D)
    w1 = jnp.concatenate(w1_blocks, axis=0).astype(jnp.bfloat16)   # (L*D, F)
    vecs = jnp.stack(vec_rows, axis=0).astype(jnp.float32)         # (L*16+2, F)
    return wd, w1, vecs


def _cost_estimate(batch, t_len, s_len, d_model, ff_hidden, num_heads, num_layers,
                   total_bytes):
    n, m = batch * t_len, batch * s_len
    self_attn = 4 * (2 * n * d_model * d_model) + 2 * (2 * batch * t_len * t_len * d_model)
    cross_attn = (2 * (2 * n * d_model * d_model) + 2 * (2 * m * d_model * d_model)
                  + 2 * (2 * batch * t_len * s_len * d_model))
    ffn = 2 * (2 * n * d_model * ff_hidden)
    flops = num_layers * (self_attn + cross_attn + ffn)
    transcendentals = num_layers * batch * num_heads * (t_len * t_len + t_len * s_len)
    return pl.CostEstimate(flops=flops, transcendentals=transcendentals,
                           bytes_accessed=total_bytes)


# ---------------------------------------------------------------------------
# wrapper
# ---------------------------------------------------------------------------
def transformer_decoder(tgt, memory, params, num_heads=NUM_HEADS):
    """Full decoder stack (+ final LayerNorm) in ONE fused pallas_call."""
    batch, t_len, d_model = tgt.shape
    s_len = memory.shape[1]
    num_layers = params["ln_g"].shape[0]
    ff_hidden = params["ff_w1"].shape[-1]
    assert d_model % num_heads == 0 and ff_hidden >= d_model

    wd, w1, vecs = pack_params(params)                 # 3 packed lane-dense operands
    tgt2 = tgt.reshape(batch * t_len, d_model)         # (B*T, D) lane-dense slab
    mem2 = memory.reshape(batch * s_len, d_model)

    total_bytes = (2 * int(tgt2.nbytes) + int(mem2.nbytes)
                   + int(wd.nbytes) + int(w1.nbytes) + int(vecs.nbytes))

    vmem = pl.BlockSpec(memory_space=pltpu.MemorySpace.VMEM)
    out2 = pl.pallas_call(
        functools.partial(fused_decoder_kernel, batch=batch, num_layers=num_layers,
                          num_heads=num_heads, d_model=d_model, ff_hidden=ff_hidden),
        out_shape=jax.ShapeDtypeStruct((batch * t_len, d_model), jnp.float32),
        in_specs=[vmem] * 5,
        out_specs=vmem,
        cost_estimate=_cost_estimate(batch, t_len, s_len, d_model, ff_hidden,
                                     num_heads, num_layers, total_bytes),
    )(tgt2, mem2, wd, w1, vecs)
    return out2.reshape(batch, t_len, d_model)


# ---------------------------------------------------------------------------
# deterministic parameter initialization (nn.Linear / nn.LayerNorm conventions,
# weights stored as (in_features, out_features))
# ---------------------------------------------------------------------------
def init_params(key, d_model, ff_hidden, num_heads, num_layers):
    def linear(k, fan_in, fan_out):
        k1, k2 = jax.random.split(k)
        bound = 1.0 / (fan_in ** 0.5)
        w = jax.random.uniform(k1, (fan_in, fan_out), jnp.float32, -bound, bound)
        b = jax.random.uniform(k2, (fan_out,), jnp.float32, -bound, bound)
        return w, b

    w_names = ("sa_wq", "sa_wk", "sa_wv", "sa_wo", "ca_wq", "ca_wk", "ca_wv", "ca_wo")
    acc = {n: [] for n in w_names}
    acc.update({n.replace("_w", "_b"): [] for n in w_names})
    acc.update({"ff_w1": [], "ff_b1": [], "ff_w2": [], "ff_b2": []})

    for _ in range(num_layers):
        key, *ks = jax.random.split(key, 11)
        for i, n in enumerate(w_names):
            w, b = linear(ks[i], d_model, d_model)
            acc[n].append(w)
            acc[n.replace("_w", "_b")].append(b)
        w1, b1 = linear(ks[8], d_model, ff_hidden)
        w2, b2 = linear(ks[9], ff_hidden, d_model)
        acc["ff_w1"].append(w1); acc["ff_b1"].append(b1)
        acc["ff_w2"].append(w2); acc["ff_b2"].append(b2)

    params = {n: jnp.stack(v, axis=0) for n, v in acc.items()}
    params["ln_g"] = jnp.ones((num_layers, 3, d_model), jnp.float32)
    params["ln_b"] = jnp.zeros((num_layers, 3, d_model), jnp.float32)
    params["fin_g"] = jnp.ones((d_model,), jnp.float32)
    params["fin_b"] = jnp.zeros((d_model,), jnp.float32)
    return params


# ---------------------------------------------------------------------------
# pure-JAX f32 reference (same math) for a numerical sanity check
# ---------------------------------------------------------------------------
def _ref_ln(x, g, b):
    mean = x.mean(-1, keepdims=True)
    var = ((x - mean) ** 2).mean(-1, keepdims=True)
    return (x - mean) / jnp.sqrt(var + EPS) * g + b


def _ref_attn(xq, xkv, wq, wk, wv, wo, bq, bk, bv, bo, num_heads):
    B, T, D = xq.shape
    S = xkv.shape[1]
    hd = D // num_heads
    q = (xq @ wq + bq).reshape(B, T, num_heads, hd)
    k = (xkv @ wk + bk).reshape(B, S, num_heads, hd)
    v = (xkv @ wv + bv).reshape(B, S, num_heads, hd)
    s = jnp.einsum("bthd,bshd->bhts", q, k) / (hd ** 0.5)
    p = jax.nn.softmax(s, axis=-1)
    o = jnp.einsum("bhts,bshd->bthd", p, v).reshape(B, T, D)
    return o @ wo + bo


def reference_decoder(tgt, memory, p, num_heads):
    x = tgt
    for l in range(p["ln_g"].shape[0]):
        a = _ref_attn(x, x, p["sa_wq"][l], p["sa_wk"][l], p["sa_wv"][l], p["sa_wo"][l],
                      p["sa_bq"][l], p["sa_bk"][l], p["sa_bv"][l], p["sa_bo"][l], num_heads)
        x = _ref_ln(x + a, p["ln_g"][l, 0], p["ln_b"][l, 0])
        a = _ref_attn(x, memory, p["ca_wq"][l], p["ca_wk"][l], p["ca_wv"][l], p["ca_wo"][l],
                      p["ca_bq"][l], p["ca_bk"][l], p["ca_bv"][l], p["ca_bo"][l], num_heads)
        x = _ref_ln(x + a, p["ln_g"][l, 1], p["ln_b"][l, 1])
        h = jax.nn.relu(x @ p["ff_w1"][l] + p["ff_b1"][l])
        f = h @ p["ff_w2"][l] + p["ff_b2"][l]
        x = _ref_ln(x + f, p["ln_g"][l, 2], p["ln_b"][l, 2])
    return _ref_ln(x, p["fin_g"], p["fin_b"])


if __name__ == "__main__":
    key = jax.random.PRNGKey(0)
    k_tgt, k_mem, k_par = jax.random.split(key, 3)

    batch, tgt_len, src_len = 2, 8, 8
    tgt = jax.random.normal(k_tgt, (batch, tgt_len, D_MODEL), jnp.float32)
    memory = jax.random.normal(k_mem, (batch, src_len, D_MODEL), jnp.float32)

    params = init_params(k_par, D_MODEL, FF_HIDDEN, NUM_HEADS, NUM_LAYERS)

    out = transformer_decoder(tgt, memory, params, num_heads=NUM_HEADS)
    jax.block_until_ready(out)
    assert out.shape == (batch, tgt_len, D_MODEL)

    # sanity check vs. f32 reference: bf16 matmul operands + approx softmax reciprocal
    # -> mixed abs/rel tolerance (|err| / (1 + |ref|) < 5e-2)
    ref = reference_decoder(tgt, memory, params, NUM_HEADS)
    err = float(jnp.max(jnp.abs(out - ref) / (1.0 + jnp.abs(ref))))
    assert err < 5e-2, f"kernel mismatch vs reference: err={err}"
    print("KERNEL_OK")
</pallas_src>

<mosaic_0001>
module attributes {stable_mosaic.version = 11 : i64} {
  func.func @fused_decoder_kernel(%arg0: memref<16x32xf32, #tpu.memory_space<vmem>>, %arg1: memref<16x32xf32, #tpu.memory_space<vmem>>, %arg2: memref<640x32xbf16, #tpu.memory_space<vmem>>, %arg3: memref<64x64xbf16, #tpu.memory_space<vmem>>, %arg4: memref<34x64xf32, #tpu.memory_space<vmem>>, %arg5: memref<16x32xf32, #tpu.memory_space<vmem>>) attributes {dimension_semantics = [], scalar_prefetch = 0 : i64, scratch_operands = 0 : i64, tpu.core_type = #tpu.core_type<tc>} {
    %c0 = arith.constant 0 : index
    %c0_0 = arith.constant 0 : index
    %0 = vector.load %arg0[%c0, %c0_0] : memref<16x32xf32, #tpu.memory_space<vmem>>, vector<16x32xf32>
    %c0_1 = arith.constant 0 : index
    %c0_2 = arith.constant 0 : index
    %1 = vector.load %arg1[%c0_1, %c0_2] : memref<16x32xf32, #tpu.memory_space<vmem>>, vector<16x32xf32>
    %2 = arith.truncf %1 : vector<16x32xf32> to vector<16x32xbf16>
    %3 = arith.truncf %0 : vector<16x32xf32> to vector<16x32xbf16>
    %c0_3 = arith.constant 0 : index
    %c0_4 = arith.constant 0 : index
    %4 = vector.load %arg2[%c0_3, %c0_4] : memref<640x32xbf16, #tpu.memory_space<vmem>>, vector<32x32xbf16>
    %c32 = arith.constant 32 : index
    %c0_5 = arith.constant 0 : index
    %5 = vector.load %arg2[%c32, %c0_5] : memref<640x32xbf16, #tpu.memory_space<vmem>>, vector<32x32xbf16>
    %c64 = arith.constant 64 : index
    %c0_6 = arith.constant 0 : index
    %6 = vector.load %arg2[%c64, %c0_6] : memref<640x32xbf16, #tpu.memory_space<vmem>>, vector<32x32xbf16>
    %c96 = arith.constant 96 : index
    %c0_7 = arith.constant 0 : index
    %7 = vector.load %arg2[%c96, %c0_7] : memref<640x32xbf16, #tpu.memory_space<vmem>>, vector<32x32xbf16>
    %c0_8 = arith.constant 0 : index
    %c0_9 = arith.constant 0 : index
    %8 = vector.load %arg4[%c0_8, %c0_9] : memref<34x64xf32, #tpu.memory_space<vmem>>, vector<1x32xf32>
    %c1 = arith.constant 1 : index
    %c0_10 = arith.constant 0 : index
    %9 = vector.load %arg4[%c1, %c0_10] : memref<34x64xf32, #tpu.memory_space<vmem>>, vector<1x32xf32>
    %c2 = arith.constant 2 : index
    %c0_11 = arith.constant 0 : index
    %10 = vector.load %arg4[%c2, %c0_11] : memref<34x64xf32, #tpu.memory_space<vmem>>, vector<1x32xf32>
    %c3 = arith.constant 3 : index
    %c0_12 = arith.constant 0 : index
    %11 = vector.load %arg4[%c3, %c0_12] : memref<34x64xf32, #tpu.memory_space<vmem>>, vector<1x32xf32>
    %cst = arith.constant dense<0.000000e+00> : vector<16x32xf32>
    %12 = tpu.matmul %3, %4, %cst {dimension_numbers = #tpu.dot_dimension_numbers<[1], [0], [0], [1], [0, 0, 1, 1], [], []>} : vector<16x32xbf16>, vector<32x32xbf16>, vector<16x32xf32> -> vector<16x32xf32>
    %13 = vector.broadcast %8 : vector<1x32xf32> to vector<16x32xf32>
    %14 = arith.addf %12, %13 : vector<16x32xf32>
    %cst_13 = arith.constant dense<0.000000e+00> : vector<16x32xf32>
    %15 = tpu.matmul %3, %5, %cst_13 {dimension_numbers = #tpu.dot_dimension_numbers<[1], [0], [0], [1], [0, 0, 1, 1], [], []>} : vector<16x32xbf16>, vector<32x32xbf16>, vector<16x32xf32> -> vector<16x32xf32>
    %16 = vector.broadcast %9 : vector<1x32xf32> to vector<16x32xf32>
    %17 = arith.addf %15, %16 : vector<16x32xf32>
    %cst_14 = arith.constant dense<0.000000e+00> : vector<16x32xf32>
    %18 = tpu.matmul %3, %6, %cst_14 {dimension_numbers = #tpu.dot_dimension_numbers<[1], [0], [0], [1], [0, 0, 1, 1], [], []>} : vector<16x32xbf16>, vector<32x32xbf16>, vector<16x32xf32> -> vector<16x32xf32>
    %19 = vector.broadcast %10 : vector<1x32xf32> to vector<16x32xf32>
    %20 = arith.addf %18, %19 : vector<16x32xf32>
    %cst_15 = arith.constant 0.353553385 : f32
    %21 = vector.broadcast %cst_15 : f32 to vector<16x32xf32>
    %22 = arith.mulf %14, %21 : vector<16x32xf32>
    %23 = vector.extract_strided_slice %22 {offsets = [0, 0], sizes = [16, 8], strides = [1, 1]} : vector<16x32xf32> to vector<16x8xf32>
    %24 = vector.shape_cast %23 : vector<16x8xf32> to vector<2x8x8xf32>
    %25 = arith.truncf %24 : vector<2x8x8xf32> to vector<2x8x8xbf16>
    %26 = vector.extract_strided_slice %17 {offsets = [0, 0], sizes = [16, 8], strides = [1, 1]} : vector<16x32xf32> to vector<16x8xf32>
    %27 = vector.shape_cast %26 : vector<16x8xf32> to vector<2x8x8xf32>
    %28 = arith.truncf %27 : vector<2x8x8xf32> to vector<2x8x8xbf16>
    %29 = vector.extract_strided_slice %20 {offsets = [0, 0], sizes = [16, 8], strides = [1, 1]} : vector<16x32xf32> to vector<16x8xf32>
    %30 = vector.shape_cast %29 : vector<16x8xf32> to vector<2x8x8xf32>
    %31 = arith.truncf %30 : vector<2x8x8xf32> to vector<2x8x8xbf16>
    "tpu.trace_start"() <{level = 10 : i32, message = "bqd,bkd->bqk"}> : () -> ()
    %cst_16 = arith.constant dense<0.000000e+00> : vector<2x8x8xf32>
    %32 = tpu.matmul %25, %28, %cst_16 {dimension_numbers = #tpu.dot_dimension_numbers<[2], [2], [1], [1], [0, 0, 0, 1, 1, 1], [0], [0]>} : vector<2x8x8xbf16>, vector<2x8x8xbf16>, vector<2x8x8xf32> -> vector<2x8x8xf32>
    "tpu.trace_stop"() : () -> ()
    %cst_17 = arith.constant dense<0xFF800000> : vector<2x8xf32>
    %33 = vector.multi_reduction <maximumf>, %32, %cst_17 [2] : vector<2x8x8xf32> to vector<2x8xf32>
    %34 = vector.shape_cast %33 : vector<2x8xf32> to vector<2x8x1xf32>
    %35 = vector.broadcast %34 : vector<2x8x1xf32> to vector<2x8x8xf32>
    %36 = arith.subf %32, %35 : vector<2x8x8xf32>
    %37 = math.exp %36 : vector<2x8x8xf32>
    %cst_18 = arith.constant dense<0.000000e+00> : vector<2x8xf32>
    %38 = vector.multi_reduction <add>, %37, %cst_18 [2] : vector<2x8x8xf32> to vector<2x8xf32>
    %39 = vector.shape_cast %38 : vector<2x8xf32> to vector<2x8x1xf32>
    %40 = tpu.reciprocal %39 {approx = true} : vector<2x8x1xf32> -> vector<2x8x1xf32>
    %41 = vector.broadcast %40 : vector<2x8x1xf32> to vector<2x8x8xf32>
    %42 = arith.mulf %37, %41 : vector<2x8x8xf32>
    %43 = arith.truncf %42 : vector<2x8x8xf32> to vector<2x8x8xbf16>
    "tpu.trace_start"() <{level = 10 : i32, message = "bqk,bkd->bqd"}> : () -> ()
    %cst_19 = arith.constant dense<0.000000e+00> : vector<2x8x8xf32>
    %44 = tpu.matmul %43, %31, %cst_19 {dimension_numbers = #tpu.dot_dimension_numbers<[2], [1], [1], [2], [0, 0, 0, 1, 1, 2], [0], [0]>} : vector<2x8x8xbf16>, vector<2x8x8xbf16>, vector<2x8x8xf32> -> vector<2x8x8xf32>
    "tpu.trace_stop"() : () -> ()
    %45 = vector.shape_cast %44 : vector<2x8x8xf32> to vector<16x8xf32>
    %46 = vector.extract_strided_slice %22 {offsets = [0, 8], sizes = [16, 8], strides = [1, 1]} : vector<16x32xf32> to vector<16x8xf32>
    %47 = vector.shape_cast %46 : vector<16x8xf32> to vector<2x8x8xf32>
    %48 = arith.truncf %47 : vector<2x8x8xf32> to vector<2x8x8xbf16>
    %49 = vector.extract_strided_slice %17 {offsets = [0, 8], sizes = [16, 8], strides = [1, 1]} : vector<16x32xf32> to vector<16x8xf32>
    %50 = vector.shape_cast %49 : vector<16x8xf32> to vector<2x8x8xf32>
    %51 = arith.truncf %50 : vector<2x8x8xf32> to vector<2x8x8xbf16>
    %52 = vector.extract_strided_slice %20 {offsets = [0, 8], sizes = [16, 8], strides = [1, 1]} : vector<16x32xf32> to vector<16x8xf32>
    %53 = vector.shape_cast %52 : vector<16x8xf32> to vector<2x8x8xf32>
    %54 = arith.truncf %53 : vector<2x8x8xf32> to vector<2x8x8xbf16>
    "tpu.trace_start"() <{level = 10 : i32, message = "bqd,bkd->bqk"}> : () -> ()
    %cst_20 = arith.constant dense<0.000000e+00> : vector<2x8x8xf32>
    %55 = tpu.matmul %48, %51, %cst_20 {dimension_numbers = #tpu.dot_dimension_numbers<[2], [2], [1], [1], [0, 0, 0, 1, 1, 1], [0], [0]>} : vector<2x8x8xbf16>, vector<2x8x8xbf16>, vector<2x8x8xf32> -> vector<2x8x8xf32>
    "tpu.trace_stop"() : () -> ()
    %cst_21 = arith.constant dense<0xFF800000> : vector<2x8xf32>
    %56 = vector.multi_reduction <maximumf>, %55, %cst_21 [2] : vector<2x8x8xf32> to vector<2x8xf32>
    %57 = vector.shape_cast %56 : vector<2x8xf32> to vector<2x8x1xf32>
    %58 = vector.broadcast %57 : vector<2x8x1xf32> to vector<2x8x8xf32>
    %59 = arith.subf %55, %58 : vector<2x8x8xf32>
    %60 = math.exp %59 : vector<2x8x8xf32>
    %cst_22 = arith.constant dense<0.000000e+00> : vector<2x8xf32>
    %61 = vector.multi_reduction <add>, %60, %cst_22 [2] : vector<2x8x8xf32> to vector<2x8xf32>
    %62 = vector.shape_cast %61 : vector<2x8xf32> to vector<2x8x1xf32>
    %63 = tpu.reciprocal %62 {approx = true} : vector<2x8x1xf32> -> vector<2x8x1xf32>
    %64 = vector.broadcast %63 : vector<2x8x1xf32> to vector<2x8x8xf32>
    %65 = arith.mulf %60, %64 : vector<2x8x8xf32>
    %66 = arith.truncf %65 : vector<2x8x8xf32> to vector<2x8x8xbf16>
    "tpu.trace_start"() <{level = 10 : i32, message = "bqk,bkd->bqd"}> : () -> ()
    %cst_23 = arith.constant dense<0.000000e+00> : vector<2x8x8xf32>
    %67 = tpu.matmul %66, %54, %cst_23 {dimension_numbers = #tpu.dot_dimension_numbers<[2], [1], [1], [2], [0, 0, 0, 1, 1, 2], [0], [0]>} : vector<2x8x8xbf16>, vector<2x8x8xbf16>, vector<2x8x8xf32> -> vector<2x8x8xf32>
    "tpu.trace_stop"() : () -> ()
    %68 = vector.shape_cast %67 : vector<2x8x8xf32> to vector<16x8xf32>
    %69 = vector.extract_strided_slice %22 {offsets = [0, 16], sizes = [16, 8], strides = [1, 1]} : vector<16x32xf32> to vector<16x8xf32>
    %70 = vector.shape_cast %69 : vector<16x8xf32> to vector<2x8x8xf32>
    %71 = arith.truncf %70 : vector<2x8x8xf32> to vector<2x8x8xbf16>
    %72 = vector.extract_strided_slice %17 {offsets = [0, 16], sizes = [16, 8], strides = [1, 1]} : vector<16x32xf32> to vector<16x8xf32>
    %73 = vector.shape_cast %72 : vector<16x8xf32> to vector<2x8x8xf32>
    %74 = arith.truncf %73 : vector<2x8x8xf32> to vector<2x8x8xbf16>
    %75 = vector.extract_strided_slice %20 {offsets = [0, 16], sizes = [16, 8], strides = [1, 1]} : vector<16x32xf32> to vector<16x8xf32>
    %76 = vector.shape_cast %75 : vector<16x8xf32> to vector<2x8x8xf32>
    %77 = arith.truncf %76 : vector<2x8x8xf32> to vector<2x8x8xbf16>
    "tpu.trace_start"() <{level = 10 : i32, message = "bqd,bkd->bqk"}> : () -> ()
    %cst_24 = arith.constant dense<0.000000e+00> : vector<2x8x8xf32>
    %78 = tpu.matmul %71, %74, %cst_24 {dimension_numbers = #tpu.dot_dimension_numbers<[2], [2], [1], [1], [0, 0, 0, 1, 1, 1], [0], [0]>} : vector<2x8x8xbf16>, vector<2x8x8xbf16>, vector<2x8x8xf32> -> vector<2x8x8xf32>
    "tpu.trace_stop"() : () -> ()
    %cst_25 = arith.constant dense<0xFF800000> : vector<2x8xf32>
    %79 = vector.multi_reduction <maximumf>, %78, %cst_25 [2] : vector<2x8x8xf32> to vector<2x8xf32>
    %80 = vector.shape_cast %79 : vector<2x8xf32> to vector<2x8x1xf32>
    %81 = vector.broadcast %80 : vector<2x8x1xf32> to vector<2x8x8xf32>
    %82 = arith.subf %78, %81 : vector<2x8x8xf32>
    %83 = math.exp %82 : vector<2x8x8xf32>
    %cst_26 = arith.constant dense<0.000000e+00> : vector<2x8xf32>
    %84 = vector.multi_reduction <add>, %83, %cst_26 [2] : vector<2x8x8xf32> to vector<2x8xf32>
    %85 = vector.shape_cast %84 : vector<2x8xf32> to vector<2x8x1xf32>
    %86 = tpu.reciprocal %85 {approx = true} : vector<2x8x1xf32> -> vector<2x8x1xf32>
    %87 = vector.broadcast %86 : vector<2x8x1xf32> to vector<2x8x8xf32>
    %88 = arith.mulf %83, %87 : vector<2x8x8xf32>
    %89 = arith.truncf %88 : vector<2x8x8xf32> to vector<2x8x8xbf16>
    "tpu.trace_start"() <{level = 10 : i32, message = "bqk,bkd->bqd"}> : () -> ()
    %cst_27 = arith.constant dense<0.000000e+00> : vector<2x8x8xf32>
    %90 = tpu.matmul %89, %77, %cst_27 {dimension_numbers = #tpu.dot_dimension_numbers<[2], [1], [1], [2], [0, 0, 0, 1, 1, 2], [0], [0]>} : vector<2x8x8xbf16>, vector<2x8x8xbf16>, vector<2x8x8xf32> -> vector<2x8x8xf32>
    "tpu.trace_stop"() : () -> ()
    %91 = vector.shape_cast %90 : vector<2x8x8xf32> to vector<16x8xf32>
    %92 = vector.extract_strided_slice %22 {offsets = [0, 24], sizes = [16, 8], strides = [1, 1]} : vector<16x32xf32> to vector<16x8xf32>
    %93 = vector.shape_cast %92 : vector<16x8xf32> to vector<2x8x8xf32>
    %94 = arith.truncf %93 : vector<2x8x8xf32> to vector<2x8x8xbf16>
    %95 = vector.extract_strided_slice %17 {offsets = [0, 24], sizes = [16, 8], strides = [1, 1]} : vector<16x32xf32> to vector<16x8xf32>
    %96 = vector.shape_cast %95 : vector<16x8xf32> to vector<2x8x8xf32>
    %97 = arith.truncf %96 : vector<2x8x8xf32> to vector<2x8x8xbf16>
    %98 = vector.extract_strided_slice %20 {offsets = [0, 24], sizes = [16, 8], strides = [1, 1]} : vector<16x32xf32> to vector<16x8xf32>
    %99 = vector.shape_cast %98 : vector<16x8xf32> to vector<2x8x8xf32>
    %100 = arith.truncf %99 : vector<2x8x8xf32> to vector<2x8x8xbf16>
    "tpu.trace_start"() <{level = 10 : i32, message = "bqd,bkd->bqk"}> : () -> ()
    %cst_28 = arith.constant dense<0.000000e+00> : vector<2x8x8xf32>
    %101 = tpu.matmul %94, %97, %cst_28 {dimension_numbers = #tpu.dot_dimension_numbers<[2], [2], [1], [1], [0, 0, 0, 1, 1, 1], [0], [0]>} : vector<2x8x8xbf16>, vector<2x8x8xbf16>, vector<2x8x8xf32> -> vector<2x8x8xf32>
    "tpu.trace_stop"() : () -> ()
    %cst_29 = arith.constant dense<0xFF800000> : vector<2x8xf32>
    %102 = vector.multi_reduction <maximumf>, %101, %cst_29 [2] : vector<2x8x8xf32> to vector<2x8xf32>
    %103 = vector.shape_cast %102 : vector<2x8xf32> to vector<2x8x1xf32>
    %104 = vector.broadcast %103 : vector<2x8x1xf32> to vector<2x8x8xf32>
    %105 = arith.subf %101, %104 : vector<2x8x8xf32>
    %106 = math.exp %105 : vector<2x8x8xf32>
    %cst_30 = arith.constant dense<0.000000e+00> : vector<2x8xf32>
    %107 = vector.multi_reduction <add>, %106, %cst_30 [2] : vector<2x8x8xf32> to vector<2x8xf32>
    %108 = vector.shape_cast %107 : vector<2x8xf32> to vector<2x8x1xf32>
    %109 = tpu.reciprocal %108 {approx = true} : vector<2x8x1xf32> -> vector<2x8x1xf32>
    %110 = vector.broadcast %109 : vector<2x8x1xf32> to vector<2x8x8xf32>
    %111 = arith.mulf %106, %110 : vector<2x8x8xf32>
    %112 = arith.truncf %111 : vector<2x8x8xf32> to vector<2x8x8xbf16>
    "tpu.trace_start"() <{level = 10 : i32, message = "bqk,bkd->bqd"}> : () -> ()
    %cst_31 = arith.constant dense<0.000000e+00> : vector<2x8x8xf32>
    %113 = tpu.matmul %112, %100, %cst_31 {dimension_numbers = #tpu.dot_dimension_numbers<[2], [1], [1], [2], [0, 0, 0, 1, 1, 2], [0], [0]>} : vector<2x8x8xbf16>, vector<2x8x8xbf16>, vector<2x8x8xf32> -> vector<2x8x8xf32>
    "tpu.trace_stop"() : () -> ()
    %114 = vector.shape_cast %113 : vector<2x8x8xf32> to vector<16x8xf32>
    %115 = tpu.concatenate %45, %68, %91, %114 in 1 : vector<16x8xf32>, vector<16x8xf32>, vector<16x8xf32>, vector<16x8xf32> -> vector<16x32xf32>
    %116 = arith.truncf %115 : vector<16x32xf32> to vector<16x32xbf16>
    %cst_32 = arith.constant dense<0.000000e+00> : vector<16x32xf32>
    %117 = tpu.matmul %116, %7, %cst_32 {dimension_numbers = #tpu.dot_dimension_numbers<[1], [0], [0], [1], [0, 0, 1, 1], [], []>} : vector<16x32xbf16>, vector<32x32xbf16>, vector<16x32xf32> -> vector<16x32xf32>
    %118 = vector.broadcast %11 : vector<1x32xf32> to vector<16x32xf32>
    %119 = arith.addf %117, %118 : vector<16x32xf32>
    %120 = arith.addf %0, %119 : vector<16x32xf32>
    %c8 = arith.constant 8 : index
    %c0_33 = arith.constant 0 : index
    %121 = vector.load %arg4[%c8, %c0_33] : memref<34x64xf32, #tpu.memory_space<vmem>>, vector<1x32xf32>
    %c9 = arith.constant 9 : index
    %c0_34 = arith.constant 0 : index
    %122 = vector.load %arg4[%c9, %c0_34] : memref<34x64xf32, #tpu.memory_space<vmem>>, vector<1x32xf32>
    %cst_35 = arith.constant dense<0.000000e+00> : vector<16xf32>
    %123 = vector.multi_reduction <add>, %120, %cst_35 [1] : vector<16x32xf32> to vector<16xf32>
    %124 = vector.shape_cast %123 : vector<16xf32> to vector<16x1xf32>
    %cst_36 = arith.constant 3.200000e+01 : f32
    %125 = vector.broadcast %cst_36 : f32 to vector<16x1xf32>
    %126 = arith.divf %124, %125 : vector<16x1xf32>
    %127 = vector.broadcast %126 : vector<16x1xf32> to vector<16x32xf32>
    %128 = arith.subf %120, %127 : vector<16x32xf32>
    %129 = arith.mulf %128, %128 : vector<16x32xf32>
    %cst_37 = arith.constant dense<0.000000e+00> : vector<16xf32>
    %130 = vector.multi_reduction <add>, %129, %cst_37 [1] : vector<16x32xf32> to vector<16xf32>
    %131 = vector.shape_cast %130 : vector<16xf32> to vector<16x1xf32>
    %cst_38 = arith.constant 3.200000e+01 : f32
    %132 = vector.broadcast %cst_38 : f32 to vector<16x1xf32>
    %133 = arith.divf %131, %132 : vector<16x1xf32>
    %cst_39 = arith.constant 9.99999974E-6 : f32
    %134 = vector.broadcast %cst_39 : f32 to vector<16x1xf32>
    %135 = arith.addf %133, %134 : vector<16x1xf32>
    %136 = math.rsqrt %135 : vector<16x1xf32>
    %137 = vector.broadcast %136 : vector<16x1xf32> to vector<16x32xf32>
    %138 = arith.mulf %128, %137 : vector<16x32xf32>
    %139 = vector.broadcast %121 : vector<1x32xf32> to vector<16x32xf32>
    %140 = arith.mulf %138, %139 : vector<16x32xf32>
    %141 = vector.broadcast %122 : vector<1x32xf32> to vector<16x32xf32>
    %142 = arith.addf %140, %141 : vector<16x32xf32>
    %143 = arith.truncf %142 : vector<16x32xf32> to vector<16x32xbf16>
    %c128 = arith.constant 128 : index
    %c0_40 = arith.constant 0 : index
    %144 = vector.load %arg2[%c128, %c0_40] : memref<640x32xbf16, #tpu.memory_space<vmem>>, vector<32x32xbf16>
    %c160 = arith.constant 160 : index
    %c0_41 = arith.constant 0 : index
    %145 = vector.load %arg2[%c160, %c0_41] : memref<640x32xbf16, #tpu.memory_space<vmem>>, vector<32x32xbf16>
    %c192 = arith.constant 192 : index
    %c0_42 = arith.constant 0 : index
    %146 = vector.load %arg2[%c192, %c0_42] : memref<640x32xbf16, #tpu.memory_space<vmem>>, vector<32x32xbf16>
    %c224 = arith.constant 224 : index
    %c0_43 = arith.constant 0 : index
    %147 = vector.load %arg2[%c224, %c0_43] : memref<640x32xbf16, #tpu.memory_space<vmem>>, vector<32x32xbf16>
    %c4 = arith.constant 4 : index
    %c0_44 = arith.constant 0 : index
    %148 = vector.load %arg4[%c4, %c0_44] : memref<34x64xf32, #tpu.memory_space<vmem>>, vector<1x32xf32>
    %c5 = arith.constant 5 : index
    %c0_45 = arith.constant 0 : index
    %149 = vector.load %arg4[%c5, %c0_45] : memref<34x64xf32, #tpu.memory_space<vmem>>, vector<1x32xf32>
    %c6 = arith.constant 6 : index
    %c0_46 = arith.constant 0 : index
    %150 = vector.load %arg4[%c6, %c0_46] : memref<34x64xf32, #tpu.memory_space<vmem>>, vector<1x32xf32>
    %c7 = arith.constant 7 : index
    %c0_47 = arith.constant 0 : index
    %151 = vector.load %arg4[%c7, %c0_47] : memref<34x64xf32, #tpu.memory_space<vmem>>, vector<1x32xf32>
    %cst_48 = arith.constant dense<0.000000e+00> : vector<16x32xf32>
    %152 = tpu.matmul %143, %144, %cst_48 {dimension_numbers = #tpu.dot_dimension_numbers<[1], [0], [0], [1], [0, 0, 1, 1], [], []>} : vector<16x32xbf16>, vector<32x32xbf16>, vector<16x32xf32> -> vector<16x32xf32>
    %153 = vector.broadcast %148 : vector<1x32xf32> to vector<16x32xf32>
    %154 = arith.addf %152, %153 : vector<16x32xf32>
    %cst_49 = arith.constant dense<0.000000e+00> : vector<16x32xf32>
    %155 = tpu.matmul %2, %145, %cst_49 {dimension_numbers = #tpu.dot_dimension_numbers<[1], [0], [0], [1], [0, 0, 1, 1], [], []>} : vector<16x32xbf16>, vector<32x32xbf16>, vector<16x32xf32> -> vector<16x32xf32>
    %156 = vector.broadcast %149 : vector<1x32xf32> to vector<16x32xf32>
    %157 = arith.addf %155, %156 : vector<16x32xf32>
    %cst_50 = arith.constant dense<0.000000e+00> : vector<16x32xf32>
    %158 = tpu.matmul %2, %146, %cst_50 {dimension_numbers = #tpu.dot_dimension_numbers<[1], [0], [0], [1], [0, 0, 1, 1], [], []>} : vector<16x32xbf16>, vector<32x32xbf16>, vector<16x32xf32> -> vector<16x32xf32>
    %159 = vector.broadcast %150 : vector<1x32xf32> to vector<16x32xf32>
    %160 = arith.addf %158, %159 : vector<16x32xf32>
    %cst_51 = arith.constant 0.353553385 : f32
    %161 = vector.broadcast %cst_51 : f32 to vector<16x32xf32>
    %162 = arith.mulf %154, %161 : vector<16x32xf32>
    %163 = vector.extract_strided_slice %162 {offsets = [0, 0], sizes = [16, 8], strides = [1, 1]} : vector<16x32xf32> to vector<16x8xf32>
    %164 = vector.shape_cast %163 : vector<16x8xf32> to vector<2x8x8xf32>
    %165 = arith.truncf %164 : vector<2x8x8xf32> to vector<2x8x8xbf16>
    %166 = vector.extract_strided_slice %157 {offsets = [0, 0], sizes = [16, 8], strides = [1, 1]} : vector<16x32xf32> to vector<16x8xf32>
    %167 = vector.shape_cast %166 : vector<16x8xf32> to vector<2x8x8xf32>
    %168 = arith.truncf %167 : vector<2x8x8xf32> to vector<2x8x8xbf16>
    %169 = vector.extract_strided_slice %160 {offsets = [0, 0], sizes = [16, 8], strides = [1, 1]} : vector<16x32xf32> to vector<16x8xf32>
    %170 = vector.shape_cast %169 : vector<16x8xf32> to vector<2x8x8xf32>
    %171 = arith.truncf %170 : vector<2x8x8xf32> to vector<2x8x8xbf16>
    "tpu.trace_start"() <{level = 10 : i32, message = "bqd,bkd->bqk"}> : () -> ()
    %cst_52 = arith.constant dense<0.000000e+00> : vector<2x8x8xf32>
    %172 = tpu.matmul %165, %168, %cst_52 {dimension_numbers = #tpu.dot_dimension_numbers<[2], [2], [1], [1], [0, 0, 0, 1, 1, 1], [0], [0]>} : vector<2x8x8xbf16>, vector<2x8x8xbf16>, vector<2x8x8xf32> -> vector<2x8x8xf32>
    "tpu.trace_stop"() : () -> ()
    %cst_53 = arith.constant dense<0xFF800000> : vector<2x8xf32>
    %173 = vector.multi_reduction <maximumf>, %172, %cst_53 [2] : vector<2x8x8xf32> to vector<2x8xf32>
    %174 = vector.shape_cast %173 : vector<2x8xf32> to vector<2x8x1xf32>
    %175 = vector.broadcast %174 : vector<2x8x1xf32> to vector<2x8x8xf32>
    %176 = arith.subf %172, %175 : vector<2x8x8xf32>
    %177 = math.exp %176 : vector<2x8x8xf32>
    %cst_54 = arith.constant dense<0.000000e+00> : vector<2x8xf32>
    %178 = vector.multi_reduction <add>, %177, %cst_54 [2] : vector<2x8x8xf32> to vector<2x8xf32>
    %179 = vector.shape_cast %178 : vector<2x8xf32> to vector<2x8x1xf32>
    %180 = tpu.reciprocal %179 {approx = true} : vector<2x8x1xf32> -> vector<2x8x1xf32>
    %181 = vector.broadcast %180 : vector<2x8x1xf32> to vector<2x8x8xf32>
    %182 = arith.mulf %177, %181 : vector<2x8x8xf32>
    %183 = arith.truncf %182 : vector<2x8x8xf32> to vector<2x8x8xbf16>
    "tpu.trace_start"() <{level = 10 : i32, message = "bqk,bkd->bqd"}> : () -> ()
    %cst_55 = arith.constant dense<0.000000e+00> : vector<2x8x8xf32>
    %184 = tpu.matmul %183, %171, %cst_55 {dimension_numbers = #tpu.dot_dimension_numbers<[2], [1], [1], [2], [0, 0, 0, 1, 1, 2], [0], [0]>} : vector<2x8x8xbf16>, vector<2x8x8xbf16>, vector<2x8x8xf32> -> vector<2x8x8xf32>
    "tpu.trace_stop"() : () -> ()
    %185 = vector.shape_cast %184 : vector<2x8x8xf32> to vector<16x8xf32>
    %186 = vector.extract_strided_slice %162 {offsets = [0, 8], sizes = [16, 8], strides = [1, 1]} : vector<16x32xf32> to vector<16x8xf32>
    %187 = vector.shape_cast %186 : vector<16x8xf32> to vector<2x8x8xf32>
    %188 = arith.truncf %187 : vector<2x8x8xf32> to vector<2x8x8xbf16>
    %189 = vector.extract_strided_slice %157 {offsets = [0, 8], sizes = [16, 8], strides = [1, 1]} : vector<16x32xf32> to vector<16x8xf32>
    %190 = vector.shape_cast %189 : vector<16x8xf32> to vector<2x8x8xf32>
    %191 = arith.truncf %190 : vector<2x8x8xf32> to vector<2x8x8xbf16>
    %192 = vector.extract_strided_slice %160 {offsets = [0, 8], sizes = [16, 8], strides = [1, 1]} : vector<16x32xf32> to vector<16x8xf32>
    %193 = vector.shape_cast %192 : vector<16x8xf32> to vector<2x8x8xf32>
    %194 = arith.truncf %193 : vector<2x8x8xf32> to vector<2x8x8xbf16>
    "tpu.trace_start"() <{level = 10 : i32, message = "bqd,bkd->bqk"}> : () -> ()
    %cst_56 = arith.constant dense<0.000000e+00> : vector<2x8x8xf32>
    %195 = tpu.matmul %188, %191, %cst_56 {dimension_numbers = #tpu.dot_dimension_numbers<[2], [2], [1], [1], [0, 0, 0, 1, 1, 1], [0], [0]>} : vector<2x8x8xbf16>, vector<2x8x8xbf16>, vector<2x8x8xf32> -> vector<2x8x8xf32>
    "tpu.trace_stop"() : () -> ()
    %cst_57 = arith.constant dense<0xFF800000> : vector<2x8xf32>
    %196 = vector.multi_reduction <maximumf>, %195, %cst_57 [2] : vector<2x8x8xf32> to vector<2x8xf32>
    %197 = vector.shape_cast %196 : vector<2x8xf32> to vector<2x8x1xf32>
    %198 = vector.broadcast %197 : vector<2x8x1xf32> to vector<2x8x8xf32>
    %199 = arith.subf %195, %198 : vector<2x8x8xf32>
    %200 = math.exp %199 : vector<2x8x8xf32>
    %cst_58 = arith.constant dense<0.000000e+00> : vector<2x8xf32>
    %201 = vector.multi_reduction <add>, %200, %cst_58 [2] : vector<2x8x8xf32> to vector<2x8xf32>
    %202 = vector.shape_cast %201 : vector<2x8xf32> to vector<2x8x1xf32>
    %203 = tpu.reciprocal %202 {approx = true} : vector<2x8x1xf32> -> vector<2x8x1xf32>
    %204 = vector.broadcast %203 : vector<2x8x1xf32> to vector<2x8x8xf32>
    %205 = arith.mulf %200, %204 : vector<2x8x8xf32>
    %206 = arith.truncf %205 : vector<2x8x8xf32> to vector<2x8x8xbf16>
    "tpu.trace_start"() <{level = 10 : i32, message = "bqk,bkd->bqd"}> : () -> ()
    %cst_59 = arith.constant dense<0.000000e+00> : vector<2x8x8xf32>
    %207 = tpu.matmul %206, %194, %cst_59 {dimension_numbers = #tpu.dot_dimension_numbers<[2], [1], [1], [2], [0, 0, 0, 1, 1, 2], [0], [0]>} : vector<2x8x8xbf16>, vector<2x8x8xbf16>, vector<2x8x8xf32> -> vector<2x8x8xf32>
    "tpu.trace_stop"() : () -> ()
    %208 = vector.shape_cast %207 : vector<2x8x8xf32> to vector<16x8xf32>
    %209 = vector.extract_strided_slice %162 {offsets = [0, 16], sizes = [16, 8], strides = [1, 1]} : vector<16x32xf32> to vector<16x8xf32>
    %210 = vector.shape_cast %209 : vector<16x8xf32> to vector<2x8x8xf32>
    %211 = arith.truncf %210 : vector<2x8x8xf32> to vector<2x8x8xbf16>
    %212 = vector.extract_strided_slice %157 {offsets = [0, 16], sizes = [16, 8], strides = [1, 1]} : vector<16x32xf32> to vector<16x8xf32>
    %213 = vector.shape_cast %212 : vector<16x8xf32> to vector<2x8x8xf32>
    %214 = arith.truncf %213 : vector<2x8x8xf32> to vector<2x8x8xbf16>
    %215 = vector.extract_strided_slice %160 {offsets = [0, 16], sizes = [16, 8], strides = [1, 1]} : vector<16x32xf32> to vector<16x8xf32>
    %216 = vector.shape_cast %215 : vector<16x8xf32> to vector<2x8x8xf32>
    %217 = arith.truncf %216 : vector<2x8x8xf32> to vector<2x8x8xbf16>
    "tpu.trace_start"() <{level = 10 : i32, message = "bqd,bkd->bqk"}> : () -> ()
    %cst_60 = arith.constant dense<0.000000e+00> : vector<2x8x8xf32>
    %218 = tpu.matmul %211, %214, %cst_60 {dimension_numbers = #tpu.dot_dimension_numbers<[2], [2], [1], [1], [0, 0, 0, 1, 1, 1], [0], [0]>} : vector<2x8x8xbf16>, vector<2x8x8xbf16>, vector<2x8x8xf32> -> vector<2x8x8xf32>
    "tpu.trace_stop"() : () -> ()
    %cst_61 = arith.constant dense<0xFF800000> : vector<2x8xf32>
    %219 = vector.multi_reduction <maximumf>, %218, %cst_61 [2] : vector<2x8x8xf32> to vector<2x8xf32>
    %220 = vector.shape_cast %219 : vector<2x8xf32> to vector<2x8x1xf32>
    %221 = vector.broadcast %220 : vector<2x8x1xf32> to vector<2x8x8xf32>
    %222 = arith.subf %218, %221 : vector<2x8x8xf32>
    %223 = math.exp %222 : vector<2x8x8xf32>
    %cst_62 = arith.constant dense<0.000000e+00> : vector<2x8xf32>
    %224 = vector.multi_reduction <add>, %223, %cst_62 [2] : vector<2x8x8xf32> to vector<2x8xf32>
    %225 = vector.shape_cast %224 : vector<2x8xf32> to vector<2x8x1xf32>
    %226 = tpu.reciprocal %225 {approx = true} : vector<2x8x1xf32> -> vector<2x8x1xf32>
    %227 = vector.broadcast %226 : vector<2x8x1xf32> to vector<2x8x8xf32>
    %228 = arith.mulf %223, %227 : vector<2x8x8xf32>
    %229 = arith.truncf %228 : vector<2x8x8xf32> to vector<2x8x8xbf16>
    "tpu.trace_start"() <{level = 10 : i32, message = "bqk,bkd->bqd"}> : () -> ()
    %cst_63 = arith.constant dense<0.000000e+00> : vector<2x8x8xf32>
    %230 = tpu.matmul %229, %217, %cst_63 {dimension_numbers = #tpu.dot_dimension_numbers<[2], [1], [1], [2], [0, 0, 0, 1, 1, 2], [0], [0]>} : vector<2x8x8xbf16>, vector<2x8x8xbf16>, vector<2x8x8xf32> -> vector<2x8x8xf32>
    "tpu.trace_stop"() : () -> ()
    %231 = vector.shape_cast %230 : vector<2x8x8xf32> to vector<16x8xf32>
    %232 = vector.extract_strided_slice %162 {offsets = [0, 24], sizes = [16, 8], strides = [1, 1]} : vector<16x32xf32> to vector<16x8xf32>
    %233 = vector.shape_cast %232 : vector<16x8xf32> to vector<2x8x8xf32>
    %234 = arith.truncf %233 : vector<2x8x8xf32> to vector<2x8x8xbf16>
    %235 = vector.extract_strided_slice %157 {offsets = [0, 24], sizes = [16, 8], strides = [1, 1]} : vector<16x32xf32> to vector<16x8xf32>
    %236 = vector.shape_cast %235 : vector<16x8xf32> to vector<2x8x8xf32>
    %237 = arith.truncf %236 : vector<2x8x8xf32> to vector<2x8x8xbf16>
    %238 = vector.extract_strided_slice %160 {offsets = [0, 24], sizes = [16, 8], strides = [1, 1]} : vector<16x32xf32> to vector<16x8xf32>
    %239 = vector.shape_cast %238 : vector<16x8xf32> to vector<2x8x8xf32>
    %240 = arith.truncf %239 : vector<2x8x8xf32> to vector<2x8x8xbf16>
    "tpu.trace_start"() <{level = 10 : i32, message = "bqd,bkd->bqk"}> : () -> ()
    %cst_64 = arith.constant dense<0.000000e+00> : vector<2x8x8xf32>
    %241 = tpu.matmul %234, %237, %cst_64 {dimension_numbers = #tpu.dot_dimension_numbers<[2], [2], [1], [1], [0, 0, 0, 1, 1, 1], [0], [0]>} : vector<2x8x8xbf16>, vector<2x8x8xbf16>, vector<2x8x8xf32> -> vector<2x8x8xf32>
    "tpu.trace_stop"() : () -> ()
    %cst_65 = arith.constant dense<0xFF800000> : vector<2x8xf32>
    %242 = vector.multi_reduction <maximumf>, %241, %cst_65 [2] : vector<2x8x8xf32> to vector<2x8xf32>
    %243 = vector.shape_cast %242 : vector<2x8xf32> to vector<2x8x1xf32>
    %244 = vector.broadcast %243 : vector<2x8x1xf32> to vector<2x8x8xf32>
    %245 = arith.subf %241, %244 : vector<2x8x8xf32>
    %246 = math.exp %245 : vector<2x8x8xf32>
    %cst_66 = arith.constant dense<0.000000e+00> : vector<2x8xf32>
    %247 = vector.multi_reduction <add>, %246, %cst_66 [2] : vector<2x8x8xf32> to vector<2x8xf32>
    %248 = vector.shape_cast %247 : vector<2x8xf32> to vector<2x8x1xf32>
    %249 = tpu.reciprocal %248 {approx = true} : vector<2x8x1xf32> -> vector<2x8x1xf32>
    %250 = vector.broadcast %249 : vector<2x8x1xf32> to vector<2x8x8xf32>
    %251 = arith.mulf %246, %250 : vector<2x8x8xf32>
    %252 = arith.truncf %251 : vector<2x8x8xf32> to vector<2x8x8xbf16>
    "tpu.trace_start"() <{level = 10 : i32, message = "bqk,bkd->bqd"}> : () -> ()
    %cst_67 = arith.constant dense<0.000000e+00> : vector<2x8x8xf32>
    %253 = tpu.matmul %252, %240, %cst_67 {dimension_numbers = #tpu.dot_dimension_numbers<[2], [1], [1], [2], [0, 0, 0, 1, 1, 2], [0], [0]>} : vector<2x8x8xbf16>, vector<2x8x8xbf16>, vector<2x8x8xf32> -> vector<2x8x8xf32>
    "tpu.trace_stop"() : () -> ()
    %254 = vector.shape_cast %253 : vector<2x8x8xf32> to vector<16x8xf32>
    %255 = tpu.concatenate %185, %208, %231, %254 in 1 : vector<16x8xf32>, vector<16x8xf32>, vector<16x8xf32>, vector<16x8xf32> -> vector<16x32xf32>
    %256 = arith.truncf %255 : vector<16x32xf32> to vector<16x32xbf16>
    %cst_68 = arith.constant dense<0.000000e+00> : vector<16x32xf32>
    %257 = tpu.matmul %256, %147, %cst_68 {dimension_numbers = #tpu.dot_dimension_numbers<[1], [0], [0], [1], [0, 0, 1, 1], [], []>} : vector<16x32xbf16>, vector<32x32xbf16>, vector<16x32xf32> -> vector<16x32xf32>
    %258 = vector.broadcast %151 : vector<1x32xf32> to vector<16x32xf32>
    %259 = arith.addf %257, %258 : vector<16x32xf32>
    %260 = arith.addf %142, %259 : vector<16x32xf32>
    %c10 = arith.constant 10 : index
    %c0_69 = arith.constant 0 : index
    %261 = vector.load %arg4[%c10, %c0_69] : memref<34x64xf32, #tpu.memory_space<vmem>>, vector<1x32xf32>
    %c11 = arith.constant 11 : index
    %c0_70 = arith.constant 0 : index
    %262 = vector.load %arg4[%c11, %c0_70] : memref<34x64xf32, #tpu.memory_space<vmem>>, vector<1x32xf32>
    %cst_71 = arith.constant dense<0.000000e+00> : vector<16xf32>
    %263 = vector.multi_reduction <add>, %260, %cst_71 [1] : vector<16x32xf32> to vector<16xf32>
    %264 = vector.shape_cast %263 : vector<16xf32> to vector<16x1xf32>
    %cst_72 = arith.constant 3.200000e+01 : f32
    %265 = vector.broadcast %cst_72 : f32 to vector<16x1xf32>
    %266 = arith.divf %264, %265 : vector<16x1xf32>
    %267 = vector.broadcast %266 : vector<16x1xf32> to vector<16x32xf32>
    %268 = arith.subf %260, %267 : vector<16x32xf32>
    %269 = arith.mulf %268, %268 : vector<16x32xf32>
    %cst_73 = arith.constant dense<0.000000e+00> : vector<16xf32>
    %270 = vector.multi_reduction <add>, %269, %cst_73 [1] : vector<16x32xf32> to vector<16xf32>
    %271 = vector.shape_cast %270 : vector<16xf32> to vector<16x1xf32>
    %cst_74 = arith.constant 3.200000e+01 : f32
    %272 = vector.broadcast %cst_74 : f32 to vector<16x1xf32>
    %273 = arith.divf %271, %272 : vector<16x1xf32>
    %cst_75 = arith.constant 9.99999974E-6 : f32
    %274 = vector.broadcast %cst_75 : f32 to vector<16x1xf32>
    %275 = arith.addf %273, %274 : vector<16x1xf32>
    %276 = math.rsqrt %275 : vector<16x1xf32>
    %277 = vector.broadcast %276 : vector<16x1xf32> to vector<16x32xf32>
    %278 = arith.mulf %268, %277 : vector<16x32xf32>
    %279 = vector.broadcast %261 : vector<1x32xf32> to vector<16x32xf32>
    %280 = arith.mulf %278, %279 : vector<16x32xf32>
    %281 = vector.broadcast %262 : vector<1x32xf32> to vector<16x32xf32>
    %282 = arith.addf %280, %281 : vector<16x32xf32>
    %283 = arith.truncf %282 : vector<16x32xf32> to vector<16x32xbf16>
    %c0_76 = arith.constant 0 : index
    %c0_77 = arith.constant 0 : index
    %284 = vector.load %arg3[%c0_76, %c0_77] : memref<64x64xbf16, #tpu.memory_space<vmem>>, vector<32x64xbf16>
    %cst_78 = arith.constant dense<0.000000e+00> : vector<16x64xf32>
    %285 = tpu.matmul %283, %284, %cst_78 {dimension_numbers = #tpu.dot_dimension_numbers<[1], [0], [0], [1], [0, 0, 1, 1], [], []>} : vector<16x32xbf16>, vector<32x64xbf16>, vector<16x64xf32> -> vector<16x64xf32>
    %c14 = arith.constant 14 : index
    %c0_79 = arith.constant 0 : index
    %286 = vector.load %arg4[%c14, %c0_79] : memref<34x64xf32, #tpu.memory_space<vmem>>, vector<1x64xf32>
    %287 = vector.broadcast %286 : vector<1x64xf32> to vector<16x64xf32>
    %288 = arith.addf %285, %287 : vector<16x64xf32>
    %cst_80 = arith.constant 0.000000e+00 : f32
    %289 = vector.broadcast %cst_80 : f32 to vector<16x64xf32>
    %290 = arith.maximumf %288, %289 : vector<16x64xf32>
    %291 = arith.truncf %290 : vector<16x64xf32> to vector<16x64xbf16>
    %c256 = arith.constant 256 : index
    %c0_81 = arith.constant 0 : index
    %292 = vector.load %arg2[%c256, %c0_81] : memref<640x32xbf16, #tpu.memory_space<vmem>>, vector<64x32xbf16>
    %cst_82 = arith.constant dense<0.000000e+00> : vector<16x32xf32>
    %293 = tpu.matmul %291, %292, %cst_82 {dimension_numbers = #tpu.dot_dimension_numbers<[1], [0], [0], [1], [0, 0, 1, 1], [], []>} : vector<16x64xbf16>, vector<64x32xbf16>, vector<16x32xf32> -> vector<16x32xf32>
    %c15 = arith.constant 15 : index
    %c0_83 = arith.constant 0 : index
    %294 = vector.load %arg4[%c15, %c0_83] : memref<34x64xf32, #tpu.memory_space<vmem>>, vector<1x32xf32>
    %295 = vector.broadcast %294 : vector<1x32xf32> to vector<16x32xf32>
    %296 = arith.addf %293, %295 : vector<16x32xf32>
    %297 = arith.addf %282, %296 : vector<16x32xf32>
    %c12 = arith.constant 12 : index
    %c0_84 = arith.constant 0 : index
    %298 = vector.load %arg4[%c12, %c0_84] : memref<34x64xf32, #tpu.memory_space<vmem>>, vector<1x32xf32>
    %c13 = arith.constant 13 : index
    %c0_85 = arith.constant 0 : index
    %299 = vector.load %arg4[%c13, %c0_85] : memref<34x64xf32, #tpu.memory_space<vmem>>, vector<1x32xf32>
    %cst_86 = arith.constant dense<0.000000e+00> : vector<16xf32>
    %300 = vector.multi_reduction <add>, %297, %cst_86 [1] : vector<16x32xf32> to vector<16xf32>
    %301 = vector.shape_cast %300 : vector<16xf32> to vector<16x1xf32>
    %cst_87 = arith.constant 3.200000e+01 : f32
    %302 = vector.broadcast %cst_87 : f32 to vector<16x1xf32>
    %303 = arith.divf %301, %302 : vector<16x1xf32>
    %304 = vector.broadcast %303 : vector<16x1xf32> to vector<16x32xf32>
    %305 = arith.subf %297, %304 : vector<16x32xf32>
    %306 = arith.mulf %305, %305 : vector<16x32xf32>
    %cst_88 = arith.constant dense<0.000000e+00> : vector<16xf32>
    %307 = vector.multi_reduction <add>, %306, %cst_88 [1] : vector<16x32xf32> to vector<16xf32>
    %308 = vector.shape_cast %307 : vector<16xf32> to vector<16x1xf32>
    %cst_89 = arith.constant 3.200000e+01 : f32
    %309 = vector.broadcast %cst_89 : f32 to vector<16x1xf32>
    %310 = arith.divf %308, %309 : vector<16x1xf32>
    %cst_90 = arith.constant 9.99999974E-6 : f32
    %311 = vector.broadcast %cst_90 : f32 to vector<16x1xf32>
    %312 = arith.addf %310, %311 : vector<16x1xf32>
    %313 = math.rsqrt %312 : vector<16x1xf32>
    %314 = vector.broadcast %313 : vector<16x1xf32> to vector<16x32xf32>
    %315 = arith.mulf %305, %314 : vector<16x32xf32>
    %316 = vector.broadcast %298 : vector<1x32xf32> to vector<16x32xf32>
    %317 = arith.mulf %315, %316 : vector<16x32xf32>
    %318 = vector.broadcast %299 : vector<1x32xf32> to vector<16x32xf32>
    %319 = arith.addf %317, %318 : vector<16x32xf32>
    %320 = arith.truncf %319 : vector<16x32xf32> to vector<16x32xbf16>
    %c320 = arith.constant 320 : index
    %c0_91 = arith.constant 0 : index
    %321 = vector.load %arg2[%c320, %c0_91] : memref<640x32xbf16, #tpu.memory_space<vmem>>, vector<32x32xbf16>
    %c352 = arith.constant 352 : index
    %c0_92 = arith.constant 0 : index
    %322 = vector.load %arg2[%c352, %c0_92] : memref<640x32xbf16, #tpu.memory_space<vmem>>, vector<32x32xbf16>
    %c384 = arith.constant 384 : index
    %c0_93 = arith.constant 0 : index
    %323 = vector.load %arg2[%c384, %c0_93] : memref<640x32xbf16, #tpu.memory_space<vmem>>, vector<32x32xbf16>
    %c416 = arith.constant 416 : index
    %c0_94 = arith.constant 0 : index
    %324 = vector.load %arg2[%c416, %c0_94] : memref<640x32xbf16, #tpu.memory_space<vmem>>, vector<32x32xbf16>
    %c16 = arith.constant 16 : index
    %c0_95 = arith.constant 0 : index
    %325 = vector.load %arg4[%c16, %c0_95] : memref<34x64xf32, #tpu.memory_space<vmem>>, vector<1x32xf32>
    %c17 = arith.constant 17 : index
    %c0_96 = arith.constant 0 : index
    %326 = vector.load %arg4[%c17, %c0_96] : memref<34x64xf32, #tpu.memory_space<vmem>>, vector<1x32xf32>
    %c18 = arith.constant 18 : index
    %c0_97 = arith.constant 0 : index
    %327 = vector.load %arg4[%c18, %c0_97] : memref<34x64xf32, #tpu.memory_space<vmem>>, vector<1x32xf32>
    %c19 = arith.constant 19 : index
    %c0_98 = arith.constant 0 : index
    %328 = vector.load %arg4[%c19, %c0_98] : memref<34x64xf32, #tpu.memory_space<vmem>>, vector<1x32xf32>
    %cst_99 = arith.constant dense<0.000000e+00> : vector<16x32xf32>
    %329 = tpu.matmul %320, %321, %cst_99 {dimension_numbers = #tpu.dot_dimension_numbers<[1], [0], [0], [1], [0, 0, 1, 1], [], []>} : vector<16x32xbf16>, vector<32x32xbf16>, vector<16x32xf32> -> vector<16x32xf32>
    %330 = vector.broadcast %325 : vector<1x32xf32> to vector<16x32xf32>
    %331 = arith.addf %329, %330 : vector<16x32xf32>
    %cst_100 = arith.constant dense<0.000000e+00> : vector<16x32xf32>
    %332 = tpu.matmul %320, %322, %cst_100 {dimension_numbers = #tpu.dot_dimension_numbers<[1], [0], [0], [1], [0, 0, 1, 1], [], []>} : vector<16x32xbf16>, vector<32x32xbf16>, vector<16x32xf32> -> vector<16x32xf32>
    %333 = vector.broadcast %326 : vector<1x32xf32> to vector<16x32xf32>
    %334 = arith.addf %332, %333 : vector<16x32xf32>
    %cst_101 = arith.constant dense<0.000000e+00> : vector<16x32xf32>
    %335 = tpu.matmul %320, %323, %cst_101 {dimension_numbers = #tpu.dot_dimension_numbers<[1], [0], [0], [1], [0, 0, 1, 1], [], []>} : vector<16x32xbf16>, vector<32x32xbf16>, vector<16x32xf32> -> vector<16x32xf32>
    %336 = vector.broadcast %327 : vector<1x32xf32> to vector<16x32xf32>
    %337 = arith.addf %335, %336 : vector<16x32xf32>
    %cst_102 = arith.constant 0.353553385 : f32
    %338 = vector.broadcast %cst_102 : f32 to vector<16x32xf32>
    %339 = arith.mulf %331, %338 : vector<16x32xf32>
    %340 = vector.extract_strided_slice %339 {offsets = [0, 0], sizes = [16, 8], strides = [1, 1]} : vector<16x32xf32> to vector<16x8xf32>
    %341 = vector.shape_cast %340 : vector<16x8xf32> to vector<2x8x8xf32>
    %342 = arith.truncf %341 : vector<2x8x8xf32> to vector<2x8x8xbf16>
    %343 = vector.extract_strided_slice %334 {offsets = [0, 0], sizes = [16, 8], strides = [1, 1]} : vector<16x32xf32> to vector<16x8xf32>
    %344 = vector.shape_cast %343 : vector<16x8xf32> to vector<2x8x8xf32>
    %345 = arith.truncf %344 : vector<2x8x8xf32> to vector<2x8x8xbf16>
    %346 = vector.extract_strided_slice %337 {offsets = [0, 0], sizes = [16, 8], strides = [1, 1]} : vector<16x32xf32> to vector<16x8xf32>
    %347 = vector.shape_cast %346 : vector<16x8xf32> to vector<2x8x8xf32>
    %348 = arith.truncf %347 : vector<2x8x8xf32> to vector<2x8x8xbf16>
    "tpu.trace_start"() <{level = 10 : i32, message = "bqd,bkd->bqk"}> : () -> ()
    %cst_103 = arith.constant dense<0.000000e+00> : vector<2x8x8xf32>
    %349 = tpu.matmul %342, %345, %cst_103 {dimension_numbers = #tpu.dot_dimension_numbers<[2], [2], [1], [1], [0, 0, 0, 1, 1, 1], [0], [0]>} : vector<2x8x8xbf16>, vector<2x8x8xbf16>, vector<2x8x8xf32> -> vector<2x8x8xf32>
    "tpu.trace_stop"() : () -> ()
    %cst_104 = arith.constant dense<0xFF800000> : vector<2x8xf32>
    %350 = vector.multi_reduction <maximumf>, %349, %cst_104 [2] : vector<2x8x8xf32> to vector<2x8xf32>
    %351 = vector.shape_cast %350 : vector<2x8xf32> to vector<2x8x1xf32>
    %352 = vector.broadcast %351 : vector<2x8x1xf32> to vector<2x8x8xf32>
    %353 = arith.subf %349, %352 : vector<2x8x8xf32>
    %354 = math.exp %353 : vector<2x8x8xf32>
    %cst_105 = arith.constant dense<0.000000e+00> : vector<2x8xf32>
    %355 = vector.multi_reduction <add>, %354, %cst_105 [2] : vector<2x8x8xf32> to vector<2x8xf32>
    %356 = vector.shape_cast %355 : vector<2x8xf32> to vector<2x8x1xf32>
    %357 = tpu.reciprocal %356 {approx = true} : vector<2x8x1xf32> -> vector<2x8x1xf32>
    %358 = vector.broadcast %357 : vector<2x8x1xf32> to vector<2x8x8xf32>
    %359 = arith.mulf %354, %358 : vector<2x8x8xf32>
    %360 = arith.truncf %359 : vector<2x8x8xf32> to vector<2x8x8xbf16>
    "tpu.trace_start"() <{level = 10 : i32, message = "bqk,bkd->bqd"}> : () -> ()
    %cst_106 = arith.constant dense<0.000000e+00> : vector<2x8x8xf32>
    %361 = tpu.matmul %360, %348, %cst_106 {dimension_numbers = #tpu.dot_dimension_numbers<[2], [1], [1], [2], [0, 0, 0, 1, 1, 2], [0], [0]>} : vector<2x8x8xbf16>, vector<2x8x8xbf16>, vector<2x8x8xf32> -> vector<2x8x8xf32>
    "tpu.trace_stop"() : () -> ()
    %362 = vector.shape_cast %361 : vector<2x8x8xf32> to vector<16x8xf32>
    %363 = vector.extract_strided_slice %339 {offsets = [0, 8], sizes = [16, 8], strides = [1, 1]} : vector<16x32xf32> to vector<16x8xf32>
    %364 = vector.shape_cast %363 : vector<16x8xf32> to vector<2x8x8xf32>
    %365 = arith.truncf %364 : vector<2x8x8xf32> to vector<2x8x8xbf16>
    %366 = vector.extract_strided_slice %334 {offsets = [0, 8], sizes = [16, 8], strides = [1, 1]} : vector<16x32xf32> to vector<16x8xf32>
    %367 = vector.shape_cast %366 : vector<16x8xf32> to vector<2x8x8xf32>
    %368 = arith.truncf %367 : vector<2x8x8xf32> to vector<2x8x8xbf16>
    %369 = vector.extract_strided_slice %337 {offsets = [0, 8], sizes = [16, 8], strides = [1, 1]} : vector<16x32xf32> to vector<16x8xf32>
    %370 = vector.shape_cast %369 : vector<16x8xf32> to vector<2x8x8xf32>
    %371 = arith.truncf %370 : vector<2x8x8xf32> to vector<2x8x8xbf16>
    "tpu.trace_start"() <{level = 10 : i32, message = "bqd,bkd->bqk"}> : () -> ()
    %cst_107 = arith.constant dense<0.000000e+00> : vector<2x8x8xf32>
    %372 = tpu.matmul %365, %368, %cst_107 {dimension_numbers = #tpu.dot_dimension_numbers<[2], [2], [1], [1], [0, 0, 0, 1, 1, 1], [0], [0]>} : vector<2x8x8xbf16>, vector<2x8x8xbf16>, vector<2x8x8xf32> -> vector<2x8x8xf32>
    "tpu.trace_stop"() : () -> ()
    %cst_108 = arith.constant dense<0xFF800000> : vector<2x8xf32>
    %373 = vector.multi_reduction <maximumf>, %372, %cst_108 [2] : vector<2x8x8xf32> to vector<2x8xf32>
    %374 = vector.shape_cast %373 : vector<2x8xf32> to vector<2x8x1xf32>
    %375 = vector.broadcast %374 : vector<2x8x1xf32> to vector<2x8x8xf32>
    %376 = arith.subf %372, %375 : vector<2x8x8xf32>
    %377 = math.exp %376 : vector<2x8x8xf32>
    %cst_109 = arith.constant dense<0.000000e+00> : vector<2x8xf32>
    %378 = vector.multi_reduction <add>, %377, %cst_109 [2] : vector<2x8x8xf32> to vector<2x8xf32>
    %379 = vector.shape_cast %378 : vector<2x8xf32> to vector<2x8x1xf32>
    %380 = tpu.reciprocal %379 {approx = true} : vector<2x8x1xf32> -> vector<2x8x1xf32>
    %381 = vector.broadcast %380 : vector<2x8x1xf32> to vector<2x8x8xf32>
    %382 = arith.mulf %377, %381 : vector<2x8x8xf32>
    %383 = arith.truncf %382 : vector<2x8x8xf32> to vector<2x8x8xbf16>
    "tpu.trace_start"() <{level = 10 : i32, message = "bqk,bkd->bqd"}> : () -> ()
    %cst_110 = arith.constant dense<0.000000e+00> : vector<2x8x8xf32>
    %384 = tpu.matmul %383, %371, %cst_110 {dimension_numbers = #tpu.dot_dimension_numbers<[2], [1], [1], [2], [0, 0, 0, 1, 1, 2], [0], [0]>} : vector<2x8x8xbf16>, vector<2x8x8xbf16>, vector<2x8x8xf32> -> vector<2x8x8xf32>
    "tpu.trace_stop"() : () -> ()
    %385 = vector.shape_cast %384 : vector<2x8x8xf32> to vector<16x8xf32>
    %386 = vector.extract_strided_slice %339 {offsets = [0, 16], sizes = [16, 8], strides = [1, 1]} : vector<16x32xf32> to vector<16x8xf32>
    %387 = vector.shape_cast %386 : vector<16x8xf32> to vector<2x8x8xf32>
    %388 = arith.truncf %387 : vector<2x8x8xf32> to vector<2x8x8xbf16>
    %389 = vector.extract_strided_slice %334 {offsets = [0, 16], sizes = [16, 8], strides = [1, 1]} : vector<16x32xf32> to vector<16x8xf32>
    %390 = vector.shape_cast %389 : vector<16x8xf32> to vector<2x8x8xf32>
    %391 = arith.truncf %390 : vector<2x8x8xf32> to vector<2x8x8xbf16>
    %392 = vector.extract_strided_slice %337 {offsets = [0, 16], sizes = [16, 8], strides = [1, 1]} : vector<16x32xf32> to vector<16x8xf32>
    %393 = vector.shape_cast %392 : vector<16x8xf32> to vector<2x8x8xf32>
    %394 = arith.truncf %393 : vector<2x8x8xf32> to vector<2x8x8xbf16>
    "tpu.trace_start"() <{level = 10 : i32, message = "bqd,bkd->bqk"}> : () -> ()
    %cst_111 = arith.constant dense<0.000000e+00> : vector<2x8x8xf32>
    %395 = tpu.matmul %388, %391, %cst_111 {dimension_numbers = #tpu.dot_dimension_numbers<[2], [2], [1], [1], [0, 0, 0, 1, 1, 1], [0], [0]>} : vector<2x8x8xbf16>, vector<2x8x8xbf16>, vector<2x8x8xf32> -> vector<2x8x8xf32>
    "tpu.trace_stop"() : () -> ()
    %cst_112 = arith.constant dense<0xFF800000> : vector<2x8xf32>
    %396 = vector.multi_reduction <maximumf>, %395, %cst_112 [2] : vector<2x8x8xf32> to vector<2x8xf32>
    %397 = vector.shape_cast %396 : vector<2x8xf32> to vector<2x8x1xf32>
    %398 = vector.broadcast %397 : vector<2x8x1xf32> to vector<2x8x8xf32>
    %399 = arith.subf %395, %398 : vector<2x8x8xf32>
    %400 = math.exp %399 : vector<2x8x8xf32>
    %cst_113 = arith.constant dense<0.000000e+00> : vector<2x8xf32>
    %401 = vector.multi_reduction <add>, %400, %cst_113 [2] : vector<2x8x8xf32> to vector<2x8xf32>
    %402 = vector.shape_cast %401 : vector<2x8xf32> to vector<2x8x1xf32>
    %403 = tpu.reciprocal %402 {approx = true} : vector<2x8x1xf32> -> vector<2x8x1xf32>
    %404 = vector.broadcast %403 : vector<2x8x1xf32> to vector<2x8x8xf32>
    %405 = arith.mulf %400, %404 : vector<2x8x8xf32>
    %406 = arith.truncf %405 : vector<2x8x8xf32> to vector<2x8x8xbf16>
    "tpu.trace_start"() <{level = 10 : i32, message = "bqk,bkd->bqd"}> : () -> ()
    %cst_114 = arith.constant dense<0.000000e+00> : vector<2x8x8xf32>
    %407 = tpu.matmul %406, %394, %cst_114 {dimension_numbers = #tpu.dot_dimension_numbers<[2], [1], [1], [2], [0, 0, 0, 1, 1, 2], [0], [0]>} : vector<2x8x8xbf16>, vector<2x8x8xbf16>, vector<2x8x8xf32> -> vector<2x8x8xf32>
    "tpu.trace_stop"() : () -> ()
    %408 = vector.shape_cast %407 : vector<2x8x8xf32> to vector<16x8xf32>
    %409 = vector.extract_strided_slice %339 {offsets = [0, 24], sizes = [16, 8], strides = [1, 1]} : vector<16x32xf32> to vector<16x8xf32>
    %410 = vector.shape_cast %409 : vector<16x8xf32> to vector<2x8x8xf32>
    %411 = arith.truncf %410 : vector<2x8x8xf32> to vector<2x8x8xbf16>
    %412 = vector.extract_strided_slice %334 {offsets = [0, 24], sizes = [16, 8], strides = [1, 1]} : vector<16x32xf32> to vector<16x8xf32>
    %413 = vector.shape_cast %412 : vector<16x8xf32> to vector<2x8x8xf32>
    %414 = arith.truncf %413 : vector<2x8x8xf32> to vector<2x8x8xbf16>
    %415 = vector.extract_strided_slice %337 {offsets = [0, 24], sizes = [16, 8], strides = [1, 1]} : vector<16x32xf32> to vector<16x8xf32>
    %416 = vector.shape_cast %415 : vector<16x8xf32> to vector<2x8x8xf32>
    %417 = arith.truncf %416 : vector<2x8x8xf32> to vector<2x8x8xbf16>
    "tpu.trace_start"() <{level = 10 : i32, message = "bqd,bkd->bqk"}> : () -> ()
    %cst_115 = arith.constant dense<0.000000e+00> : vector<2x8x8xf32>
    %418 = tpu.matmul %411, %414, %cst_115 {dimension_numbers = #tpu.dot_dimension_numbers<[2], [2], [1], [1], [0, 0, 0, 1, 1, 1], [0], [0]>} : vector<2x8x8xbf16>, vector<2x8x8xbf16>, vector<2x8x8xf32> -> vector<2x8x8xf32>
    "tpu.trace_stop"() : () -> ()
    %cst_116 = arith.constant dense<0xFF800000> : vector<2x8xf32>
    %419 = vector.multi_reduction <maximumf>, %418, %cst_116 [2] : vector<2x8x8xf32> to vector<2x8xf32>
    %420 = vector.shape_cast %419 : vector<2x8xf32> to vector<2x8x1xf32>
    %421 = vector.broadcast %420 : vector<2x8x1xf32> to vector<2x8x8xf32>
    %422 = arith.subf %418, %421 : vector<2x8x8xf32>
    %423 = math.exp %422 : vector<2x8x8xf32>
    %cst_117 = arith.constant dense<0.000000e+00> : vector<2x8xf32>
    %424 = vector.multi_reduction <add>, %423, %cst_117 [2] : vector<2x8x8xf32> to vector<2x8xf32>
    %425 = vector.shape_cast %424 : vector<2x8xf32> to vector<2x8x1xf32>
    %426 = tpu.reciprocal %425 {approx = true} : vector<2x8x1xf32> -> vector<2x8x1xf32>
    %427 = vector.broadcast %426 : vector<2x8x1xf32> to vector<2x8x8xf32>
    %428 = arith.mulf %423, %427 : vector<2x8x8xf32>
    %429 = arith.truncf %428 : vector<2x8x8xf32> to vector<2x8x8xbf16>
    "tpu.trace_start"() <{level = 10 : i32, message = "bqk,bkd->bqd"}> : () -> ()
    %cst_118 = arith.constant dense<0.000000e+00> : vector<2x8x8xf32>
    %430 = tpu.matmul %429, %417, %cst_118 {dimension_numbers = #tpu.dot_dimension_numbers<[2], [1], [1], [2], [0, 0, 0, 1, 1, 2], [0], [0]>} : vector<2x8x8xbf16>, vector<2x8x8xbf16>, vector<2x8x8xf32> -> vector<2x8x8xf32>
    "tpu.trace_stop"() : () -> ()
    %431 = vector.shape_cast %430 : vector<2x8x8xf32> to vector<16x8xf32>
    %432 = tpu.concatenate %362, %385, %408, %431 in 1 : vector<16x8xf32>, vector<16x8xf32>, vector<16x8xf32>, vector<16x8xf32> -> vector<16x32xf32>
    %433 = arith.truncf %432 : vector<16x32xf32> to vector<16x32xbf16>
    %cst_119 = arith.constant dense<0.000000e+00> : vector<16x32xf32>
    %434 = tpu.matmul %433, %324, %cst_119 {dimension_numbers = #tpu.dot_dimension_numbers<[1], [0], [0], [1], [0, 0, 1, 1], [], []>} : vector<16x32xbf16>, vector<32x32xbf16>, vector<16x32xf32> -> vector<16x32xf32>
    %435 = vector.broadcast %328 : vector<1x32xf32> to vector<16x32xf32>
    %436 = arith.addf %434, %435 : vector<16x32xf32>
    %437 = arith.addf %319, %436 : vector<16x32xf32>
    %c24 = arith.constant 24 : index
    %c0_120 = arith.constant 0 : index
    %438 = vector.load %arg4[%c24, %c0_120] : memref<34x64xf32, #tpu.memory_space<vmem>>, vector<1x32xf32>
    %c25 = arith.constant 25 : index
    %c0_121 = arith.constant 0 : index
    %439 = vector.load %arg4[%c25, %c0_121] : memref<34x64xf32, #tpu.memory_space<vmem>>, vector<1x32xf32>
    %cst_122 = arith.constant dense<0.000000e+00> : vector<16xf32>
    %440 = vector.multi_reduction <add>, %437, %cst_122 [1] : vector<16x32xf32> to vector<16xf32>
    %441 = vector.shape_cast %440 : vector<16xf32> to vector<16x1xf32>
    %cst_123 = arith.constant 3.200000e+01 : f32
    %442 = vector.broadcast %cst_123 : f32 to vector<16x1xf32>
    %443 = arith.divf %441, %442 : vector<16x1xf32>
    %444 = vector.broadcast %443 : vector<16x1xf32> to vector<16x32xf32>
    %445 = arith.subf %437, %444 : vector<16x32xf32>
    %446 = arith.mulf %445, %445 : vector<16x32xf32>
    %cst_124 = arith.constant dense<0.000000e+00> : vector<16xf32>
    %447 = vector.multi_reduction <add>, %446, %cst_124 [1] : vector<16x32xf32> to vector<16xf32>
    %448 = vector.shape_cast %447 : vector<16xf32> to vector<16x1xf32>
    %cst_125 = arith.constant 3.200000e+01 : f32
    %449 = vector.broadcast %cst_125 : f32 to vector<16x1xf32>
    %450 = arith.divf %448, %449 : vector<16x1xf32>
    %cst_126 = arith.constant 9.99999974E-6 : f32
    %451 = vector.broadcast %cst_126 : f32 to vector<16x1xf32>
    %452 = arith.addf %450, %451 : vector<16x1xf32>
    %453 = math.rsqrt %452 : vector<16x1xf32>
    %454 = vector.broadcast %453 : vector<16x1xf32> to vector<16x32xf32>
    %455 = arith.mulf %445, %454 : vector<16x32xf32>
    %456 = vector.broadcast %438 : vector<1x32xf32> to vector<16x32xf32>
    %457 = arith.mulf %455, %456 : vector<16x32xf32>
    %458 = vector.broadcast %439 : vector<1x32xf32> to vector<16x32xf32>
    %459 = arith.addf %457, %458 : vector<16x32xf32>
    %460 = arith.truncf %459 : vector<16x32xf32> to vector<16x32xbf16>
    %c448 = arith.constant 448 : index
    %c0_127 = arith.constant 0 : index
    %461 = vector.load %arg2[%c448, %c0_127] : memref<640x32xbf16, #tpu.memory_space<vmem>>, vector<32x32xbf16>
    %c480 = arith.constant 480 : index
    %c0_128 = arith.constant 0 : index
    %462 = vector.load %arg2[%c480, %c0_128] : memref<640x32xbf16, #tpu.memory_space<vmem>>, vector<32x32xbf16>
    %c512 = arith.constant 512 : index
    %c0_129 = arith.constant 0 : index
    %463 = vector.load %arg2[%c512, %c0_129] : memref<640x32xbf16, #tpu.memory_space<vmem>>, vector<32x32xbf16>
    %c544 = arith.constant 544 : index
    %c0_130 = arith.constant 0 : index
    %464 = vector.load %arg2[%c544, %c0_130] : memref<640x32xbf16, #tpu.memory_space<vmem>>, vector<32x32xbf16>
    %c20 = arith.constant 20 : index
    %c0_131 = arith.constant 0 : index
    %465 = vector.load %arg4[%c20, %c0_131] : memref<34x64xf32, #tpu.memory_space<vmem>>, vector<1x32xf32>
    %c21 = arith.constant 21 : index
    %c0_132 = arith.constant 0 : index
    %466 = vector.load %arg4[%c21, %c0_132] : memref<34x64xf32, #tpu.memory_space<vmem>>, vector<1x32xf32>
    %c22 = arith.constant 22 : index
    %c0_133 = arith.constant 0 : index
    %467 = vector.load %arg4[%c22, %c0_133] : memref<34x64xf32, #tpu.memory_space<vmem>>, vector<1x32xf32>
    %c23 = arith.constant 23 : index
    %c0_134 = arith.constant 0 : index
    %468 = vector.load %arg4[%c23, %c0_134] : memref<34x64xf32, #tpu.memory_space<vmem>>, vector<1x32xf32>
    %cst_135 = arith.constant dense<0.000000e+00> : vector<16x32xf32>
    %469 = tpu.matmul %460, %461, %cst_135 {dimension_numbers = #tpu.dot_dimension_numbers<[1], [0], [0], [1], [0, 0, 1, 1], [], []>} : vector<16x32xbf16>, vector<32x32xbf16>, vector<16x32xf32> -> vector<16x32xf32>
    %470 = vector.broadcast %465 : vector<1x32xf32> to vector<16x32xf32>
    %471 = arith.addf %469, %470 : vector<16x32xf32>
    %cst_136 = arith.constant dense<0.000000e+00> : vector<16x32xf32>
    %472 = tpu.matmul %2, %462, %cst_136 {dimension_numbers = #tpu.dot_dimension_numbers<[1], [0], [0], [1], [0, 0, 1, 1], [], []>} : vector<16x32xbf16>, vector<32x32xbf16>, vector<16x32xf32> -> vector<16x32xf32>
    %473 = vector.broadcast %466 : vector<1x32xf32> to vector<16x32xf32>
    %474 = arith.addf %472, %473 : vector<16x32xf32>
    %cst_137 = arith.constant dense<0.000000e+00> : vector<16x32xf32>
    %475 = tpu.matmul %2, %463, %cst_137 {dimension_numbers = #tpu.dot_dimension_numbers<[1], [0], [0], [1], [0, 0, 1, 1], [], []>} : vector<16x32xbf16>, vector<32x32xbf16>, vector<16x32xf32> -> vector<16x32xf32>
    %476 = vector.broadcast %467 : vector<1x32xf32> to vector<16x32xf32>
    %477 = arith.addf %475, %476 : vector<16x32xf32>
    %cst_138 = arith.constant 0.353553385 : f32
    %478 = vector.broadcast %cst_138 : f32 to vector<16x32xf32>
    %479 = arith.mulf %471, %478 : vector<16x32xf32>
    %480 = vector.extract_strided_slice %479 {offsets = [0, 0], sizes = [16, 8], strides = [1, 1]} : vector<16x32xf32> to vector<16x8xf32>
    %481 = vector.shape_cast %480 : vector<16x8xf32> to vector<2x8x8xf32>
    %482 = arith.truncf %481 : vector<2x8x8xf32> to vector<2x8x8xbf16>
    %483 = vector.extract_strided_slice %474 {offsets = [0, 0], sizes = [16, 8], strides = [1, 1]} : vector<16x32xf32> to vector<16x8xf32>
    %484 = vector.shape_cast %483 : vector<16x8xf32> to vector<2x8x8xf32>
    %485 = arith.truncf %484 : vector<2x8x8xf32> to vector<2x8x8xbf16>
    %486 = vector.extract_strided_slice %477 {offsets = [0, 0], sizes = [16, 8], strides = [1, 1]} : vector<16x32xf32> to vector<16x8xf32>
    %487 = vector.shape_cast %486 : vector<16x8xf32> to vector<2x8x8xf32>
    %488 = arith.truncf %487 : vector<2x8x8xf32> to vector<2x8x8xbf16>
    "tpu.trace_start"() <{level = 10 : i32, message = "bqd,bkd->bqk"}> : () -> ()
    %cst_139 = arith.constant dense<0.000000e+00> : vector<2x8x8xf32>
    %489 = tpu.matmul %482, %485, %cst_139 {dimension_numbers = #tpu.dot_dimension_numbers<[2], [2], [1], [1], [0, 0, 0, 1, 1, 1], [0], [0]>} : vector<2x8x8xbf16>, vector<2x8x8xbf16>, vector<2x8x8xf32> -> vector<2x8x8xf32>
    "tpu.trace_stop"() : () -> ()
    %cst_140 = arith.constant dense<0xFF800000> : vector<2x8xf32>
    %490 = vector.multi_reduction <maximumf>, %489, %cst_140 [2] : vector<2x8x8xf32> to vector<2x8xf32>
    %491 = vector.shape_cast %490 : vector<2x8xf32> to vector<2x8x1xf32>
    %492 = vector.broadcast %491 : vector<2x8x1xf32> to vector<2x8x8xf32>
    %493 = arith.subf %489, %492 : vector<2x8x8xf32>
    %494 = math.exp %493 : vector<2x8x8xf32>
    %cst_141 = arith.constant dense<0.000000e+00> : vector<2x8xf32>
    %495 = vector.multi_reduction <add>, %494, %cst_141 [2] : vector<2x8x8xf32> to vector<2x8xf32>
    %496 = vector.shape_cast %495 : vector<2x8xf32> to vector<2x8x1xf32>
    %497 = tpu.reciprocal %496 {approx = true} : vector<2x8x1xf32> -> vector<2x8x1xf32>
    %498 = vector.broadcast %497 : vector<2x8x1xf32> to vector<2x8x8xf32>
    %499 = arith.mulf %494, %498 : vector<2x8x8xf32>
    %500 = arith.truncf %499 : vector<2x8x8xf32> to vector<2x8x8xbf16>
    "tpu.trace_start"() <{level = 10 : i32, message = "bqk,bkd->bqd"}> : () -> ()
    %cst_142 = arith.constant dense<0.000000e+00> : vector<2x8x8xf32>
    %501 = tpu.matmul %500, %488, %cst_142 {dimension_numbers = #tpu.dot_dimension_numbers<[2], [1], [1], [2], [0, 0, 0, 1, 1, 2], [0], [0]>} : vector<2x8x8xbf16>, vector<2x8x8xbf16>, vector<2x8x8xf32> -> vector<2x8x8xf32>
    "tpu.trace_stop"() : () -> ()
    %502 = vector.shape_cast %501 : vector<2x8x8xf32> to vector<16x8xf32>
    %503 = vector.extract_strided_slice %479 {offsets = [0, 8], sizes = [16, 8], strides = [1, 1]} : vector<16x32xf32> to vector<16x8xf32>
    %504 = vector.shape_cast %503 : vector<16x8xf32> to vector<2x8x8xf32>
    %505 = arith.truncf %504 : vector<2x8x8xf32> to vector<2x8x8xbf16>
    %506 = vector.extract_strided_slice %474 {offsets = [0, 8], sizes = [16, 8], strides = [1, 1]} : vector<16x32xf32> to vector<16x8xf32>
    %507 = vector.shape_cast %506 : vector<16x8xf32> to vector<2x8x8xf32>
    %508 = arith.truncf %507 : vector<2x8x8xf32> to vector<2x8x8xbf16>
    %509 = vector.extract_strided_slice %477 {offsets = [0, 8], sizes = [16, 8], strides = [1, 1]} : vector<16x32xf32> to vector<16x8xf32>
    %510 = vector.shape_cast %509 : vector<16x8xf32> to vector<2x8x8xf32>
    %511 = arith.truncf %510 : vector<2x8x8xf32> to vector<2x8x8xbf16>
    "tpu.trace_start"() <{level = 10 : i32, message = "bqd,bkd->bqk"}> : () -> ()
    %cst_143 = arith.constant dense<0.000000e+00> : vector<2x8x8xf32>
    %512 = tpu.matmul %505, %508, %cst_143 {dimension_numbers = #tpu.dot_dimension_numbers<[2], [2], [1], [1], [0, 0, 0, 1, 1, 1], [0], [0]>} : vector<2x8x8xbf16>, vector<2x8x8xbf16>, vector<2x8x8xf32> -> vector<2x8x8xf32>
    "tpu.trace_stop"() : () -> ()
    %cst_144 = arith.constant dense<0xFF800000> : vector<2x8xf32>
    %513 = vector.multi_reduction <maximumf>, %512, %cst_144 [2] : vector<2x8x8xf32> to vector<2x8xf32>
    %514 = vector.shape_cast %513 : vector<2x8xf32> to vector<2x8x1xf32>
    %515 = vector.broadcast %514 : vector<2x8x1xf32> to vector<2x8x8xf32>
    %516 = arith.subf %512, %515 : vector<2x8x8xf32>
    %517 = math.exp %516 : vector<2x8x8xf32>
    %cst_145 = arith.constant dense<0.000000e+00> : vector<2x8xf32>
    %518 = vector.multi_reduction <add>, %517, %cst_145 [2] : vector<2x8x8xf32> to vector<2x8xf32>
    %519 = vector.shape_cast %518 : vector<2x8xf32> to vector<2x8x1xf32>
    %520 = tpu.reciprocal %519 {approx = true} : vector<2x8x1xf32> -> vector<2x8x1xf32>
    %521 = vector.broadcast %520 : vector<2x8x1xf32> to vector<2x8x8xf32>
    %522 = arith.mulf %517, %521 : vector<2x8x8xf32>
    %523 = arith.truncf %522 : vector<2x8x8xf32> to vector<2x8x8xbf16>
    "tpu.trace_start"() <{level = 10 : i32, message = "bqk,bkd->bqd"}> : () -> ()
    %cst_146 = arith.constant dense<0.000000e+00> : vector<2x8x8xf32>
    %524 = tpu.matmul %523, %511, %cst_146 {dimension_numbers = #tpu.dot_dimension_numbers<[2], [1], [1], [2], [0, 0, 0, 1, 1, 2], [0], [0]>} : vector<2x8x8xbf16>, vector<2x8x8xbf16>, vector<2x8x8xf32> -> vector<2x8x8xf32>
    "tpu.trace_stop"() : () -> ()
    %525 = vector.shape_cast %524 : vector<2x8x8xf32> to vector<16x8xf32>
    %526 = vector.extract_strided_slice %479 {offsets = [0, 16], sizes = [16, 8], strides = [1, 1]} : vector<16x32xf32> to vector<16x8xf32>
    %527 = vector.shape_cast %526 : vector<16x8xf32> to vector<2x8x8xf32>
    %528 = arith.truncf %527 : vector<2x8x8xf32> to vector<2x8x8xbf16>
    %529 = vector.extract_strided_slice %474 {offsets = [0, 16], sizes = [16, 8], strides = [1, 1]} : vector<16x32xf32> to vector<16x8xf32>
    %530 = vector.shape_cast %529 : vector<16x8xf32> to vector<2x8x8xf32>
    %531 = arith.truncf %530 : vector<2x8x8xf32> to vector<2x8x8xbf16>
    %532 = vector.extract_strided_slice %477 {offsets = [0, 16], sizes = [16, 8], strides = [1, 1]} : vector<16x32xf32> to vector<16x8xf32>
    %533 = vector.shape_cast %532 : vector<16x8xf32> to vector<2x8x8xf32>
    %534 = arith.truncf %533 : vector<2x8x8xf32> to vector<2x8x8xbf16>
    "tpu.trace_start"() <{level = 10 : i32, message = "bqd,bkd->bqk"}> : () -> ()
    %cst_147 = arith.constant dense<0.000000e+00> : vector<2x8x8xf32>
    %535 = tpu.matmul %528, %531, %cst_147 {dimension_numbers = #tpu.dot_dimension_numbers<[2], [2], [1], [1], [0, 0, 0, 1, 1, 1], [0], [0]>} : vector<2x8x8xbf16>, vector<2x8x8xbf16>, vector<2x8x8xf32> -> vector<2x8x8xf32>
    "tpu.trace_stop"() : () -> ()
    %cst_148 = arith.constant dense<0xFF800000> : vector<2x8xf32>
    %536 = vector.multi_reduction <maximumf>, %535, %cst_148 [2] : vector<2x8x8xf32> to vector<2x8xf32>
    %537 = vector.shape_cast %536 : vector<2x8xf32> to vector<2x8x1xf32>
    %538 = vector.broadcast %537 : vector<2x8x1xf32> to vector<2x8x8xf32>
    %539 = arith.subf %535, %538 : vector<2x8x8xf32>
    %540 = math.exp %539 : vector<2x8x8xf32>
    %cst_149 = arith.constant dense<0.000000e+00> : vector<2x8xf32>
    %541 = vector.multi_reduction <add>, %540, %cst_149 [2] : vector<2x8x8xf32> to vector<2x8xf32>
    %542 = vector.shape_cast %541 : vector<2x8xf32> to vector<2x8x1xf32>
    %543 = tpu.reciprocal %542 {approx = true} : vector<2x8x1xf32> -> vector<2x8x1xf32>
    %544 = vector.broadcast %543 : vector<2x8x1xf32> to vector<2x8x8xf32>
    %545 = arith.mulf %540, %544 : vector<2x8x8xf32>
    %546 = arith.truncf %545 : vector<2x8x8xf32> to vector<2x8x8xbf16>
    "tpu.trace_start"() <{level = 10 : i32, message = "bqk,bkd->bqd"}> : () -> ()
    %cst_150 = arith.constant dense<0.000000e+00> : vector<2x8x8xf32>
    %547 = tpu.matmul %546, %534, %cst_150 {dimension_numbers = #tpu.dot_dimension_numbers<[2], [1], [1], [2], [0, 0, 0, 1, 1, 2], [0], [0]>} : vector<2x8x8xbf16>, vector<2x8x8xbf16>, vector<2x8x8xf32> -> vector<2x8x8xf32>
    "tpu.trace_stop"() : () -> ()
    %548 = vector.shape_cast %547 : vector<2x8x8xf32> to vector<16x8xf32>
    %549 = vector.extract_strided_slice %479 {offsets = [0, 24], sizes = [16, 8], strides = [1, 1]} : vector<16x32xf32> to vector<16x8xf32>
    %550 = vector.shape_cast %549 : vector<16x8xf32> to vector<2x8x8xf32>
    %551 = arith.truncf %550 : vector<2x8x8xf32> to vector<2x8x8xbf16>
    %552 = vector.extract_strided_slice %474 {offsets = [0, 24], sizes = [16, 8], strides = [1, 1]} : vector<16x32xf32> to vector<16x8xf32>
    %553 = vector.shape_cast %552 : vector<16x8xf32> to vector<2x8x8xf32>
    %554 = arith.truncf %553 : vector<2x8x8xf32> to vector<2x8x8xbf16>
    %555 = vector.extract_strided_slice %477 {offsets = [0, 24], sizes = [16, 8], strides = [1, 1]} : vector<16x32xf32> to vector<16x8xf32>
    %556 = vector.shape_cast %555 : vector<16x8xf32> to vector<2x8x8xf32>
    %557 = arith.truncf %556 : vector<2x8x8xf32> to vector<2x8x8xbf16>
    "tpu.trace_start"() <{level = 10 : i32, message = "bqd,bkd->bqk"}> : () -> ()
    %cst_151 = arith.constant dense<0.000000e+00> : vector<2x8x8xf32>
    %558 = tpu.matmul %551, %554, %cst_151 {dimension_numbers = #tpu.dot_dimension_numbers<[2], [2], [1], [1], [0, 0, 0, 1, 1, 1], [0], [0]>} : vector<2x8x8xbf16>, vector<2x8x8xbf16>, vector<2x8x8xf32> -> vector<2x8x8xf32>
    "tpu.trace_stop"() : () -> ()
    %cst_152 = arith.constant dense<0xFF800000> : vector<2x8xf32>
    %559 = vector.multi_reduction <maximumf>, %558, %cst_152 [2] : vector<2x8x8xf32> to vector<2x8xf32>
    %560 = vector.shape_cast %559 : vector<2x8xf32> to vector<2x8x1xf32>
    %561 = vector.broadcast %560 : vector<2x8x1xf32> to vector<2x8x8xf32>
    %562 = arith.subf %558, %561 : vector<2x8x8xf32>
    %563 = math.exp %562 : vector<2x8x8xf32>
    %cst_153 = arith.constant dense<0.000000e+00> : vector<2x8xf32>
    %564 = vector.multi_reduction <add>, %563, %cst_153 [2] : vector<2x8x8xf32> to vector<2x8xf32>
    %565 = vector.shape_cast %564 : vector<2x8xf32> to vector<2x8x1xf32>
    %566 = tpu.reciprocal %565 {approx = true} : vector<2x8x1xf32> -> vector<2x8x1xf32>
    %567 = vector.broadcast %566 : vector<2x8x1xf32> to vector<2x8x8xf32>
    %568 = arith.mulf %563, %567 : vector<2x8x8xf32>
    %569 = arith.truncf %568 : vector<2x8x8xf32> to vector<2x8x8xbf16>
    "tpu.trace_start"() <{level = 10 : i32, message = "bqk,bkd->bqd"}> : () -> ()
    %cst_154 = arith.constant dense<0.000000e+00> : vector<2x8x8xf32>
    %570 = tpu.matmul %569, %557, %cst_154 {dimension_numbers = #tpu.dot_dimension_numbers<[2], [1], [1], [2], [0, 0, 0, 1, 1, 2], [0], [0]>} : vector<2x8x8xbf16>, vector<2x8x8xbf16>, vector<2x8x8xf32> -> vector<2x8x8xf32>
    "tpu.trace_stop"() : () -> ()
    %571 = vector.shape_cast %570 : vector<2x8x8xf32> to vector<16x8xf32>
    %572 = tpu.concatenate %502, %525, %548, %571 in 1 : vector<16x8xf32>, vector<16x8xf32>, vector<16x8xf32>, vector<16x8xf32> -> vector<16x32xf32>
    %573 = arith.truncf %572 : vector<16x32xf32> to vector<16x32xbf16>
    %cst_155 = arith.constant dense<0.000000e+00> : vector<16x32xf32>
    %574 = tpu.matmul %573, %464, %cst_155 {dimension_numbers = #tpu.dot_dimension_numbers<[1], [0], [0], [1], [0, 0, 1, 1], [], []>} : vector<16x32xbf16>, vector<32x32xbf16>, vector<16x32xf32> -> vector<16x32xf32>
    %575 = vector.broadcast %468 : vector<1x32xf32> to vector<16x32xf32>
    %576 = arith.addf %574, %575 : vector<16x32xf32>
    %577 = arith.addf %459, %576 : vector<16x32xf32>
    %c26 = arith.constant 26 : index
    %c0_156 = arith.constant 0 : index
    %578 = vector.load %arg4[%c26, %c0_156] : memref<34x64xf32, #tpu.memory_space<vmem>>, vector<1x32xf32>
    %c27 = arith.constant 27 : index
    %c0_157 = arith.constant 0 : index
    %579 = vector.load %arg4[%c27, %c0_157] : memref<34x64xf32, #tpu.memory_space<vmem>>, vector<1x32xf32>
    %cst_158 = arith.constant dense<0.000000e+00> : vector<16xf32>
    %580 = vector.multi_reduction <add>, %577, %cst_158 [1] : vector<16x32xf32> to vector<16xf32>
    %581 = vector.shape_cast %580 : vector<16xf32> to vector<16x1xf32>
    %cst_159 = arith.constant 3.200000e+01 : f32
    %582 = vector.broadcast %cst_159 : f32 to vector<16x1xf32>
    %583 = arith.divf %581, %582 : vector<16x1xf32>
    %584 = vector.broadcast %583 : vector<16x1xf32> to vector<16x32xf32>
    %585 = arith.subf %577, %584 : vector<16x32xf32>
    %586 = arith.mulf %585, %585 : vector<16x32xf32>
    %cst_160 = arith.constant dense<0.000000e+00> : vector<16xf32>
    %587 = vector.multi_reduction <add>, %586, %cst_160 [1] : vector<16x32xf32> to vector<16xf32>
    %588 = vector.shape_cast %587 : vector<16xf32> to vector<16x1xf32>
    %cst_161 = arith.constant 3.200000e+01 : f32
    %589 = vector.broadcast %cst_161 : f32 to vector<16x1xf32>
    %590 = arith.divf %588, %589 : vector<16x1xf32>
    %cst_162 = arith.constant 9.99999974E-6 : f32
    %591 = vector.broadcast %cst_162 : f32 to vector<16x1xf32>
    %592 = arith.addf %590, %591 : vector<16x1xf32>
    %593 = math.rsqrt %592 : vector<16x1xf32>
    %594 = vector.broadcast %593 : vector<16x1xf32> to vector<16x32xf32>
    %595 = arith.mulf %585, %594 : vector<16x32xf32>
    %596 = vector.broadcast %578 : vector<1x32xf32> to vector<16x32xf32>
    %597 = arith.mulf %595, %596 : vector<16x32xf32>
    %598 = vector.broadcast %579 : vector<1x32xf32> to vector<16x32xf32>
    %599 = arith.addf %597, %598 : vector<16x32xf32>
    %600 = arith.truncf %599 : vector<16x32xf32> to vector<16x32xbf16>
    %c32_163 = arith.constant 32 : index
    %c0_164 = arith.constant 0 : index
    %601 = vector.load %arg3[%c32_163, %c0_164] : memref<64x64xbf16, #tpu.memory_space<vmem>>, vector<32x64xbf16>
    %cst_165 = arith.constant dense<0.000000e+00> : vector<16x64xf32>
    %602 = tpu.matmul %600, %601, %cst_165 {dimension_numbers = #tpu.dot_dimension_numbers<[1], [0], [0], [1], [0, 0, 1, 1], [], []>} : vector<16x32xbf16>, vector<32x64xbf16>, vector<16x64xf32> -> vector<16x64xf32>
    %c30 = arith.constant 30 : index
    %c0_166 = arith.constant 0 : index
    %603 = vector.load %arg4[%c30, %c0_166] : memref<34x64xf32, #tpu.memory_space<vmem>>, vector<1x64xf32>
    %604 = vector.broadcast %603 : vector<1x64xf32> to vector<16x64xf32>
    %605 = arith.addf %602, %604 : vector<16x64xf32>
    %cst_167 = arith.constant 0.000000e+00 : f32
    %606 = vector.broadcast %cst_167 : f32 to vector<16x64xf32>
    %607 = arith.maximumf %605, %606 : vector<16x64xf32>
    %608 = arith.truncf %607 : vector<16x64xf32> to vector<16x64xbf16>
    %c576 = arith.constant 576 : index
    %c0_168 = arith.constant 0 : index
    %609 = vector.load %arg2[%c576, %c0_168] : memref<640x32xbf16, #tpu.memory_space<vmem>>, vector<64x32xbf16>
    %cst_169 = arith.constant dense<0.000000e+00> : vector<16x32xf32>
    %610 = tpu.matmul %608, %609, %cst_169 {dimension_numbers = #tpu.dot_dimension_numbers<[1], [0], [0], [1], [0, 0, 1, 1], [], []>} : vector<16x64xbf16>, vector<64x32xbf16>, vector<16x32xf32> -> vector<16x32xf32>
    %c31 = arith.constant 31 : index
    %c0_170 = arith.constant 0 : index
    %611 = vector.load %arg4[%c31, %c0_170] : memref<34x64xf32, #tpu.memory_space<vmem>>, vector<1x32xf32>
    %612 = vector.broadcast %611 : vector<1x32xf32> to vector<16x32xf32>
    %613 = arith.addf %610, %612 : vector<16x32xf32>
    %614 = arith.addf %599, %613 : vector<16x32xf32>
    %c28 = arith.constant 28 : index
    %c0_171 = arith.constant 0 : index
    %615 = vector.load %arg4[%c28, %c0_171] : memref<34x64xf32, #tpu.memory_space<vmem>>, vector<1x32xf32>
    %c29 = arith.constant 29 : index
    %c0_172 = arith.constant 0 : index
    %616 = vector.load %arg4[%c29, %c0_172] : memref<34x64xf32, #tpu.memory_space<vmem>>, vector<1x32xf32>
    %cst_173 = arith.constant dense<0.000000e+00> : vector<16xf32>
    %617 = vector.multi_reduction <add>, %614, %cst_173 [1] : vector<16x32xf32> to vector<16xf32>
    %618 = vector.shape_cast %617 : vector<16xf32> to vector<16x1xf32>
    %cst_174 = arith.constant 3.200000e+01 : f32
    %619 = vector.broadcast %cst_174 : f32 to vector<16x1xf32>
    %620 = arith.divf %618, %619 : vector<16x1xf32>
    %621 = vector.broadcast %620 : vector<16x1xf32> to vector<16x32xf32>
    %622 = arith.subf %614, %621 : vector<16x32xf32>
    %623 = arith.mulf %622, %622 : vector<16x32xf32>
    %cst_175 = arith.constant dense<0.000000e+00> : vector<16xf32>
    %624 = vector.multi_reduction <add>, %623, %cst_175 [1] : vector<16x32xf32> to vector<16xf32>
    %625 = vector.shape_cast %624 : vector<16xf32> to vector<16x1xf32>
    %cst_176 = arith.constant 3.200000e+01 : f32
    %626 = vector.broadcast %cst_176 : f32 to vector<16x1xf32>
    %627 = arith.divf %625, %626 : vector<16x1xf32>
    %cst_177 = arith.constant 9.99999974E-6 : f32
    %628 = vector.broadcast %cst_177 : f32 to vector<16x1xf32>
    %629 = arith.addf %627, %628 : vector<16x1xf32>
    %630 = math.rsqrt %629 : vector<16x1xf32>
    %631 = vector.broadcast %630 : vector<16x1xf32> to vector<16x32xf32>
    %632 = arith.mulf %622, %631 : vector<16x32xf32>
    %633 = vector.broadcast %615 : vector<1x32xf32> to vector<16x32xf32>
    %634 = arith.mulf %632, %633 : vector<16x32xf32>
    %635 = vector.broadcast %616 : vector<1x32xf32> to vector<16x32xf32>
    %636 = arith.addf %634, %635 : vector<16x32xf32>
    %c32_178 = arith.constant 32 : index
    %c0_179 = arith.constant 0 : index
    %637 = vector.load %arg4[%c32_178, %c0_179] : memref<34x64xf32, #tpu.memory_space<vmem>>, vector<1x32xf32>
    %c33 = arith.constant 33 : index
    %c0_180 = arith.constant 0 : index
    %638 = vector.load %arg4[%c33, %c0_180] : memref<34x64xf32, #tpu.memory_space<vmem>>, vector<1x32xf32>
    %cst_181 = arith.constant dense<0.000000e+00> : vector<16xf32>
    %639 = vector.multi_reduction <add>, %636, %cst_181 [1] : vector<16x32xf32> to vector<16xf32>
    %640 = vector.shape_cast %639 : vector<16xf32> to vector<16x1xf32>
    %cst_182 = arith.constant 3.200000e+01 : f32
    %641 = vector.broadcast %cst_182 : f32 to vector<16x1xf32>
    %642 = arith.divf %640, %641 : vector<16x1xf32>
    %643 = vector.broadcast %642 : vector<16x1xf32> to vector<16x32xf32>
    %644 = arith.subf %636, %643 : vector<16x32xf32>
    %645 = arith.mulf %644, %644 : vector<16x32xf32>
    %cst_183 = arith.constant dense<0.000000e+00> : vector<16xf32>
    %646 = vector.multi_reduction <add>, %645, %cst_183 [1] : vector<16x32xf32> to vector<16xf32>
    %647 = vector.shape_cast %646 : vector<16xf32> to vector<16x1xf32>
    %cst_184 = arith.constant 3.200000e+01 : f32
    %648 = vector.broadcast %cst_184 : f32 to vector<16x1xf32>
    %649 = arith.divf %647, %648 : vector<16x1xf32>
    %cst_185 = arith.constant 9.99999974E-6 : f32
    %650 = vector.broadcast %cst_185 : f32 to vector<16x1xf32>
    %651 = arith.addf %649, %650 : vector<16x1xf32>
    %652 = math.rsqrt %651 : vector<16x1xf32>
    %653 = vector.broadcast %652 : vector<16x1xf32> to vector<16x32xf32>
    %654 = arith.mulf %644, %653 : vector<16x32xf32>
    %655 = vector.broadcast %637 : vector<1x32xf32> to vector<16x32xf32>
    %656 = arith.mulf %654, %655 : vector<16x32xf32>
    %657 = vector.broadcast %638 : vector<1x32xf32> to vector<16x32xf32>
    %658 = arith.addf %656, %657 : vector<16x32xf32>
    %c0_186 = arith.constant 0 : index
    %c0_187 = arith.constant 0 : index
    %659 = vector.load %arg5[%c0_186, %c0_187] : memref<16x32xf32, #tpu.memory_space<vmem>>, vector<16x32xf32>
    tpu.vector_store %arg5[%c0_186, %c0_187], %658 {strides = array<i32>} : memref<16x32xf32, #tpu.memory_space<vmem>>, vector<16x32xf32>,
    return
  }
}

</mosaic_0001>

<bundles_post_ra>
// kernel: tpu_custom_call.1
= control target key start
LH: loop header
LB: loop body
LE: loop exit
PB: predicated region body
PF: predicated region fallthrough
CT: control target
= control target key end

     0   :  { %v6517_v1 = vmov 0.0   ;;  %vm6518_vm0 = vmmov 0   ;;  %vm64_vm1 = vcmask 261120   ;;  %s7675_s0 = inlined_call_operand.vmem [shape: f32[16,32], index: 0, kind: input, shape index: {}]   ;;  %s7676_s1 = inlined_call_operand.vmem [shape: f32[16,32], index: 1, kind: input, shape index: {}]   ;;  %s7677_s2 = inlined_call_operand.vmem [shape: bf16[640,32], index: 2, kind: input, shape index: {}]   ;;  %s7678_s3 = inlined_call_operand.vmem [shape: bf16[64,64], index: 3, kind: input, shape index: {}]   ;;  %s7679_s4 = inlined_call_operand.vmem [shape: f32[34,64], index: 4, kind: input, shape index: {}]   ;;  %s7680_s5 = inlined_call_operand.hbm [shape: f32[16,32], index: 5, kind: output, shape index: {}]  }
   0x1   :  { %v6295_v0 = vld [vmem:[%s7677_s2 + $0x8] sm:$0xff]   ;;  %5673 = vmatprep.subr.bf16.mxu1 %v6517_v1  ;;  %v6296_v2 = vld [vmem:[%s7677_s2] sm:$0xff]   ;;  %5689 = vmatprep.subr.bf16.mxu0 %v6517_v1  ;;  %v6297_v5 = vld [vmem:[%s7677_s2 + $0x18] sm:$0xff]  }
   0x2   :  { %5674 = vmatpush3.bf16.msra.mxu1 %v6295_v0  ;;  %5677 = vmatprep.mubr.msk.bf16.mxu1 %vm6518_vm0, %v6517_v1  ;;  %v6570_v3 = vld [vmem:[%s7675_s0] sm:$0xff]  ;;  %v6575_v4 = vld [vmem:[%s7675_s0 + $0x8] sm:$0xff]  ;;  %v6298_v7 = vld [vmem:[%s7677_s2 + $0x10] sm:$0xff]  }
   0x3   :  { %5675 = vmatprep.subr.bf16.mxu1 %v6517_v1  ;;  %5693 = vmatprep.mubr.msk.bf16.mxu0 %vm6518_vm0, %v6517_v1  ;;  %v27_v6 = vpack.c.bf16 %v6575_v4, %v6570_v3 }
   0x6   :  { %5676 = vmatpush3.bf16.msra.mxu1 %v6296_v2 }
   0x7   :  { %5681 = vmatprep.subr.bf16.mxu1 %v6517_v1 }
   0x9   :  { %5678 = vmatmul.mubr.msk.bf16.vlgmr.msra.gmra.mxu1 %vm64_vm1, %v27_v6 }
   0xa   :  { %5682 = vmatpush3.bf16.msra.mxu1 %v6297_v5  ;;  %5685 = vmatprep.mubr.msk.bf16.mxu1 %vm6518_vm0, %v6517_v1 }
   0xb   :  { %5683 = vmatprep.subr.bf16.mxu1 %v6517_v1 }
   0xe   :  { %5684 = vmatpush3.bf16.msra.mxu1 %v6298_v7 }
   0xf   :  { %5697 = vmatprep.subr.bf16.mxu1 %v6517_v1 }
  0x11   :  { %5686 = vmatmul.mubr.msk.bf16.vlgmr.msra.gmra.mxu1 %vm64_vm1, %v27_v6 }
  0x12   :  { %5699 = vmatprep.mubr.msk.bf16.mxu1 %vm6518_vm0, %v6517_v1 }
  0x13   :  { %10 = vsyncpa [#allocation3], 0  ;;  %v6299_v8 = vld [vmem:[%s7677_s2 + $0x28] sm:$0xff]   ;;  %v6300_v9 = vld [vmem:[%s7677_s2 + $0x20] sm:$0xff]   ;;  %vm231_vm2 = vcmask 64512   ;;  %s6519_s12 = smov 120  }
  0x14   :  { %5690 = vmatpush3.bf16.msra.mxu0 %v6299_v8  ;;  %v5323_v14 = vld [vmem:[%s7679_s4 + $0x1] ss:$0 sm:$0xff]  ;;  %v5319_v15 = vld [vmem:[%s7679_s4] ss:$0 sm:$0xff]  ;;  %v5327_v32 = vld [vmem:[%s7679_s4 + $0x2] ss:$0 sm:$0xff] }
  0x15   :  { %5691 = vmatprep.subr.bf16.mxu0 %v6517_v1  ;;  %vm351_vm3 = vcmask 1043456   ;;  %s6520_s15 = smov 112   ;;  %s6521_s16 = smov 104   ;;  %vm1133_vm4 = vcmask 130048   ;;  %vm1136_vm5 = vcmask 195584   ;;  %vm2562_vm6 = vcmask 523264  }
  0x16   :  { %s6522_s17 = smov 8   ;;  %s6523_s18 = smov 16  }
  0x17   :  { %s6524_s23 = smov 24   ;;  %s6525_s24 = smov [#allocation2]  }
  0x18   :  { %5692 = vmatpush3.bf16.msra.mxu0 %v6300_v9  ;;  %s5308_s25 = sshll.u32 %s6525_s24, 4  ;;  %s5309_s25 = int_to_ptr.vmem [resolvable:$true] %s5308_s25 }
  0x19   :  { %5703 = vmatprep.subr.bf16.mxu0 %v6517_v1  ;;  %s6495_s26 = scalar_lea.vmem %s5309_s25, 256  ;;  %p6500_p1 = scmp.lt.s32.totalorder %s5309_s25, %s5309_s25 }
  0x1a   :  { %p6496_p0 = scmp.ne.s32.totalorder %s5309_s25, %s6495_s26  ;;  %p6501_p2 = scmp.lt.s32.totalorder %s6495_s26, %s6495_s26 }
  0x1b   :  { %5694 = vmatmul.mubr.msk.bf16.vlgmr.msra.gmra.mxu0 %vm64_vm1, %v27_v6 }
  0x1c   :  { %5705 = vmatprep.mubr.msk.bf16.mxu0 %vm6518_vm0, %v6517_v1  ;;  %p6502_p3 = por %p6501_p2, %p6500_p1 }
  0x1e   :  { %p6503_p4 = pnand %p6502_p3, %p6496_p0 }
  0xc9   :  { %v102_v10 = vpop.f32.mrf.mxu1 }
  0xca   :  { %v103_v19 = vadd.f32 %v5319_v15, %v102_v10 }
  0xcb   :  { %v5679_v11 = vpop.f32.mrf.mxu1 }
  0xcc   :  { %v223_v25 = vmul.f32 0.35355338, %v103_v19 }
  0xcd   :  { %v105_v12 = vpop.f32.mrf.mxu1 }
  0xce   :  { %v106_v26 = vadd.f32 %v5319_v15, %v105_v12  ;;  %v6625_v29 = vpack.c.bf16 %v223_v25, %v223_v25 }
  0xcf   :  { %v5680_v13 = vpop.f32.mrf.mxu1 }
  0xd0   :  { %v224_v30 = vmul.f32 0.35355338, %v106_v26 }
  0xd1   :  { %v159_v16 = vpop.f32.mrf.mxu1 }
  0xd2   :  { %v160_v17 = vadd.f32 %v5323_v14, %v159_v16  ;;  %v6632_v31 = vpack.c.bf16 %v224_v30, %v224_v30 }
  0xd3   :  { %v5687_v18 = vpop.f32.mrf.mxu1 }
  0xd4   :  { %v6614_v20 = vpack.c.bf16 %v160_v17, %v160_v17 }
  0xd5   :  { %v162_v21 = vpop.f32.mrf.mxu1 }
  0xd6   :  { %v163_v22 = vadd.f32 %v5323_v14, %v162_v21  ;;  %v236_v23 = vsel %vm231_vm2, %v6614_v20, 0 }
  0xd7   :  { %v5688_v24 = vpop.f32.mrf.mxu1  ;;  %5698 = vmatpush3.bf16.xpose.msra.mxu1 %v236_v23 }
  0xd8   :  { %v6618_v27 = vpack.c.bf16 %v163_v22, %v163_v22  ;;  %5709 = vmatprep.subr.bf16.mxu1 %v6517_v1 }
  0xda   :  { %497 = vrot.lane.b32.xlu1 %v6618_v27, %s6519_s12  ;;  %v282_v28 = vsel %vm231_vm2, %v6618_v27, 0 }
  0xdb   :  { %5704 = vmatpush3.bf16.xpose.msra.mxu0 %v282_v28  ;;  %v216_v33 = vpop.f32.mrf.mxu0 }
  0xdc   :  { %5715 = vmatprep.subr.bf16.mxu0 %v6517_v1  ;;  %v217_v35 = vadd.f32 %v5327_v32, %v216_v33 }
  0xdd   :  { %v5695_v34 = vpop.f32.mrf.mxu0 }
  0xde   :  { %5700 = vmatmul.mubr.msk.bf16.vlgmr.msra.gmra.mxu1 %vm231_vm2, %v6625_v29  ;;  %v6641_v39 = vpack.c.bf16 %v217_v35, %v217_v35 }
  0xdf   :  { %5711 = vmatprep.mubr.msk.bf16.mxu1 %vm6518_vm0, %v6517_v1  ;;  %v219_v36 = vpop.f32.mrf.mxu0 }
  0xe0   :  { %v220_v37 = vadd.f32 %v5327_v32, %v219_v36  ;;  %v353_v41 = vsel %vm351_vm3, %v6641_v39, 0 }
  0xe1   :  { %v5696_v38 = vpop.f32.mrf.mxu0  ;;  %5710 = vmatpush3.bf16.msra.mxu1 %v353_v41 }
  0xe2   :  { %5706 = vmatmul.mubr.msk.bf16.vlgmr.msra.gmra.mxu0 %vm231_vm2, %v6632_v31  ;;  %v6643_v40 = vpack.c.bf16 %v220_v37, %v220_v37  ;;  %5721 = vmatprep.subr.bf16.mxu1 %v6517_v1 }
  0xe3   :  { %5717 = vmatprep.mubr.msk.bf16.mxu0 %vm6518_vm0, %v6517_v1 }
  0xe4   :  { %v399_v42 = vsel %vm351_vm3, %v6643_v40, 0 }
  0xe5   :  { %5716 = vmatpush3.bf16.msra.mxu0 %v399_v42 }
  0xe6   :  { %5727 = vmatprep.subr.bf16.mxu0 %v6517_v1 }
 0x14c   :  { %v498_v63 = vpop.permute.xlu1 %497 }
 0x14d   :  { %v503_v13 = vsel %vm231_vm2, %v498_v63, 0 }
 0x19e   :  { %v272_v43 = vpop.f32.mrf.mxu1 }
 0x19f   :  { %v324_v44 = vsel %vm231_vm2, %v272_v43, -inf }
 0x1a0   :  { %325 = vmax.xlane.f32.xlu0 %v324_v44  ;;  %v5701_v45 = vpop.f32.mrf.mxu1 }
 0x1a2   :  { %v275_v46 = vpop.f32.mrf.mxu1  ;;  %v318_v47 = vpop.f32.mrf.mxu0 }
 0x1a3   :  { %v327_v48 = vsel %vm231_vm2, %v318_v47, -inf }
 0x1a4   :  { %v5707_v49 = vpop.f32.mrf.mxu0  ;;  %328 = vmax.xlane.f32.xlu0 %v327_v48  ;;  %v5702_v50 = vpop.f32.mrf.mxu1 }
 0x1a6   :  { %v321_v51 = vpop.f32.mrf.mxu0 }
 0x1a8   :  { %v5708_v52 = vpop.f32.mrf.mxu0 }
 0x1ba   :  { %445 = vrot.lane.b32.xlu0 %v6614_v20, %s6519_s12 }
 0x229   :  { %v326_v53 = vpop.xlane.xlu0 %325 }
 0x22a   :  { %v330_v54 = vsub.f32 %v272_v43, %v326_v53 }
 0x22c   :  { %v332_v55 = vmul.f32 1.442695, %v330_v54 }
 0x22d   :  { %v329_v56 = vpop.xlane.xlu0 %328 }
 0x22e   :  { %6339 = vpow2.f32 %v332_v55  ;;  %v331_v57 = vsub.f32 %v318_v47, %v329_v56 }
 0x230   :  { %v334_v58 = vmul.f32 1.442695, %v331_v57 }
 0x231   :  { %v446_v7 = vpop.permute.xlu0 %445 }
 0x232   :  { %6341 = vpow2.f32 %v334_v58  ;;  %v451_v10 = vsel %vm231_vm2, %v446_v7, 0 }
 0x23b   :  { %v6340_v59 = vpop.eup %6339 }
 0x23c   :  { %v336_v60 = vsel %vm231_vm2, %v6340_v59, 0.0 }
 0x23d   :  { %337 = vadd.xlane.f32.xlu1 %v336_v60 }
 0x23f   :  { %v6342_v61 = vpop.eup %6341 }
 0x240   :  { %v339_v62 = vsel %vm231_vm2, %v6342_v61, 0.0 }
 0x241   :  { %340 = vadd.xlane.f32.xlu1 %v339_v62 }
 0x252   :  { %442 = vrot.lane.b32.xlu1 %v6625_v29, %s6519_s12 }
 0x256   :  { %494 = vrot.lane.b32.xlu1 %v6632_v31, %s6519_s12 }
 0x2c6   :  { %v338_v0 = vpop.xlane.xlu1 %337 }
 0x2c7   :  { %6343 = vrcp.f32 %v338_v0 }
 0x2ca   :  { %v341_v2 = vpop.xlane.xlu1 %340 }
 0x2cb   :  { %6345 = vrcp.f32 %v341_v2 }
 0x2ce   :  { %v443_v14 = vpop.permute.xlu1 %442 }
 0x2d2   :  { %v495_v15 = vpop.permute.xlu1 %494 }
 0x2d4   :  { %v6344_v5 = vpop.eup %6343 }
 0x2d5   :  { %v344_v6 = vmul.f32 %v6344_v5, %v6340_v59 }
 0x2d7   :  { %v346_v8 = vpack.c.bf16 %v344_v6, %v344_v6 }
 0x2d8   :  { %v6346_v9 = vpop.eup %6345 }
 0x2d9   :  { %5712 = vmatmul.mubr.msk.bf16.vlgmr.msra.gmra.mxu1 %vm231_vm2, %v346_v8  ;;  %v345_v11 = vmul.f32 %v6346_v9, %v6342_v61 }
 0x2da   :  { %5722 = vmatpush3.bf16.xpose.msra.mxu1 %v451_v10  ;;  %5723 = vmatprep.mubr.msk.bf16.mxu1 %vm6518_vm0, %v6517_v1 }
 0x2db   :  { %v347_v12 = vpack.c.bf16 %v345_v11, %v345_v11  ;;  %5733 = vmatprep.subr.bf16.mxu1 %v6517_v1 }
 0x2dd   :  { %5718 = vmatmul.mubr.msk.bf16.vlgmr.msra.gmra.mxu0 %vm231_vm2, %v347_v12 }
 0x2de   :  { %5728 = vmatpush3.bf16.xpose.msra.mxu0 %v503_v13  ;;  %5729 = vmatprep.mubr.msk.bf16.mxu0 %vm6518_vm0, %v6517_v1 }
 0x2df   :  { %5739 = vmatprep.subr.bf16.mxu0 %v6517_v1 }
 0x2e1   :  { %5724 = vmatmul.mubr.msk.bf16.vlgmr.msra.gmra.mxu1 %vm231_vm2, %v443_v14 }
 0x2e2   :  { %5735 = vmatprep.mubr.msk.bf16.mxu1 %vm6518_vm0, %v6517_v1 }
 0x2e5   :  { %5730 = vmatmul.mubr.msk.bf16.vlgmr.msra.gmra.mxu0 %vm231_vm2, %v495_v15 }
 0x2e6   :  { %5741 = vmatprep.mubr.msk.bf16.mxu0 %vm6518_vm0, %v6517_v1 }
 0x399   :  { %v6677_v16 = vpop.f32.mrf.mxu1 }
 0x39b   :  { %v5713_v17 = vpop.f32.mrf.mxu1 }
 0x39d   :  { %v392_v18 = vpop.f32.mrf.mxu1  ;;  %v6679_v19 = vpop.f32.mrf.mxu0 }
 0x39f   :  { %v5714_v21 = vpop.f32.mrf.mxu1  ;;  %v5719_v22 = vpop.f32.mrf.mxu0 }
 0x3a1   :  { %v438_v23 = vpop.f32.mrf.mxu0  ;;  %v487_v24 = vpop.f32.mrf.mxu1 }
 0x3a2   :  { %v545_v25 = vsel %vm231_vm2, %v487_v24, -inf }
 0x3a3   :  { %v5720_v26 = vpop.f32.mrf.mxu0  ;;  %546 = vmax.xlane.f32.xlu0 %v545_v25  ;;  %v5725_v28 = vpop.f32.mrf.mxu1 }
 0x3a5   :  { %v490_v30 = vpop.f32.mrf.mxu1  ;;  %v539_v32 = vpop.f32.mrf.mxu0 }
 0x3a6   :  { %v548_v33 = vsel %vm231_vm2, %v539_v32, -inf }
 0x3a7   :  { %549 = vmax.xlane.f32.xlu1 %v548_v33  ;;  %v5726_v34 = vpop.f32.mrf.mxu1  ;;  %v5731_v35 = vpop.f32.mrf.mxu0 }
 0x3a9   :  { %v542_v36 = vpop.f32.mrf.mxu0 }
 0x3ab   :  { %v5732_v37 = vpop.f32.mrf.mxu0 }
 0x3b8   :  { %619 = vrot.lane.b32.xlu1 %v6643_v40, %s6519_s12 }
 0x3bc   :  { %669 = vrot.lane.b32.xlu1 %v6614_v20, %s6520_s15 }
 0x3c0   :  { %719 = vrot.lane.b32.xlu1 %v6618_v27, %s6520_s15 }
 0x3c4   :  { %717 = vrot.lane.b32.xlu1 %v6632_v31, %s6520_s15 }
 0x42c   :  { %v547_v38 = vpop.xlane.xlu0 %546 }
 0x42d   :  { %v551_v41 = vsub.f32 %v487_v24, %v547_v38 }
 0x42f   :  { %v553_v42 = vmul.f32 1.442695, %v551_v41 }
 0x430   :  { %v550_v43 = vpop.xlane.xlu1 %549 }
 0x431   :  { %6347 = vpow2.f32 %v553_v42  ;;  %v552_v44 = vsub.f32 %v539_v32, %v550_v43 }
 0x433   :  { %v555_v45 = vmul.f32 1.442695, %v552_v44 }
 0x434   :  { %v620_v46 = vpop.permute.xlu1 %619 }
 0x435   :  { %6349 = vpow2.f32 %v555_v45  ;;  %v625_v47 = vsel %vm351_vm3, %v620_v46, 0 }
 0x436   :  { %5740 = vmatpush3.bf16.msra.mxu0 %v625_v47 }
 0x437   :  { %5751 = vmatprep.subr.bf16.mxu0 %v6517_v1 }
 0x438   :  { %v670_v57 = vpop.permute.xlu1 %669 }
 0x439   :  { %v675_v61 = vsel %vm231_vm2, %v670_v57, 0 }
 0x43c   :  { %v720_v63 = vpop.permute.xlu1 %719 }
 0x43d   :  { %v725_v2 = vsel %vm231_vm2, %v720_v63, 0 }
 0x43e   :  { %v6348_v48 = vpop.eup %6347 }
 0x43f   :  { %v557_v49 = vsel %vm231_vm2, %v6348_v48, 0.0 }
 0x440   :  { %558 = vadd.xlane.f32.xlu0 %v557_v49  ;;  %v718_v6 = vpop.permute.xlu1 %717 }
 0x442   :  { %v6350_v50 = vpop.eup %6349 }
 0x443   :  { %v560_v51 = vsel %vm231_vm2, %v6350_v50, 0.0 }
 0x444   :  { %561 = vadd.xlane.f32.xlu0 %v560_v51 }
 0x45a   :  { %570 = vrot.lane.b32.xlu0 %v6641_v39, %s6519_s12 }
 0x45e   :  { %667 = vrot.lane.b32.xlu0 %v6625_v29, %s6520_s15 }
 0x4c9   :  { %v559_v52 = vpop.xlane.xlu0 %558 }
 0x4ca   :  { %6351 = vrcp.f32 %v559_v52 }
 0x4cd   :  { %v562_v53 = vpop.xlane.xlu0 %561 }
 0x4ce   :  { %6353 = vrcp.f32 %v562_v53 }
 0x4d1   :  { %v571_v54 = vpop.permute.xlu0 %570 }
 0x4d2   :  { %v576_v55 = vsel %vm351_vm3, %v571_v54, 0 }
 0x4d3   :  { %5734 = vmatpush3.bf16.msra.mxu1 %v576_v55 }
 0x4d4   :  { %5745 = vmatprep.subr.bf16.mxu1 %v6517_v1 }
 0x4d5   :  { %v668_v5 = vpop.permute.xlu0 %667 }
 0x4d7   :  { %v6352_v56 = vpop.eup %6351 }
 0x4d8   :  { %v565_v58 = vmul.f32 %v6352_v56, %v6348_v48 }
 0x4da   :  { %v567_v59 = vpack.c.bf16 %v565_v58, %v565_v58 }
 0x4db   :  { %v6354_v60 = vpop.eup %6353 }
 0x4dc   :  { %5736 = vmatmul.mubr.msk.bf16.vlgmr.msra.gmra.mxu1 %vm231_vm2, %v567_v59  ;;  %v566_v62 = vmul.f32 %v6354_v60, %v6350_v50 }
 0x4dd   :  { %5746 = vmatpush3.bf16.xpose.msra.mxu1 %v675_v61  ;;  %5747 = vmatprep.mubr.msk.bf16.mxu1 %vm6518_vm0, %v6517_v1 }
 0x4de   :  { %v568_v0 = vpack.c.bf16 %v566_v62, %v566_v62  ;;  %5757 = vmatprep.subr.bf16.mxu1 %v6517_v1 }
 0x4e0   :  { %5742 = vmatmul.mubr.msk.bf16.vlgmr.msra.gmra.mxu0 %vm231_vm2, %v568_v0 }
 0x4e1   :  { %5752 = vmatpush3.bf16.xpose.msra.mxu0 %v725_v2  ;;  %5753 = vmatprep.mubr.msk.bf16.mxu0 %vm6518_vm0, %v6517_v1 }
 0x4e2   :  { %5763 = vmatprep.subr.bf16.mxu0 %v6517_v1 }
 0x4e4   :  { %5748 = vmatmul.mubr.msk.bf16.vlgmr.msra.gmra.mxu1 %vm231_vm2, %v668_v5 }
 0x4e5   :  { %5759 = vmatprep.mubr.msk.bf16.mxu1 %vm6518_vm0, %v6517_v1 }
 0x4e8   :  { %5754 = vmatmul.mubr.msk.bf16.vlgmr.msra.gmra.mxu0 %vm231_vm2, %v718_v6 }
 0x4e9   :  { %5765 = vmatprep.mubr.msk.bf16.mxu0 %vm6518_vm0, %v6517_v1 }
 0x59c   :  { %v6717_v7 = vpop.f32.mrf.mxu1 }
 0x59e   :  { %v5737_v8 = vpop.f32.mrf.mxu1 }
 0x5a0   :  { %v615_v9 = vpop.f32.mrf.mxu1  ;;  %v6719_v10 = vpop.f32.mrf.mxu0 }
 0x5a1   :  { %v6235_v11 = vpack.i.bf16 %v6719_v10, %v6717_v7 }
 0x5a2   :  { %v5738_v12 = vpop.f32.mrf.mxu1  ;;  %v5743_v13 = vpop.f32.mrf.mxu0 }
 0x5a4   :  { %v664_v14 = vpop.f32.mrf.mxu0  ;;  %v711_v15 = vpop.f32.mrf.mxu1 }
 0x5a5   :  { %v767_v17 = vsel %vm231_vm2, %v711_v15, -inf }
 0x5a6   :  { %v5744_v18 = vpop.f32.mrf.mxu0  ;;  %768 = vmax.xlane.f32.xlu0 %v767_v17  ;;  %v5749_v21 = vpop.f32.mrf.mxu1 }
 0x5a8   :  { %v714_v22 = vpop.f32.mrf.mxu1  ;;  %v761_v23 = vpop.f32.mrf.mxu0 }
 0x5a9   :  { %v770_v24 = vsel %vm231_vm2, %v761_v23, -inf }
 0x5aa   :  { %771 = vmax.xlane.f32.xlu1 %v770_v24  ;;  %v5750_v25 = vpop.f32.mrf.mxu1  ;;  %v5755_v26 = vpop.f32.mrf.mxu0 }
 0x5ac   :  { %v764_v28 = vpop.f32.mrf.mxu0 }
 0x5ae   :  { %v5756_v30 = vpop.f32.mrf.mxu0 }
 0x5bb   :  { %839 = vrot.lane.b32.xlu1 %v6643_v40, %s6520_s15 }
 0x5bf   :  { %889 = vrot.lane.b32.xlu1 %v6614_v20, %s6521_s16 }
 0x5c3   :  { %939 = vrot.lane.b32.xlu1 %v6618_v27, %s6521_s16 }
 0x5c7   :  { %937 = vrot.lane.b32.xlu1 %v6632_v31, %s6521_s16 }
 0x62f   :  { %v769_v32 = vpop.xlane.xlu0 %768 }
 0x630   :  { %v773_v33 = vsub.f32 %v711_v15, %v769_v32 }
 0x632   :  { %v775_v34 = vmul.f32 1.442695, %v773_v33 }
 0x633   :  { %v772_v35 = vpop.xlane.xlu1 %771 }
 0x634   :  { %6355 = vpow2.f32 %v775_v34  ;;  %v774_v36 = vsub.f32 %v761_v23, %v772_v35 }
 0x636   :  { %v777_v37 = vmul.f32 1.442695, %v774_v36 }
 0x637   :  { %v840_v38 = vpop.permute.xlu1 %839 }
 0x638   :  { %6357 = vpow2.f32 %v777_v37  ;;  %v845_v41 = vsel %vm351_vm3, %v840_v38, 0 }
 0x639   :  { %5764 = vmatpush3.bf16.msra.mxu0 %v845_v41 }
 0x63a   :  { %5775 = vmatprep.subr.bf16.mxu0 %v6517_v1 }
 0x63b   :  { %v890_v48 = vpop.permute.xlu1 %889 }
 0x63c   :  { %v895_v52 = vsel %vm231_vm2, %v890_v48, 0 }
 0x63f   :  { %v940_v53 = vpop.permute.xlu1 %939 }
 0x640   :  { %v945_v55 = vsel %vm231_vm2, %v940_v53, 0 }
 0x641   :  { %v6356_v20 = vpop.eup %6355 }
 0x642   :  { %v779_v27 = vsel %vm231_vm2, %v6356_v20, 0.0 }
 0x643   :  { %780 = vadd.xlane.f32.xlu0 %v779_v27  ;;  %v938_v57 = vpop.permute.xlu1 %937 }
 0x645   :  { %v6358_v42 = vpop.eup %6357 }
 0x646   :  { %v782_v31 = vsel %vm231_vm2, %v6358_v42, 0.0 }
 0x647   :  { %783 = vadd.xlane.f32.xlu0 %v782_v31  ;;  %v6302_v31 = vld [vmem:[%s7677_s2 + $0x30] sm:$0xff]  }
 0x65d   :  { %791 = vrot.lane.b32.xlu0 %v6641_v39, %s6520_s15 }
 0x661   :  { %887 = vrot.lane.b32.xlu0 %v6625_v29, %s6521_s16 }
 0x6cc   :  { %v781_v43 = vpop.xlane.xlu0 %780 }
 0x6cd   :  { %6359 = vrcp.f32 %v781_v43 }
 0x6d0   :  { %v784_v44 = vpop.xlane.xlu0 %783 }
 0x6d1   :  { %6361 = vrcp.f32 %v784_v44 }
 0x6d4   :  { %v792_v45 = vpop.permute.xlu0 %791 }
 0x6d5   :  { %v797_v46 = vsel %vm351_vm3, %v792_v45, 0 }
 0x6d6   :  { %5758 = vmatpush3.bf16.msra.mxu1 %v797_v46 }
 0x6d7   :  { %5769 = vmatprep.subr.bf16.mxu1 %v6517_v1 }
 0x6d8   :  { %v888_v56 = vpop.permute.xlu0 %887 }
 0x6da   :  { %v6360_v47 = vpop.eup %6359 }
 0x6db   :  { %v787_v49 = vmul.f32 %v6360_v47, %v6356_v20 }
 0x6dd   :  { %v789_v50 = vpack.c.bf16 %v787_v49, %v787_v49 }
 0x6de   :  { %v6362_v51 = vpop.eup %6361 }
 0x6df   :  { %5760 = vmatmul.mubr.msk.bf16.vlgmr.msra.gmra.mxu1 %vm231_vm2, %v789_v50  ;;  %v788_v29 = vmul.f32 %v6362_v51, %v6358_v42  ;;  %v6301_v42 = vld [vmem:[%s7677_s2 + $0x38] sm:$0xff]  }
 0x6e0   :  { %5770 = vmatpush3.bf16.xpose.msra.mxu1 %v895_v52  ;;  %5771 = vmatprep.mubr.msk.bf16.mxu1 %vm6518_vm0, %v6517_v1 }
 0x6e1   :  { %v790_v54 = vpack.c.bf16 %v788_v29, %v788_v29  ;;  %5781 = vmatprep.subr.bf16.mxu1 %v6517_v1 }
 0x6e3   :  { %5766 = vmatmul.mubr.msk.bf16.vlgmr.msra.gmra.mxu0 %vm231_vm2, %v790_v54 }
 0x6e4   :  { %5776 = vmatpush3.bf16.xpose.msra.mxu0 %v945_v55  ;;  %5777 = vmatprep.mubr.msk.bf16.mxu0 %vm6518_vm0, %v6517_v1 }
 0x6e5   :  { %5787 = vmatprep.subr.bf16.mxu0 %v6517_v1 }
 0x6e7   :  { %5772 = vmatmul.mubr.msk.bf16.vlgmr.msra.gmra.mxu1 %vm231_vm2, %v888_v56 }
 0x6e8   :  { %5783 = vmatprep.mubr.msk.bf16.mxu1 %vm6518_vm0, %v6517_v1 }
 0x6eb   :  { %5778 = vmatmul.mubr.msk.bf16.vlgmr.msra.gmra.mxu0 %vm231_vm2, %v938_v57 }
 0x6ec   :  { %5789 = vmatprep.mubr.msk.bf16.mxu0 %vm6518_vm0, %v6517_v1 }
 0x79f   :  { %v833_v58 = vpop.f32.mrf.mxu1 }
 0x7a1   :  { %v5761_v59 = vpop.f32.mrf.mxu1 }
 0x7a3   :  { %v836_v60 = vpop.f32.mrf.mxu1  ;;  %v881_v61 = vpop.f32.mrf.mxu0 }
 0x7a4   :  { %v6240_v21 = vpack.i.bf16 %v881_v61, %v833_v58 }
 0x7a5   :  { %v5762_v62 = vpop.f32.mrf.mxu1  ;;  %v5767_v63 = vpop.f32.mrf.mxu0 }
 0x7a7   :  { %v884_v0 = vpop.f32.mrf.mxu0  ;;  %v931_v2 = vpop.f32.mrf.mxu1 }
 0x7a8   :  { %v987_v5 = vsel %vm231_vm2, %v931_v2, -inf }
 0x7a9   :  { %v5768_v6 = vpop.f32.mrf.mxu0  ;;  %988 = vmax.xlane.f32.xlu0 %v987_v5  ;;  %v5773_v8 = vpop.f32.mrf.mxu1 }
 0x7ab   :  { %v934_v9 = vpop.f32.mrf.mxu1  ;;  %v981_v12 = vpop.f32.mrf.mxu0 }
 0x7ac   :  { %v990_v13 = vsel %vm231_vm2, %v981_v12, -inf }
 0x7ad   :  { %991 = vmax.xlane.f32.xlu1 %v990_v13  ;;  %v5774_v14 = vpop.f32.mrf.mxu1  ;;  %v5779_v15 = vpop.f32.mrf.mxu0 }
 0x7af   :  { %v984_v17 = vpop.f32.mrf.mxu0 }
 0x7b1   :  { %v5780_v18 = vpop.f32.mrf.mxu0 }
 0x7be   :  { %1059 = vrot.lane.b32.xlu1 %v6643_v40, %s6521_s16 }
 0x7c2   :  { %6236 = vrot.lane.b32.xlu1 %v6235_v11, %s6522_s17 }
 0x7c6   :  { %6241 = vrot.lane.b32.xlu1 %v6240_v21, %s6523_s18 }
 0x832   :  { %v989_v22 = vpop.xlane.xlu0 %988 }
 0x833   :  { %v993_v23 = vsub.f32 %v931_v2, %v989_v22 }
 0x835   :  { %v995_v24 = vmul.f32 1.442695, %v993_v23 }
 0x836   :  { %v992_v25 = vpop.xlane.xlu1 %991 }
 0x837   :  { %6363 = vpow2.f32 %v995_v24  ;;  %v994_v26 = vsub.f32 %v981_v12, %v992_v25 }
 0x839   :  { %v997_v28 = vmul.f32 1.442695, %v994_v26 }
 0x83a   :  { %v1060_v30 = vpop.permute.xlu1 %1059 }
 0x83b   :  { %6365 = vpow2.f32 %v997_v28  ;;  %v1065_v40 = vsel %vm351_vm3, %v1060_v30, 0 }
 0x83c   :  { %5788 = vmatpush3.bf16.msra.mxu0 %v1065_v40 }
 0x83d   :  { %5801 = vmatprep.subr.bf16.mxu0 %v6517_v1 }
 0x83e   :  { %v6237_v52 = vpop.permute.xlu1 %6236 }
 0x83f   :  { %v6239_v53 = vunpack.i.h.bf16 %v6237_v52  ;;  %v6238_v54 = vunpack.i.l.bf16 %v6237_v52  ;;  %v5357_v52 = vld [vmem:[%s7679_s4 + $0x5] ss:$0 sm:$0xff] }
 0x841   :  { %v1132_v58 = vsel %vm231_vm2, %v6679_v19, %v6239_v53  ;;  %v1131_v59 = vsel %vm231_vm2, %v6677_v16, %v6238_v54  ;;  %v5347_v16 = vld [vmem:[%s7679_s4 + $0x3] ss:$0 sm:$0xff] }
 0x842   :  { %v6242_v29 = vpop.permute.xlu1 %6241 }
 0x843   :  { %v6244_v55 = vunpack.i.h.bf16 %v6242_v29  ;;  %v6243_v56 = vunpack.i.l.bf16 %v6242_v29 }
 0x844   :  { %v6364_v7 = vpop.eup %6363 }
 0x845   :  { %v999_v10 = vsel %vm231_vm2, %v6364_v7, 0.0  ;;  %v1135_v62 = vsel %vm1133_vm4, %v1132_v58, %v6244_v55  ;;  %v1134_v63 = vsel %vm1133_vm4, %v1131_v59, %v6243_v56 }
 0x846   :  { %1000 = vadd.xlane.f32.xlu0 %v999_v10  ;;  %v24_v10 = vld [vmem:[%s7676_s1] sm:$0xff] }
 0x848   :  { %v6366_v11 = vpop.eup %6365 }
 0x849   :  { %v1002_v32 = vsel %vm231_vm2, %v6366_v11, 0.0 }
 0x84a   :  { %1003 = vadd.xlane.f32.xlu0 %v1002_v32 }
 0x860   :  { %1011 = vrot.lane.b32.xlu0 %v6641_v39, %s6521_s16 }
 0x8cf   :  { %v1001_v33 = vpop.xlane.xlu0 %1000 }
 0x8d0   :  { %6367 = vrcp.f32 %v1001_v33  ;;  %v6305_v33 = vld [vmem:[%s7677_s2 + $0x48] sm:$0xff]  }
 0x8d3   :  { %v1004_v34 = vpop.xlane.xlu0 %1003 }
 0x8d4   :  { %6369 = vrcp.f32 %v1004_v34  ;;  %v6306_v34 = vld [vmem:[%s7677_s2 + $0x40] sm:$0xff]  }
 0x8d7   :  { %v1012_v35 = vpop.permute.xlu0 %1011 }
 0x8d8   :  { %v1017_v36 = vsel %vm351_vm3, %v1012_v35, 0 }
 0x8d9   :  { %5782 = vmatpush3.bf16.msra.mxu1 %v1017_v36 }
 0x8da   :  { %5793 = vmatprep.subr.bf16.mxu1 %v6517_v1 }
 0x8dd   :  { %v6368_v37 = vpop.eup %6367 }
 0x8de   :  { %v1007_v38 = vmul.f32 %v6368_v37, %v6364_v7  ;;  %v6304_v7 = vld [vmem:[%s7677_s2 + $0x50] sm:$0xff]  }
 0x8e0   :  { %v1009_v41 = vpack.c.bf16 %v1007_v38, %v1007_v38 }
 0x8e1   :  { %v6370_v20 = vpop.eup %6369 }
 0x8e2   :  { %5784 = vmatmul.mubr.msk.bf16.vlgmr.msra.gmra.mxu1 %vm231_vm2, %v1009_v41  ;;  %v1008_v27 = vmul.f32 %v6370_v20, %v6366_v11  ;;  %v25_v11 = vld [vmem:[%s7676_s1 + $0x8] sm:$0xff] }
 0x8e3   :  { %5797 = vmatprep.mubr.msk.bf16.mxu1 %vm6518_vm0, %v6517_v1  ;;  %5794 = vmatpush3.bf16.msra.mxu1 %v6301_v42  ;;  %v6824_v32 = vpack.c.bf16 %v25_v11, %v24_v10  ;;  %v5351_v42 = vld [vmem:[%s7679_s4 + $0x8] ss:$0 sm:$0xff] }
 0x8e4   :  { %v1010_v39 = vpack.c.bf16 %v1008_v27, %v1008_v27  ;;  %5795 = vmatprep.subr.bf16.mxu1 %v6517_v1 }
 0x8e6   :  { %5790 = vmatmul.mubr.msk.bf16.vlgmr.msra.gmra.mxu0 %vm231_vm2, %v1010_v39 }
 0x8e7   :  { %5805 = vmatprep.mubr.msk.bf16.mxu0 %vm6518_vm0, %v6517_v1  ;;  %5796 = vmatpush3.bf16.msra.mxu1 %v6302_v31 }
 0x8e8   :  { %5809 = vmatprep.subr.bf16.mxu1 %v6517_v1  ;;  %5802 = vmatpush3.bf16.msra.mxu0 %v6305_v33 }
 0x8e9   :  { %5803 = vmatprep.subr.bf16.mxu0 %v6517_v1 }
 0x8ec   :  { %5804 = vmatpush3.bf16.msra.mxu0 %v6306_v34 }
 0x8ed   :  { %5817 = vmatprep.subr.bf16.mxu0 %v6517_v1 }
 0x9a2   :  { %v1053_v43 = vpop.f32.mrf.mxu1 }
 0x9a4   :  { %v5785_v44 = vpop.f32.mrf.mxu1 }
 0x9a6   :  { %v1056_v45 = vpop.f32.mrf.mxu1  ;;  %v1101_v46 = vpop.f32.mrf.mxu0 }
 0x9a7   :  { %v6245_v47 = vpack.i.bf16 %v1101_v46, %v1053_v43  ;;  %v5352_v45 = vld [vmem:[%s7679_s4 + $0x9] ss:$0 sm:$0xff] }
 0x9a8   :  { %v5786_v48 = vpop.f32.mrf.mxu1  ;;  %v5791_v49 = vpop.f32.mrf.mxu0 }
 0x9a9   :  { %6246 = vrot.lane.b32.xlu0 %v6245_v47, %s6524_s23  ;;  %v6307_v49 = vld [vmem:[%s7677_s2 + $0x68] sm:$0xff]  }
 0x9aa   :  { %v1104_v50 = vpop.f32.mrf.mxu0 }
 0x9ac   :  { %v5792_v51 = vpop.f32.mrf.mxu0 }
 0x9ad   :  { %v6308_v51 = vld [vmem:[%s7677_s2 + $0x60] sm:$0xff]  }
 0xa1b   :  { %v6247_v57 = vpop.permute.xlu0 %6246 }
 0xa1c   :  { %v6249_v60 = vunpack.i.h.bf16 %v6247_v57  ;;  %v6248_v61 = vunpack.i.l.bf16 %v6247_v57 }
 0xa1e   :  { %v1138_v0 = vsel %vm1136_vm5, %v1135_v62, %v6249_v60  ;;  %v1137_v2 = vsel %vm1136_vm5, %v1134_v63, %v6248_v61  ;;  %v5353_v62 = vld [vmem:[%s7679_s4 + $0x4] ss:$0 sm:$0xff] }
 0xa1f   :  { %v1139_v5 = vpack.c.bf16 %v1138_v0, %v1137_v2 }
 0xa21   :  { %5798 = vmatmul.mubr.msk.bf16.vlgmr.msra.gmra.mxu1 %vm64_vm1, %v1139_v5 }
 0xa22   :  { %5813 = vmatprep.mubr.msk.bf16.mxu1 %vm6518_vm0, %v6517_v1 }
 0xae1   :  { %v1193_v19 = vpop.f32.mrf.mxu1 }
 0xae2   :  { %v1194_v6 = vadd.f32 %v5347_v16, %v1193_v19 }
 0xae3   :  { %v5799_v8 = vpop.f32.mrf.mxu1 }
 0xae4   :  { %v1200_v9 = vadd.f32 %v1194_v6, %v6570_v3 }
 0xae5   :  { %v1196_v12 = vpop.f32.mrf.mxu1 }
 0xae6   :  { %v1197_v13 = vadd.f32 %v5347_v16, %v1196_v12  ;;  %v1204_v14 = vsel %vm64_vm1, %v1200_v9, 0.0 }
 0xae7   :  { %1205 = vadd.xlane.f32.xlu1 %v1204_v14  ;;  %v5800_v15 = vpop.f32.mrf.mxu1 }
 0xae8   :  { %v1201_v17 = vadd.f32 %v1197_v13, %v6575_v4  ;;  %v6303_v4 = vld [vmem:[%s7677_s2 + $0x58] sm:$0xff]  }
 0xae9   :  { %5810 = vmatpush3.bf16.msra.mxu1 %v6303_v4 }
 0xaea   :  { %v1207_v18 = vsel %vm64_vm1, %v1201_v17, 0.0  ;;  %5811 = vmatprep.subr.bf16.mxu1 %v6517_v1 }
 0xaeb   :  { %1208 = vadd.xlane.f32.xlu0 %v1207_v18  ;;  %v5361_v18 = vld [vmem:[%s7679_s4 + $0x6] ss:$0 sm:$0xff] }
 0xaed   :  { %5812 = vmatpush3.bf16.msra.mxu1 %v6304_v7 }
 0xaee   :  { %5825 = vmatprep.subr.bf16.mxu1 %v6517_v1 }
 0xaf0   :  { %5814 = vmatmul.mubr.msk.bf16.vlgmr.msra.gmra.mxu1 %vm64_vm1, %v6824_v32 }
 0xaf1   :  { %5827 = vmatprep.mubr.msk.bf16.mxu1 %vm6518_vm0, %v6517_v1 }
 0xb70   :  { %v1206_v21 = vpop.xlane.xlu1 %1205 }
 0xb71   :  { %v1211_v22 = vmul.f32 0.03125, %v1206_v21 }
 0xb73   :  { %v1213_v23 = vsub.f32 %v1200_v9, %v1211_v22 }
 0xb74   :  { %v1209_v24 = vpop.xlane.xlu0 %1208 }
 0xb75   :  { %v1212_v25 = vmul.f32 0.03125, %v1209_v24  ;;  %v1215_v26 = vmul.f32 %v1213_v23, %v1213_v23 }
 0xb77   :  { %v1214_v28 = vsub.f32 %v1201_v17, %v1212_v25  ;;  %v1217_v3 = vsel %vm64_vm1, %v1215_v26, 0.0 }
 0xb78   :  { %1218 = vadd.xlane.f32.xlu0 %v1217_v3 }
 0xb79   :  { %v1216_v30 = vmul.f32 %v1214_v28, %v1214_v28 }
 0xb7b   :  { %v1220_v40 = vsel %vm64_vm1, %v1216_v30, 0.0 }
 0xb7c   :  { %1221 = vadd.xlane.f32.xlu0 %v1220_v40 }
 0xbb0   :  { %v1377_v29 = vpop.f32.mrf.mxu1 }
 0xbb1   :  { %v1378_v54 = vadd.f32 %v5357_v52, %v1377_v29 }
 0xbb2   :  { %v5815_v53 = vpop.f32.mrf.mxu1 }
 0xbb3   :  { %v6869_v58 = vpack.c.bf16 %v1378_v54, %v1378_v54 }
 0xbb4   :  { %v1380_v55 = vpop.f32.mrf.mxu1 }
 0xbb5   :  { %v1381_v56 = vadd.f32 %v5357_v52, %v1380_v55  ;;  %v1453_v60 = vsel %vm231_vm2, %v6869_v58, 0 }
 0xbb6   :  { %v5816_v57 = vpop.f32.mrf.mxu1  ;;  %5826 = vmatpush3.bf16.xpose.msra.mxu1 %v1453_v60 }
 0xbb7   :  { %v6871_v59 = vpack.c.bf16 %v1381_v56, %v1381_v56  ;;  %5837 = vmatprep.subr.bf16.mxu1 %v6517_v1 }
 0xbb9   :  { %v1499_v61 = vsel %vm231_vm2, %v6871_v59, 0 }
 0xc01   :  { %v1219_v35 = vpop.xlane.xlu0 %1218 }
 0xc02   :  { %v1223_v36 = vmul.f32 0.03125, %v1219_v35 }
 0xc04   :  { %v1225_v37 = vadd.f32 1e-05, %v1223_v36 }
 0xc05   :  { %v1222_v38 = vpop.xlane.xlu0 %1221 }
 0xc06   :  { %6371 = vrsqrt.f32 %v1225_v37  ;;  %v1224_v41 = vmul.f32 0.03125, %v1222_v38 }
 0xc08   :  { %v1226_v20 = vadd.f32 1e-05, %v1224_v41 }
 0xc0a   :  { %6373 = vrsqrt.f32 %v1226_v20 }
 0xc13   :  { %v6372_v27 = vpop.eup %6371 }
 0xc14   :  { %v1229_v39 = vmul.f32 %v6372_v27, %v1213_v23 }
 0xc16   :  { %v1235_v44 = vmul.f32 %v5351_v42, %v1229_v39 }
 0xc17   :  { %v6374_v31 = vpop.eup %6373 }
 0xc18   :  { %v1230_v43 = vmul.f32 %v6374_v31, %v1214_v28  ;;  %v6845_v47 = vadd.f32 %v5352_v45, %v1235_v44 }
 0xc1a   :  { %v1236_v46 = vmul.f32 %v5351_v42, %v1230_v43 }
 0xc1c   :  { %v6847_v48 = vadd.f32 %v5352_v45, %v1236_v46 }
 0xc1e   :  { %v1243_v50 = vpack.c.bf16 %v6847_v48, %v6845_v47 }
 0xc20   :  { %5806 = vmatmul.mubr.msk.bf16.vlgmr.msra.gmra.mxu0 %vm64_vm1, %v1243_v50 }
 0xc21   :  { %5818 = vmatpush3.bf16.msra.mxu0 %v6307_v49  ;;  %5821 = vmatprep.mubr.msk.bf16.mxu0 %vm6518_vm0, %v6517_v1 }
 0xc22   :  { %5819 = vmatprep.subr.bf16.mxu0 %v6517_v1 }
 0xc25   :  { %5820 = vmatpush3.bf16.msra.mxu0 %v6308_v51 }
 0xc26   :  { %5831 = vmatprep.subr.bf16.mxu0 %v6517_v1 }
 0xc28   :  { %5822 = vmatmul.mubr.msk.bf16.vlgmr.msra.gmra.mxu0 %vm64_vm1, %v6824_v32 }
 0xc29   :  { %5833 = vmatprep.mubr.msk.bf16.mxu0 %vm6518_vm0, %v6517_v1  ;;  %5832 = vmatpush3.bf16.xpose.msra.mxu0 %v1499_v61 }
 0xc2a   :  { %5843 = vmatprep.subr.bf16.mxu0 %v6517_v1 }
 0xce0   :  { %v1317_v63 = vpop.f32.mrf.mxu0 }
 0xce1   :  { %v1318_v0 = vadd.f32 %v5353_v62, %v1317_v63 }
 0xce2   :  { %v5807_v2 = vpop.f32.mrf.mxu0 }
 0xce3   :  { %v1441_v5 = vmul.f32 0.35355338, %v1318_v0 }
 0xce4   :  { %v1320_v16 = vpop.f32.mrf.mxu0 }
 0xce5   :  { %v6882_v19 = vpack.c.bf16 %v1441_v5, %v1441_v5  ;;  %v1321_v6 = vadd.f32 %v5353_v62, %v1320_v16 }
 0xce6   :  { %v5808_v8 = vpop.f32.mrf.mxu0 }
 0xce7   :  { %v1442_v9 = vmul.f32 0.35355338, %v1321_v6  ;;  %5828 = vmatmul.mubr.msk.bf16.vlgmr.msra.gmra.mxu1 %vm231_vm2, %v6882_v19 }
 0xce8   :  { %v1434_v12 = vpop.f32.mrf.mxu0  ;;  %5839 = vmatprep.mubr.msk.bf16.mxu1 %vm6518_vm0, %v6517_v1 }
 0xce9   :  { %v6888_v13 = vpack.c.bf16 %v1442_v9, %v1442_v9  ;;  %v1435_v21 = vadd.f32 %v5361_v18, %v1434_v12 }
 0xcea   :  { %v5823_v14 = vpop.f32.mrf.mxu0 }
 0xceb   :  { %5834 = vmatmul.mubr.msk.bf16.vlgmr.msra.gmra.mxu0 %vm231_vm2, %v6888_v13  ;;  %v6897_v23 = vpack.c.bf16 %v1435_v21, %v1435_v21 }
 0xcec   :  { %v1437_v15 = vpop.f32.mrf.mxu0  ;;  %5845 = vmatprep.mubr.msk.bf16.mxu0 %vm6518_vm0, %v6517_v1 }
 0xced   :  { %v1438_v22 = vadd.f32 %v5361_v18, %v1437_v15  ;;  %v1569_v25 = vsel %vm351_vm3, %v6897_v23, 0 }
 0xcee   :  { %v5824_v17 = vpop.f32.mrf.mxu0  ;;  %5838 = vmatpush3.bf16.msra.mxu1 %v1569_v25 }
 0xcef   :  { %v6899_v24 = vpack.c.bf16 %v1438_v22, %v1438_v22  ;;  %5849 = vmatprep.subr.bf16.mxu1 %v6517_v1 }
 0xcf1   :  { %v1615_v26 = vsel %vm351_vm3, %v6899_v24, 0 }
 0xcf2   :  { %5844 = vmatpush3.bf16.msra.mxu0 %v1615_v26 }
 0xcf3   :  { %5855 = vmatprep.subr.bf16.mxu0 %v6517_v1 }
 0xda7   :  { %v1489_v28 = vpop.f32.mrf.mxu1 }
 0xda8   :  { %v1541_v3 = vsel %vm231_vm2, %v1489_v28, -inf }
 0xda9   :  { %1542 = vmax.xlane.f32.xlu1 %v1541_v3  ;;  %v5829_v30 = vpop.f32.mrf.mxu1 }
 0xdab   :  { %v1492_v40 = vpop.f32.mrf.mxu1  ;;  %v1535_v4 = vpop.f32.mrf.mxu0 }
 0xdac   :  { %v1544_v7 = vsel %vm231_vm2, %v1535_v4, -inf }
 0xdad   :  { %1545 = vmax.xlane.f32.xlu0 %v1544_v7  ;;  %v5830_v10 = vpop.f32.mrf.mxu1  ;;  %v5835_v11 = vpop.f32.mrf.mxu0 }
 0xdaf   :  { %v1538_v33 = vpop.f32.mrf.mxu0 }
 0xdb1   :  { %v5836_v34 = vpop.f32.mrf.mxu0 }
 0xdba   :  { %1661 = vrot.lane.b32.xlu1 %v6869_v58, %s6519_s12 }
 0xe32   :  { %v1543_v35 = vpop.xlane.xlu1 %1542 }
 0xe33   :  { %v1547_v36 = vsub.f32 %v1489_v28, %v1543_v35 }
 0xe35   :  { %v1549_v37 = vmul.f32 1.442695, %v1547_v36 }
 0xe36   :  { %v1546_v38 = vpop.xlane.xlu0 %1545  ;;  %v1662_v43 = vpop.permute.xlu1 %1661 }
 0xe37   :  { %6375 = vpow2.f32 %v1549_v37  ;;  %v1548_v41 = vsub.f32 %v1535_v4, %v1546_v38  ;;  %v1667_v52 = vsel %vm231_vm2, %v1662_v43, 0 }
 0xe39   :  { %v1551_v20 = vmul.f32 1.442695, %v1548_v41 }
 0xe3b   :  { %6377 = vpow2.f32 %v1551_v20 }
 0xe44   :  { %v6376_v27 = vpop.eup %6375 }
 0xe45   :  { %v1553_v39 = vsel %vm231_vm2, %v6376_v27, 0.0 }
 0xe46   :  { %1554 = vadd.xlane.f32.xlu1 %v1553_v39 }
 0xe48   :  { %v6378_v42 = vpop.eup %6377 }
 0xe49   :  { %v1556_v31 = vsel %vm231_vm2, %v6378_v42, 0.0 }
 0xe4a   :  { %1557 = vadd.xlane.f32.xlu0 %v1556_v31 }
 0xe57   :  { %1658 = vrot.lane.b32.xlu1 %v6882_v19, %s6519_s12 }
 0xe5b   :  { %1710 = vrot.lane.b32.xlu1 %v6888_v13, %s6519_s12 }
 0xe60   :  { %1713 = vrot.lane.b32.xlu0 %v6871_v59, %s6519_s12 }
 0xecf   :  { %v1555_v44 = vpop.xlane.xlu1 %1554 }
 0xed0   :  { %6379 = vrcp.f32 %v1555_v44 }
 0xed3   :  { %v1558_v45 = vpop.xlane.xlu0 %1557  ;;  %v1659_v56 = vpop.permute.xlu1 %1658 }
 0xed4   :  { %6381 = vrcp.f32 %v1558_v45 }
 0xed7   :  { %v1714_v53 = vpop.permute.xlu0 %1713  ;;  %v1711_v57 = vpop.permute.xlu1 %1710 }
 0xed8   :  { %v1719_v55 = vsel %vm231_vm2, %v1714_v53, 0 }
 0xedd   :  { %v6380_v46 = vpop.eup %6379 }
 0xede   :  { %v1561_v49 = vmul.f32 %v6380_v46, %v6376_v27 }
 0xee0   :  { %v1563_v50 = vpack.c.bf16 %v1561_v49, %v1561_v49 }
 0xee1   :  { %v6382_v51 = vpop.eup %6381 }
 0xee2   :  { %5840 = vmatmul.mubr.msk.bf16.vlgmr.msra.gmra.mxu1 %vm231_vm2, %v1563_v50  ;;  %v1562_v29 = vmul.f32 %v6382_v51, %v6378_v42 }
 0xee3   :  { %5850 = vmatpush3.bf16.xpose.msra.mxu1 %v1667_v52  ;;  %5851 = vmatprep.mubr.msk.bf16.mxu1 %vm6518_vm0, %v6517_v1 }
 0xee4   :  { %v1564_v54 = vpack.c.bf16 %v1562_v29, %v1562_v29  ;;  %5861 = vmatprep.subr.bf16.mxu1 %v6517_v1 }
 0xee6   :  { %5846 = vmatmul.mubr.msk.bf16.vlgmr.msra.gmra.mxu0 %vm231_vm2, %v1564_v54 }
 0xee7   :  { %5856 = vmatpush3.bf16.xpose.msra.mxu0 %v1719_v55  ;;  %5857 = vmatprep.mubr.msk.bf16.mxu0 %vm6518_vm0, %v6517_v1 }
 0xee8   :  { %5867 = vmatprep.subr.bf16.mxu0 %v6517_v1 }
 0xeea   :  { %5852 = vmatmul.mubr.msk.bf16.vlgmr.msra.gmra.mxu1 %vm231_vm2, %v1659_v56 }
 0xeeb   :  { %5863 = vmatprep.mubr.msk.bf16.mxu1 %vm6518_vm0, %v6517_v1 }
 0xeee   :  { %5858 = vmatmul.mubr.msk.bf16.vlgmr.msra.gmra.mxu0 %vm231_vm2, %v1711_v57 }
 0xeef   :  { %5869 = vmatprep.mubr.msk.bf16.mxu0 %vm6518_vm0, %v6517_v1 }
 0xfa2   :  { %v6935_v60 = vpop.f32.mrf.mxu1 }
 0xfa4   :  { %v5841_v61 = vpop.f32.mrf.mxu1 }
 0xfa6   :  { %v1608_v62 = vpop.f32.mrf.mxu1  ;;  %v6937_v63 = vpop.f32.mrf.mxu0 }
 0xfa8   :  { %v5842_v0 = vpop.f32.mrf.mxu1  ;;  %v5847_v2 = vpop.f32.mrf.mxu0 }
 0xfaa   :  { %v1654_v5 = vpop.f32.mrf.mxu0  ;;  %v1703_v16 = vpop.f32.mrf.mxu1 }
 0xfab   :  { %v1761_v6 = vsel %vm231_vm2, %v1703_v16, -inf }
 0xfac   :  { %v5848_v8 = vpop.f32.mrf.mxu0  ;;  %1762 = vmax.xlane.f32.xlu1 %v1761_v6  ;;  %v5853_v9 = vpop.f32.mrf.mxu1 }
 0xfae   :  { %v1706_v12 = vpop.f32.mrf.mxu1  ;;  %v1755_v14 = vpop.f32.mrf.mxu0 }
 0xfaf   :  { %v1764_v15 = vsel %vm231_vm2, %v1755_v14, -inf }
 0xfb0   :  { %1765 = vmax.xlane.f32.xlu0 %v1764_v15  ;;  %v5854_v17 = vpop.f32.mrf.mxu1  ;;  %v5859_v18 = vpop.f32.mrf.mxu0 }
 0xfb2   :  { %v1758_v21 = vpop.f32.mrf.mxu0 }
 0xfb4   :  { %v5860_v22 = vpop.f32.mrf.mxu0 }
 0xfbd   :  { %1786 = vrot.lane.b32.xlu1 %v6897_v23, %s6519_s12 }
 0xfc1   :  { %1885 = vrot.lane.b32.xlu1 %v6869_v58, %s6520_s15 }
 0xfc5   :  { %1935 = vrot.lane.b32.xlu1 %v6871_v59, %s6520_s15 }
 0xfc9   :  { %1883 = vrot.lane.b32.xlu1 %v6882_v19, %s6520_s15 }
0x1035   :  { %v1763_v25 = vpop.xlane.xlu1 %1762 }
0x1036   :  { %v1767_v26 = vsub.f32 %v1703_v16, %v1763_v25 }
0x1038   :  { %v1769_v28 = vmul.f32 1.442695, %v1767_v26 }
0x1039   :  { %v1766_v3 = vpop.xlane.xlu0 %1765  ;;  %v1787_v30 = vpop.permute.xlu1 %1786 }
0x103a   :  { %6383 = vpow2.f32 %v1769_v28  ;;  %v1768_v40 = vsub.f32 %v1755_v14, %v1766_v3  ;;  %v1792_v4 = vsel %vm351_vm3, %v1787_v30, 0 }
0x103b   :  { %5862 = vmatpush3.bf16.msra.mxu1 %v1792_v4 }
0x103c   :  { %v1771_v7 = vmul.f32 1.442695, %v1768_v40  ;;  %5873 = vmatprep.subr.bf16.mxu1 %v6517_v1 }
0x103d   :  { %v1886_v20 = vpop.permute.xlu1 %1885 }
0x103e   :  { %6385 = vpow2.f32 %v1771_v7  ;;  %v1891_v31 = vsel %vm231_vm2, %v1886_v20, 0 }
0x1041   :  { %v1936_v44 = vpop.permute.xlu1 %1935 }
0x1042   :  { %v1941_v46 = vsel %vm231_vm2, %v1936_v44, 0 }
0x1045   :  { %v1884_v49 = vpop.permute.xlu1 %1883 }
0x1047   :  { %v6384_v10 = vpop.eup %6383 }
0x1048   :  { %v1773_v11 = vsel %vm231_vm2, %v6384_v10, 0.0 }
0x1049   :  { %1774 = vadd.xlane.f32.xlu0 %v1773_v11 }
0x104b   :  { %v6386_v33 = vpop.eup %6385 }
0x104c   :  { %v1776_v34 = vsel %vm231_vm2, %v6386_v33, 0.0 }
0x104d   :  { %1777 = vadd.xlane.f32.xlu0 %v1776_v34 }
0x1063   :  { %1835 = vrot.lane.b32.xlu0 %v6899_v24, %s6519_s12 }
0x1067   :  { %1933 = vrot.lane.b32.xlu0 %v6888_v13, %s6520_s15 }
0x10d2   :  { %v1775_v35 = vpop.xlane.xlu0 %1774 }
0x10d3   :  { %6387 = vrcp.f32 %v1775_v35 }
0x10d6   :  { %v1778_v36 = vpop.xlane.xlu0 %1777 }
0x10d7   :  { %6389 = vrcp.f32 %v1778_v36 }
0x10da   :  { %v1836_v37 = vpop.permute.xlu0 %1835 }
0x10db   :  { %v1841_v38 = vsel %vm351_vm3, %v1836_v37, 0 }
0x10dc   :  { %5868 = vmatpush3.bf16.msra.mxu0 %v1841_v38 }
0x10dd   :  { %5879 = vmatprep.subr.bf16.mxu0 %v6517_v1 }
0x10de   :  { %v1934_v50 = vpop.permute.xlu0 %1933 }
0x10e0   :  { %v6388_v41 = vpop.eup %6387 }
0x10e1   :  { %v1781_v27 = vmul.f32 %v6388_v41, %v6384_v10 }
0x10e3   :  { %v1783_v39 = vpack.c.bf16 %v1781_v27, %v1781_v27 }
0x10e4   :  { %v6390_v42 = vpop.eup %6389 }
0x10e5   :  { %5864 = vmatmul.mubr.msk.bf16.vlgmr.msra.gmra.mxu1 %vm231_vm2, %v1783_v39  ;;  %v1782_v43 = vmul.f32 %v6390_v42, %v6386_v33 }
0x10e6   :  { %5874 = vmatpush3.bf16.xpose.msra.mxu1 %v1891_v31  ;;  %5875 = vmatprep.mubr.msk.bf16.mxu1 %vm6518_vm0, %v6517_v1 }
0x10e7   :  { %v1784_v45 = vpack.c.bf16 %v1782_v43, %v1782_v43  ;;  %5885 = vmatprep.subr.bf16.mxu1 %v6517_v1 }
0x10e9   :  { %5870 = vmatmul.mubr.msk.bf16.vlgmr.msra.gmra.mxu0 %vm231_vm2, %v1784_v45 }
0x10ea   :  { %5880 = vmatpush3.bf16.xpose.msra.mxu0 %v1941_v46  ;;  %5881 = vmatprep.mubr.msk.bf16.mxu0 %vm6518_vm0, %v6517_v1 }
0x10eb   :  { %5891 = vmatprep.subr.bf16.mxu0 %v6517_v1 }
0x10ed   :  { %5876 = vmatmul.mubr.msk.bf16.vlgmr.msra.gmra.mxu1 %vm231_vm2, %v1884_v49 }
0x10ee   :  { %5887 = vmatprep.mubr.msk.bf16.mxu1 %vm6518_vm0, %v6517_v1 }
0x10f1   :  { %5882 = vmatmul.mubr.msk.bf16.vlgmr.msra.gmra.mxu0 %vm231_vm2, %v1934_v50 }
0x10f2   :  { %5893 = vmatprep.mubr.msk.bf16.mxu0 %vm6518_vm0, %v6517_v1 }
0x11a5   :  { %v6975_v51 = vpop.f32.mrf.mxu1 }
0x11a7   :  { %v5865_v52 = vpop.f32.mrf.mxu1 }
0x11a9   :  { %v1831_v29 = vpop.f32.mrf.mxu1  ;;  %v6977_v53 = vpop.f32.mrf.mxu0 }
0x11aa   :  { %v6250_v54 = vpack.i.bf16 %v6977_v53, %v6975_v51 }
0x11ab   :  { %v5866_v55 = vpop.f32.mrf.mxu1  ;;  %v5871_v56 = vpop.f32.mrf.mxu0 }
0x11ad   :  { %v1880_v57 = vpop.f32.mrf.mxu0  ;;  %v1927_v61 = vpop.f32.mrf.mxu1 }
0x11ae   :  { %v1983_v62 = vsel %vm231_vm2, %v1927_v61, -inf }
0x11af   :  { %v5872_v0 = vpop.f32.mrf.mxu0  ;;  %1984 = vmax.xlane.f32.xlu1 %v1983_v62  ;;  %v5877_v2 = vpop.f32.mrf.mxu1 }
0x11b1   :  { %v1930_v5 = vpop.f32.mrf.mxu1  ;;  %v1977_v16 = vpop.f32.mrf.mxu0 }
0x11b2   :  { %v1986_v6 = vsel %vm231_vm2, %v1977_v16, -inf }
0x11b3   :  { %1987 = vmax.xlane.f32.xlu0 %v1986_v6  ;;  %v5878_v8 = vpop.f32.mrf.mxu1  ;;  %v5883_v9 = vpop.f32.mrf.mxu0 }
0x11b5   :  { %v1980_v12 = vpop.f32.mrf.mxu0 }
0x11b7   :  { %v5884_v14 = vpop.f32.mrf.mxu0 }
0x11c0   :  { %2007 = vrot.lane.b32.xlu1 %v6897_v23, %s6520_s15 }
0x11c4   :  { %2105 = vrot.lane.b32.xlu1 %v6869_v58, %s6521_s16 }
0x11c8   :  { %2155 = vrot.lane.b32.xlu1 %v6871_v59, %s6521_s16 }
0x11cc   :  { %2103 = vrot.lane.b32.xlu1 %v6882_v19, %s6521_s16 }
0x1238   :  { %v1985_v15 = vpop.xlane.xlu1 %1984 }
0x1239   :  { %v1989_v17 = vsub.f32 %v1927_v61, %v1985_v15 }
0x123b   :  { %v1991_v18 = vmul.f32 1.442695, %v1989_v17 }
0x123c   :  { %v1988_v21 = vpop.xlane.xlu0 %1987  ;;  %v2008_v22 = vpop.permute.xlu1 %2007 }
0x123d   :  { %6391 = vpow2.f32 %v1991_v18  ;;  %v1990_v25 = vsub.f32 %v1977_v16, %v1988_v21  ;;  %v2013_v26 = vsel %vm351_vm3, %v2008_v22, 0 }
0x123e   :  { %5886 = vmatpush3.bf16.msra.mxu1 %v2013_v26 }
0x123f   :  { %v1993_v28 = vmul.f32 1.442695, %v1990_v25  ;;  %5897 = vmatprep.subr.bf16.mxu1 %v6517_v1 }
0x1240   :  { %v2106_v11 = vpop.permute.xlu1 %2105 }
0x1241   :  { %6393 = vpow2.f32 %v1993_v28  ;;  %v2111_v36 = vsel %vm231_vm2, %v2106_v11, 0 }
0x1244   :  { %v2156_v37 = vpop.permute.xlu1 %2155 }
0x1245   :  { %v2161_v41 = vsel %vm231_vm2, %v2156_v37, 0 }
0x1248   :  { %v2104_v20 = vpop.permute.xlu1 %2103 }
0x124a   :  { %v6392_v58 = vpop.eup %6391 }
0x124b   :  { %v1995_v59 = vsel %vm231_vm2, %v6392_v58, 0.0 }
0x124c   :  { %1996 = vadd.xlane.f32.xlu0 %v1995_v59 }
0x124e   :  { %v6394_v3 = vpop.eup %6393 }
0x124f   :  { %v1998_v19 = vsel %vm231_vm2, %v6394_v3, 0.0 }
0x1250   :  { %1999 = vadd.xlane.f32.xlu0 %v1998_v19  ;;  %v6309_v19 = vld [vmem:[%s7677_s2 + $0x78] sm:$0xff]  }
0x1266   :  { %2055 = vrot.lane.b32.xlu0 %v6899_v24, %s6520_s15 }
0x126a   :  { %2153 = vrot.lane.b32.xlu0 %v6888_v13, %s6521_s16 }
0x12d5   :  { %v1997_v30 = vpop.xlane.xlu0 %1996 }
0x12d6   :  { %6395 = vrcp.f32 %v1997_v30  ;;  %v6310_v30 = vld [vmem:[%s7677_s2 + $0x70] sm:$0xff]  }
0x12d9   :  { %v2000_v40 = vpop.xlane.xlu0 %1999 }
0x12da   :  { %6397 = vrcp.f32 %v2000_v40 }
0x12dd   :  { %v2056_v4 = vpop.permute.xlu0 %2055 }
0x12de   :  { %v2061_v7 = vsel %vm351_vm3, %v2056_v4, 0 }
0x12df   :  { %5892 = vmatpush3.bf16.msra.mxu0 %v2061_v7 }
0x12e0   :  { %5903 = vmatprep.subr.bf16.mxu0 %v6517_v1 }
0x12e1   :  { %v2154_v27 = vpop.permute.xlu0 %2153 }
0x12e3   :  { %v6396_v10 = vpop.eup %6395 }
0x12e4   :  { %v2003_v33 = vmul.f32 %v6396_v10, %v6392_v58 }
0x12e6   :  { %v2005_v34 = vpack.c.bf16 %v2003_v33, %v2003_v33 }
0x12e7   :  { %v6398_v35 = vpop.eup %6397 }
0x12e8   :  { %5888 = vmatmul.mubr.msk.bf16.vlgmr.msra.gmra.mxu1 %vm231_vm2, %v2005_v34  ;;  %v2004_v13 = vmul.f32 %v6398_v35, %v6394_v3 }
0x12e9   :  { %5898 = vmatpush3.bf16.xpose.msra.mxu1 %v2111_v36  ;;  %5899 = vmatprep.mubr.msk.bf16.mxu1 %vm6518_vm0, %v6517_v1 }
0x12ea   :  { %v2006_v38 = vpack.c.bf16 %v2004_v13, %v2004_v13  ;;  %5909 = vmatprep.subr.bf16.mxu1 %v6517_v1 }
0x12ec   :  { %5894 = vmatmul.mubr.msk.bf16.vlgmr.msra.gmra.mxu0 %vm231_vm2, %v2006_v38 }
0x12ed   :  { %5904 = vmatpush3.bf16.xpose.msra.mxu0 %v2161_v41  ;;  %5905 = vmatprep.mubr.msk.bf16.mxu0 %vm6518_vm0, %v6517_v1 }
0x12ee   :  { %5915 = vmatprep.subr.bf16.mxu0 %v6517_v1 }
0x12f0   :  { %5900 = vmatmul.mubr.msk.bf16.vlgmr.msra.gmra.mxu1 %vm231_vm2, %v2104_v20 }
0x12f1   :  { %5911 = vmatprep.mubr.msk.bf16.mxu1 %vm6518_vm0, %v6517_v1 }
0x12f4   :  { %5906 = vmatmul.mubr.msk.bf16.vlgmr.msra.gmra.mxu0 %vm231_vm2, %v2154_v27 }
0x12f5   :  { %5917 = vmatprep.mubr.msk.bf16.mxu0 %vm6518_vm0, %v6517_v1 }
0x13a8   :  { %v2049_v39 = vpop.f32.mrf.mxu1 }
0x13aa   :  { %v5889_v42 = vpop.f32.mrf.mxu1 }
0x13ac   :  { %v2052_v31 = vpop.f32.mrf.mxu1  ;;  %v2097_v43 = vpop.f32.mrf.mxu0 }
0x13ad   :  { %v6255_v5 = vpack.i.bf16 %v2097_v43, %v2049_v39 }
0x13ae   :  { %v5890_v44 = vpop.f32.mrf.mxu1  ;;  %v5895_v45 = vpop.f32.mrf.mxu0 }
0x13b0   :  { %v2100_v46 = vpop.f32.mrf.mxu0  ;;  %v2147_v49 = vpop.f32.mrf.mxu1 }
0x13b1   :  { %v2203_v50 = vsel %vm231_vm2, %v2147_v49, -inf }
0x13b2   :  { %v5896_v52 = vpop.f32.mrf.mxu0  ;;  %2204 = vmax.xlane.f32.xlu1 %v2203_v50  ;;  %v5901_v29 = vpop.f32.mrf.mxu1 }
0x13b4   :  { %v2150_v55 = vpop.f32.mrf.mxu1  ;;  %v2197_v56 = vpop.f32.mrf.mxu0 }
0x13b5   :  { %v2206_v57 = vsel %vm231_vm2, %v2197_v56, -inf }
0x13b6   :  { %2207 = vmax.xlane.f32.xlu0 %v2206_v57  ;;  %v5902_v61 = vpop.f32.mrf.mxu1  ;;  %v5907_v62 = vpop.f32.mrf.mxu0 }
0x13b8   :  { %v2200_v0 = vpop.f32.mrf.mxu0 }
0x13ba   :  { %v5908_v2 = vpop.f32.mrf.mxu0 }
0x13c3   :  { %2227 = vrot.lane.b32.xlu1 %v6897_v23, %s6521_s16 }
0x13c7   :  { %6251 = vrot.lane.b32.xlu1 %v6250_v54, %s6522_s17 }
0x13cb   :  { %6256 = vrot.lane.b32.xlu1 %v6255_v5, %s6523_s18 }
0x143b   :  { %v2205_v16 = vpop.xlane.xlu1 %2204 }
0x143c   :  { %v2209_v6 = vsub.f32 %v2147_v49, %v2205_v16 }
0x143e   :  { %v2211_v8 = vmul.f32 1.442695, %v2209_v6 }
0x143f   :  { %v2208_v9 = vpop.xlane.xlu0 %2207  ;;  %v2228_v12 = vpop.permute.xlu1 %2227 }
0x1440   :  { %6399 = vpow2.f32 %v2211_v8  ;;  %v2210_v14 = vsub.f32 %v2197_v56, %v2208_v9  ;;  %v2233_v15 = vsel %vm351_vm3, %v2228_v12, 0 }
0x1441   :  { %5910 = vmatpush3.bf16.msra.mxu1 %v2233_v15 }
0x1442   :  { %v2213_v17 = vmul.f32 1.442695, %v2210_v14  ;;  %5921 = vmatprep.subr.bf16.mxu1 %v6517_v1 }
0x1443   :  { %v6252_v13 = vpop.permute.xlu1 %6251 }
0x1444   :  { %6401 = vpow2.f32 %v2213_v17  ;;  %v6254_v38 = vunpack.i.h.bf16 %v6252_v13  ;;  %v6253_v41 = vunpack.i.l.bf16 %v6252_v13 }
0x1446   :  { %v2348_v42 = vsel %vm231_vm2, %v6937_v63, %v6254_v38  ;;  %v2347_v31 = vsel %vm231_vm2, %v6935_v60, %v6253_v41  ;;  %v5381_v60 = vld [vmem:[%s7679_s4 + $0x7] ss:$0 sm:$0xff] }
0x1447   :  { %v6257_v37 = vpop.permute.xlu1 %6256 }
0x1448   :  { %v6259_v20 = vunpack.i.h.bf16 %v6257_v37  ;;  %v6258_v27 = vunpack.i.l.bf16 %v6257_v37 }
0x144a   :  { %v2349_v45 = vsel %vm1133_vm4, %v2347_v31, %v6258_v27  ;;  %v2350_v46 = vsel %vm1133_vm4, %v2348_v42, %v6259_v20  ;;  %v5391_v31 = vld [vmem:[%s7679_s4 + $0xf] ss:$0 sm:$0xff] }
0x144d   :  { %v6400_v23 = vpop.eup %6399 }
0x144e   :  { %v2215_v51 = vsel %vm231_vm2, %v6400_v23, 0.0 }
0x144f   :  { %2216 = vadd.xlane.f32.xlu0 %v2215_v51  ;;  %v6312_v51 = vld [vmem:[%s7678_s3] sm:$0xff]  }
0x1451   :  { %v6402_v53 = vpop.eup %6401 }
0x1452   :  { %v2218_v54 = vsel %vm231_vm2, %v6402_v53, 0.0 }
0x1453   :  { %2219 = vadd.xlane.f32.xlu0 %v2218_v54 }
0x1469   :  { %2275 = vrot.lane.b32.xlu0 %v6899_v24, %s6521_s16 }
0x14d8   :  { %v2217_v18 = vpop.xlane.xlu0 %2216 }
0x14d9   :  { %6403 = vrcp.f32 %v2217_v18 }
0x14dc   :  { %v2220_v21 = vpop.xlane.xlu0 %2219 }
0x14dd   :  { %6405 = vrcp.f32 %v2220_v21 }
0x14e0   :  { %v2276_v22 = vpop.permute.xlu0 %2275 }
0x14e1   :  { %v2281_v25 = vsel %vm351_vm3, %v2276_v22, 0 }
0x14e2   :  { %5916 = vmatpush3.bf16.msra.mxu0 %v2281_v25 }
0x14e3   :  { %5929 = vmatprep.subr.bf16.mxu0 %v6517_v1 }
0x14e6   :  { %v6404_v26 = vpop.eup %6403 }
0x14e7   :  { %v2223_v28 = vmul.f32 %v6404_v26, %v6400_v23 }
0x14e9   :  { %v2225_v58 = vpack.c.bf16 %v2223_v28, %v2223_v28 }
0x14ea   :  { %v6406_v59 = vpop.eup %6405 }
0x14eb   :  { %5912 = vmatmul.mubr.msk.bf16.vlgmr.msra.gmra.mxu1 %vm231_vm2, %v2225_v58  ;;  %v2224_v3 = vmul.f32 %v6406_v59, %v6402_v53  ;;  %v6313_v53 = vld [vmem:[%s7677_s2 + $0x98] sm:$0xff]   ;;  %v5385_v59 = vld [vmem:[%s7679_s4 + $0xa] ss:$0 sm:$0xff] }
0x14ec   :  { %5925 = vmatprep.mubr.msk.bf16.mxu1 %vm6518_vm0, %v6517_v1  ;;  %5922 = vmatpush3.bf16.msra.mxu1 %v6309_v19 }
0x14ed   :  { %v2226_v24 = vpack.c.bf16 %v2224_v3, %v2224_v3  ;;  %5923 = vmatprep.subr.bf16.mxu1 %v6517_v1 }
0x14ef   :  { %5918 = vmatmul.mubr.msk.bf16.vlgmr.msra.gmra.mxu0 %vm231_vm2, %v2226_v24 }
0x14f0   :  { %5933 = vmatprep.mubr.msk.bf16.mxu0 %vm6518_vm0, %v6517_v1  ;;  %5924 = vmatpush3.bf16.msra.mxu1 %v6310_v30  ;;  %v5386_v30 = vld [vmem:[%s7679_s4 + $0xb] ss:$0 sm:$0xff] }
0x14f1   :  { %5937 = vmatprep.subr.bf16.mxu1 %v6517_v1 }
0x15ab   :  { %v2269_v40 = vpop.f32.mrf.mxu1 }
0x15ad   :  { %v5913_v4 = vpop.f32.mrf.mxu1 }
0x15af   :  { %v2272_v7 = vpop.f32.mrf.mxu1  ;;  %v2317_v10 = vpop.f32.mrf.mxu0 }
0x15b0   :  { %v6260_v11 = vpack.i.bf16 %v2317_v10, %v2269_v40 }
0x15b1   :  { %v5914_v33 = vpop.f32.mrf.mxu1  ;;  %v5919_v34 = vpop.f32.mrf.mxu0 }
0x15b2   :  { %6261 = vrot.lane.b32.xlu1 %v6260_v11, %s6524_s23  ;;  %v6314_v11 = vld [vmem:[%s7677_s2 + $0x90] sm:$0xff]   ;;  %v6315_v33 = vld [vmem:[%s7677_s2 + $0x88] sm:$0xff]   ;;  %v6316_v34 = vld [vmem:[%s7677_s2 + $0x80] sm:$0xff]  }
0x15b3   :  { %v2320_v35 = vpop.f32.mrf.mxu0 }
0x15b4   :  { %v5387_v35 = vld [vmem:[%s7679_s4 + $0xe] ss:$0 sm:$0xff] }
0x15b5   :  { %v5920_v36 = vpop.f32.mrf.mxu0 }
0x1624   :  { %v6262_v39 = vpop.permute.xlu1 %6261 }
0x1625   :  { %v6264_v43 = vunpack.i.h.bf16 %v6262_v39  ;;  %v6263_v44 = vunpack.i.l.bf16 %v6262_v39 }
0x1627   :  { %v2352_v49 = vsel %vm1136_vm5, %v2350_v46, %v6264_v43  ;;  %v2351_v50 = vsel %vm1136_vm5, %v2349_v45, %v6263_v44 }
0x1628   :  { %v2353_v52 = vpack.c.bf16 %v2352_v49, %v2351_v50 }
0x162a   :  { %5926 = vmatmul.mubr.msk.bf16.vlgmr.msra.gmra.mxu1 %vm64_vm1, %v2353_v52 }
0x162b   :  { %5945 = vmatprep.mubr.msk.bf16.mxu1 %vm6518_vm0, %v6517_v1  ;;  %5938 = vmatpush3.bf16.msra.mxu1 %v6313_v53 }
0x162c   :  { %5939 = vmatprep.subr.bf16.mxu1 %v6517_v1 }
0x162f   :  { %5940 = vmatpush3.bf16.msra.mxu1 %v6314_v11 }
0x1630   :  { %5941 = vmatprep.subr.bf16.mxu1 %v6517_v1 }
0x1633   :  { %5942 = vmatpush3.bf16.msra.mxu1 %v6315_v33 }
0x1634   :  { %5943 = vmatprep.subr.bf16.mxu1 %v6517_v1 }
0x1637   :  { %5944 = vmatpush3.bf16.msra.mxu1 %v6316_v34 }
0x1638   :  { %5965 = vmatprep.subr.bf16.mxu1 %v6517_v1 }
0x16ea   :  { %v2407_v63 = vpop.f32.mrf.mxu1 }
0x16eb   :  { %v2408_v29 = vadd.f32 %v5381_v60, %v2407_v63 }
0x16ec   :  { %v5927_v55 = vpop.f32.mrf.mxu1 }
0x16ed   :  { %v2414_v56 = vadd.f32 %v2408_v29, %v6845_v47 }
0x16ee   :  { %v2410_v57 = vpop.f32.mrf.mxu1 }
0x16ef   :  { %v2411_v61 = vadd.f32 %v5381_v60, %v2410_v57  ;;  %v2418_v62 = vsel %vm64_vm1, %v2414_v56, 0.0 }
0x16f0   :  { %2419 = vadd.xlane.f32.xlu0 %v2418_v62  ;;  %v5928_v0 = vpop.f32.mrf.mxu1 }
0x16f1   :  { %v2415_v2 = vadd.f32 %v2411_v61, %v6847_v48  ;;  %v6311_v48 = vld [vmem:[%s7678_s3 + $0x8] sm:$0xff]  }
0x16f2   :  { %5930 = vmatpush3.bf16.msra.mxu0 %v6311_v48 }
0x16f3   :  { %v2421_v5 = vsel %vm64_vm1, %v2415_v2, 0.0  ;;  %5931 = vmatprep.subr.bf16.mxu0 %v6517_v1 }
0x16f4   :  { %2422 = vadd.xlane.f32.xlu1 %v2421_v5 }
0x16f6   :  { %5932 = vmatpush3.bf16.msra.mxu0 %v6312_v51 }
0x16f7   :  { %5949 = vmatprep.subr.bf16.mxu0 %v6517_v1 }
0x1779   :  { %v2420_v16 = vpop.xlane.xlu0 %2419 }
0x177a   :  { %v2424_v6 = vmul.f32 0.03125, %v2420_v16 }
0x177c   :  { %v2426_v8 = vsub.f32 %v2414_v56, %v2424_v6 }
0x177d   :  { %v2423_v9 = vpop.xlane.xlu1 %2422 }
0x177e   :  { %v2425_v12 = vmul.f32 0.03125, %v2423_v9  ;;  %v2428_v14 = vmul.f32 %v2426_v8, %v2426_v8  ;;  %v6318_v9 = vld [vmem:[%s7677_s2 + $0xc8] sm:$0xff]  }
0x1780   :  { %v2427_v15 = vsub.f32 %v2415_v2, %v2425_v12  ;;  %v2430_v47 = vsel %vm64_vm1, %v2428_v14, 0.0  ;;  %v6319_v12 = vld [vmem:[%s7677_s2 + $0xa0] sm:$0xff]  }
0x1781   :  { %2431 = vadd.xlane.f32.xlu0 %v2430_v47  ;;  %v6320_v14 = vld [vmem:[%s7677_s2 + $0xc0] sm:$0xff]  }
0x1782   :  { %v2429_v17 = vmul.f32 %v2427_v15, %v2427_v15 }
0x1784   :  { %v2433_v23 = vsel %vm64_vm1, %v2429_v17, 0.0 }
0x1785   :  { %2434 = vadd.xlane.f32.xlu0 %v2433_v23 }
0x180a   :  { %v2432_v54 = vpop.xlane.xlu0 %2431 }
0x180b   :  { %v2436_v18 = vmul.f32 0.03125, %v2432_v54 }
0x180d   :  { %v2438_v21 = vadd.f32 1e-05, %v2436_v18  ;;  %v5397_v18 = vld [vmem:[%s7679_s4 + $0xc] ss:$0 sm:$0xff] }
0x180e   :  { %v2435_v22 = vpop.xlane.xlu0 %2434 }
0x180f   :  { %6407 = vrsqrt.f32 %v2438_v21  ;;  %v2437_v25 = vmul.f32 0.03125, %v2435_v22 }
0x1811   :  { %v2439_v26 = vadd.f32 1e-05, %v2437_v25 }
0x1813   :  { %6409 = vrsqrt.f32 %v2439_v26  ;;  %v5398_v26 = vld [vmem:[%s7679_s4 + $0xd] ss:$0 sm:$0xff] }
0x181c   :  { %v6408_v28 = vpop.eup %6407 }
0x181d   :  { %v2442_v58 = vmul.f32 %v6408_v28, %v2426_v8  ;;  %v6317_v8 = vld [vmem:[%s7677_s2 + $0xa8] sm:$0xff]  }
0x181f   :  { %v2448_v19 = vmul.f32 %v5385_v59, %v2442_v58 }
0x1820   :  { %v6410_v3 = vpop.eup %6409 }
0x1821   :  { %v2443_v24 = vmul.f32 %v6410_v3, %v2427_v15  ;;  %v2454_v4 = vadd.f32 %v5386_v30, %v2448_v19  ;;  %v6321_v3 = vld [vmem:[%s7677_s2 + $0xb8] sm:$0xff]   ;;  %v6322_v19 = vld [vmem:[%s7677_s2 + $0xb0] sm:$0xff]  }
0x1823   :  { %v2449_v40 = vmul.f32 %v5385_v59, %v2443_v24 }
0x1825   :  { %v2455_v7 = vadd.f32 %v5386_v30, %v2449_v40 }
0x1827   :  { %v2456_v10 = vpack.c.bf16 %v2455_v7, %v2454_v4 }
0x1829   :  { %5934 = vmatmul.mubr.msk.bf16.vlgmr.msra.gmra.mxu0 %vm64_vm1, %v2456_v10 }
0x182a   :  { %5953 = vmatprep.mubr.msk.bf16.mxu0 %vm6518_vm0, %v6517_v1  ;;  %5950 = vmatpush3.bf16.msra.mxu0 %v6317_v8 }
0x182b   :  { %5951 = vmatprep.subr.bf16.mxu0 %v6517_v1 }
0x182e   :  { %5952 = vmatpush3.bf16.msra.mxu0 %v6319_v12 }
0x182f   :  { %5957 = vmatprep.subr.bf16.mxu0 %v6517_v1 }
0x18e9   :  { %v2515_v36 = vpop.f32.mrf.mxu0 }
0x18ea   :  { %v2516_v37 = vadd.f32 %v5387_v35, %v2515_v36  ;;  %v5399_v36 = vld [vmem:[%s7679_s4 + $0x10] ss:$0 sm:$0xff] }
0x18eb   :  { %v5935_v13 = vpop.f32.mrf.mxu0 }
0x18ec   :  { %v2522_v27 = vmax.f32 %v2516_v37, 0.0 }
0x18ed   :  { %v2518_v38 = vpop.f32.mrf.mxu0 }
0x18ee   :  { %v2519_v41 = vadd.f32 %v5387_v35, %v2518_v38  ;;  %v5403_v35 = vld [vmem:[%s7679_s4 + $0x11] ss:$0 sm:$0xff]  ;;  %v5407_v38 = vld [vmem:[%s7679_s4 + $0x12] ss:$0 sm:$0xff] }
0x18ef   :  { %v5936_v20 = vpop.f32.mrf.mxu0 }
0x18f0   :  { %v2523_v39 = vmax.f32 %v2519_v41, 0.0 }
0x18f2   :  { %v2524_v42 = vpack.c.bf16 %v2523_v39, %v2522_v27 }
0x18f4   :  { %5946 = vmatmul.mubr.msk.bf16.vlgmr.msra.gmra.mxu1 %vm2562_vm6, %v2524_v42 }
0x18f5   :  { %5969 = vmatprep.mubr.msk.bf16.mxu1 %vm6518_vm0, %v6517_v1  ;;  %5966 = vmatpush3.bf16.msra.mxu1 %v6318_v9 }
0x18f6   :  { %5967 = vmatprep.subr.bf16.mxu1 %v6517_v1 }
0x18f9   :  { %5968 = vmatpush3.bf16.msra.mxu1 %v6320_v14 }
0x18fa   :  { %5979 = vmatprep.subr.bf16.mxu1 %v6517_v1 }
0x19b4   :  { %v2600_v43 = vpop.f32.mrf.mxu1 }
0x19b5   :  { %v2601_v44 = vadd.f32 %v5391_v31, %v2600_v43 }
0x19b6   :  { %v5947_v45 = vpop.f32.mrf.mxu1 }
0x19b7   :  { %v2607_v46 = vadd.f32 %v2601_v44, %v2454_v4 }
0x19b8   :  { %v2603_v49 = vpop.f32.mrf.mxu1 }
0x19b9   :  { %v2604_v50 = vadd.f32 %v5391_v31, %v2603_v49  ;;  %v2611_v52 = vsel %vm64_vm1, %v2607_v46, 0.0 }
0x19ba   :  { %2612 = vadd.xlane.f32.xlu0 %v2611_v52  ;;  %v5948_v60 = vpop.f32.mrf.mxu1 }
0x19bb   :  { %v2608_v63 = vadd.f32 %v2604_v50, %v2455_v7 }
0x19bd   :  { %v2614_v29 = vsel %vm64_vm1, %v2608_v63, 0.0 }
0x19be   :  { %2615 = vadd.xlane.f32.xlu1 %v2614_v29 }
0x1a43   :  { %v2613_v55 = vpop.xlane.xlu0 %2612 }
0x1a44   :  { %v2617_v56 = vmul.f32 0.03125, %v2613_v55 }
0x1a46   :  { %v2619_v57 = vsub.f32 %v2607_v46, %v2617_v56 }
0x1a47   :  { %v2616_v61 = vpop.xlane.xlu1 %2615 }
0x1a48   :  { %v2618_v62 = vmul.f32 0.03125, %v2616_v61  ;;  %v2621_v0 = vmul.f32 %v2619_v57, %v2619_v57 }
0x1a4a   :  { %v2620_v2 = vsub.f32 %v2608_v63, %v2618_v62  ;;  %v2623_v5 = vsel %vm64_vm1, %v2621_v0, 0.0 }
0x1a4b   :  { %2624 = vadd.xlane.f32.xlu0 %v2623_v5 }
0x1a4c   :  { %v2622_v16 = vmul.f32 %v2620_v2, %v2620_v2 }
0x1a4e   :  { %v2626_v6 = vsel %vm64_vm1, %v2622_v16, 0.0 }
0x1a4f   :  { %2627 = vadd.xlane.f32.xlu1 %v2626_v6 }
0x1ad4   :  { %v2625_v15 = vpop.xlane.xlu0 %2624 }
0x1ad5   :  { %v2629_v47 = vmul.f32 0.03125, %v2625_v15 }
0x1ad7   :  { %v2631_v17 = vadd.f32 1e-05, %v2629_v47 }
0x1ad8   :  { %v2628_v23 = vpop.xlane.xlu1 %2627 }
0x1ad9   :  { %6411 = vrsqrt.f32 %v2631_v17  ;;  %v2630_v48 = vmul.f32 0.03125, %v2628_v23 }
0x1adb   :  { %v2632_v51 = vadd.f32 1e-05, %v2630_v48 }
0x1add   :  { %6413 = vrsqrt.f32 %v2632_v51 }
0x1ae6   :  { %v6412_v53 = vpop.eup %6411 }
0x1ae7   :  { %v2635_v54 = vmul.f32 %v6412_v53, %v2619_v57 }
0x1ae9   :  { %v2641_v25 = vmul.f32 %v5397_v18, %v2635_v54 }
0x1aea   :  { %v6414_v21 = vpop.eup %6413 }
0x1aeb   :  { %v2636_v22 = vmul.f32 %v6414_v21, %v2620_v2  ;;  %v7137_v58 = vadd.f32 %v5398_v26, %v2641_v25 }
0x1aed   :  { %v2642_v28 = vmul.f32 %v5397_v18, %v2636_v22 }
0x1aef   :  { %v7139_v59 = vadd.f32 %v5398_v26, %v2642_v28 }
0x1af1   :  { %v2649_v24 = vpack.c.bf16 %v7139_v59, %v7137_v58 }
0x1af3   :  { %5954 = vmatmul.mubr.msk.bf16.vlgmr.msra.gmra.mxu0 %vm64_vm1, %v2649_v24  ;;  %5970 = vmatmul.mubr.msk.bf16.vlgmr.msra.gmra.mxu1 %vm64_vm1, %v2649_v24 }
0x1af4   :  { %5958 = vmatpush3.bf16.msra.mxu0 %v6321_v3  ;;  %5961 = vmatprep.mubr.msk.bf16.mxu0 %vm6518_vm0, %v6517_v1 }
0x1af5   :  { %5959 = vmatprep.subr.bf16.mxu0 %v6517_v1  ;;  %5981 = vmatprep.mubr.msk.bf16.mxu1 %vm6518_vm0, %v6517_v1 }
0x1af8   :  { %5960 = vmatpush3.bf16.msra.mxu0 %v6322_v19 }
0x1af9   :  { %5973 = vmatprep.subr.bf16.mxu0 %v6517_v1 }
0x1afb   :  { %5962 = vmatmul.mubr.msk.bf16.vlgmr.msra.gmra.mxu0 %vm64_vm1, %v2649_v24 }
0x1afc   :  { %5975 = vmatprep.mubr.msk.bf16.mxu0 %vm6518_vm0, %v6517_v1 }
0x1bb3   :  { %v2723_v30 = vpop.f32.mrf.mxu0  ;;  %v2837_v40 = vpop.f32.mrf.mxu1 }
0x1bb4   :  { %v2724_v20 = vadd.f32 %v5399_v36, %v2723_v30  ;;  %v2838_v42 = vadd.f32 %v5407_v38, %v2837_v40 }
0x1bb5   :  { %v5955_v4 = vpop.f32.mrf.mxu0  ;;  %v5971_v7 = vpop.f32.mrf.mxu1 }
0x1bb6   :  { %v2844_v45 = vmul.f32 0.35355338, %v2724_v20  ;;  %v7176_v50 = vpack.c.bf16 %v2838_v42, %v2838_v42 }
0x1bb7   :  { %v2726_v10 = vpop.f32.mrf.mxu0  ;;  %v2840_v11 = vpop.f32.mrf.mxu1 }
0x1bb8   :  { %v2727_v46 = vadd.f32 %v5399_v36, %v2726_v10  ;;  %v2841_v52 = vadd.f32 %v5407_v38, %v2840_v11  ;;  %v7180_v63 = vpack.c.bf16 %v2844_v45, %v2844_v45  ;;  %v2972_v56 = vsel %vm351_vm3, %v7176_v50, 0 }
0x1bb9   :  { %v5956_v33 = vpop.f32.mrf.mxu0  ;;  %v5972_v34 = vpop.f32.mrf.mxu1 }
0x1bba   :  { %v2845_v29 = vmul.f32 0.35355338, %v2727_v46  ;;  %v7183_v55 = vpack.c.bf16 %v2841_v52, %v2841_v52 }
0x1bbb   :  { %v2780_v13 = vpop.f32.mrf.mxu0 }
0x1bbc   :  { %v2781_v37 = vadd.f32 %v5403_v35, %v2780_v13  ;;  %v7191_v57 = vpack.c.bf16 %v2845_v29, %v2845_v29  ;;  %v3018_v61 = vsel %vm351_vm3, %v7183_v55, 0 }
0x1bbd   :  { %v5963_v41 = vpop.f32.mrf.mxu0 }
0x1bbe   :  { %v7169_v27 = vpack.c.bf16 %v2781_v37, %v2781_v37 }
0x1bbf   :  { %v2783_v39 = vpop.f32.mrf.mxu0 }
0x1bc0   :  { %v2784_v31 = vadd.f32 %v5403_v35, %v2783_v39  ;;  %v2856_v43 = vsel %vm231_vm2, %v7169_v27, 0 }
0x1bc1   :  { %v5964_v44 = vpop.f32.mrf.mxu0  ;;  %5974 = vmatpush3.bf16.xpose.msra.mxu0 %v2856_v43 }
0x1bc2   :  { %v7173_v49 = vpack.c.bf16 %v2784_v31, %v2784_v31  ;;  %5985 = vmatprep.subr.bf16.mxu0 %v6517_v1 }
0x1bc4   :  { %v2902_v60 = vsel %vm231_vm2, %v7173_v49, 0 }
0x1bc5   :  { %5980 = vmatpush3.bf16.xpose.msra.mxu1 %v2902_v60 }
0x1bc6   :  { %5991 = vmatprep.subr.bf16.mxu1 %v6517_v1 }
0x1bc8   :  { %5976 = vmatmul.mubr.msk.bf16.vlgmr.msra.gmra.mxu0 %vm231_vm2, %v7180_v63 }
0x1bc9   :  { %5986 = vmatpush3.bf16.msra.mxu0 %v2972_v56  ;;  %5987 = vmatprep.mubr.msk.bf16.mxu0 %vm6518_vm0, %v6517_v1 }
0x1bca   :  { %5997 = vmatprep.subr.bf16.mxu0 %v6517_v1 }
0x1bcc   :  { %5982 = vmatmul.mubr.msk.bf16.vlgmr.msra.gmra.mxu1 %vm231_vm2, %v7191_v57 }
0x1bcd   :  { %5992 = vmatpush3.bf16.msra.mxu1 %v3018_v61  ;;  %5993 = vmatprep.mubr.msk.bf16.mxu1 %vm6518_vm0, %v6517_v1 }
0x1bce   :  { %6003 = vmatprep.subr.bf16.mxu1 %v6517_v1 }
0x1c88   :  { %v2892_v62 = vpop.f32.mrf.mxu0 }
0x1c89   :  { %v2944_v0 = vsel %vm231_vm2, %v2892_v62, -inf }
0x1c8a   :  { %2945 = vmax.xlane.f32.xlu0 %v2944_v0  ;;  %v5977_v2 = vpop.f32.mrf.mxu0 }
0x1c8c   :  { %v2895_v5 = vpop.f32.mrf.mxu0  ;;  %v2938_v16 = vpop.f32.mrf.mxu1 }
0x1c8d   :  { %v2947_v6 = vsel %vm231_vm2, %v2938_v16, -inf }
0x1c8e   :  { %v5978_v8 = vpop.f32.mrf.mxu0  ;;  %2948 = vmax.xlane.f32.xlu1 %v2947_v6  ;;  %v5983_v9 = vpop.f32.mrf.mxu1 }
0x1c90   :  { %v2941_v12 = vpop.f32.mrf.mxu1 }
0x1c92   :  { %v5984_v14 = vpop.f32.mrf.mxu1 }
0x1c9f   :  { %3116 = vrot.lane.b32.xlu1 %v7173_v49, %s6519_s12 }
0x1d13   :  { %v2946_v15 = vpop.xlane.xlu0 %2945 }
0x1d14   :  { %v2950_v47 = vsub.f32 %v2892_v62, %v2946_v15 }
0x1d16   :  { %v2952_v17 = vmul.f32 1.442695, %v2950_v47 }
0x1d17   :  { %v2949_v23 = vpop.xlane.xlu1 %2948 }
0x1d18   :  { %6415 = vpow2.f32 %v2952_v17  ;;  %v2951_v48 = vsub.f32 %v2938_v16, %v2949_v23 }
0x1d1a   :  { %v2954_v51 = vmul.f32 1.442695, %v2951_v48 }
0x1d1b   :  { %v3117_v22 = vpop.permute.xlu1 %3116 }
0x1d1c   :  { %6417 = vpow2.f32 %v2954_v51  ;;  %v3122_v10 = vsel %vm231_vm2, %v3117_v22, 0 }
0x1d25   :  { %v6416_v53 = vpop.eup %6415 }
0x1d26   :  { %v2956_v54 = vsel %vm231_vm2, %v6416_v53, 0.0 }
0x1d27   :  { %2957 = vadd.xlane.f32.xlu0 %v2956_v54 }
0x1d29   :  { %v6418_v18 = vpop.eup %6417 }
0x1d2a   :  { %v2959_v21 = vsel %vm231_vm2, %v6418_v18, 0.0 }
0x1d2b   :  { %2960 = vadd.xlane.f32.xlu1 %v2959_v21 }
0x1d3c   :  { %3061 = vrot.lane.b32.xlu1 %v7180_v63, %s6519_s12 }
0x1d3d   :  { %3064 = vrot.lane.b32.xlu0 %v7169_v27, %s6519_s12 }
0x1d40   :  { %3113 = vrot.lane.b32.xlu1 %v7191_v57, %s6519_s12 }
0x1db0   :  { %v2958_v25 = vpop.xlane.xlu0 %2957 }
0x1db1   :  { %6419 = vrcp.f32 %v2958_v25 }
0x1db4   :  { %v2961_v26 = vpop.xlane.xlu1 %2960  ;;  %v3065_v24 = vpop.permute.xlu0 %3064 }
0x1db5   :  { %6421 = vrcp.f32 %v2961_v26  ;;  %v3070_v40 = vsel %vm231_vm2, %v3065_v24, 0 }
0x1db8   :  { %v3062_v11 = vpop.permute.xlu1 %3061 }
0x1dbc   :  { %v3114_v33 = vpop.permute.xlu1 %3113 }
0x1dbe   :  { %v6420_v28 = vpop.eup %6419 }
0x1dbf   :  { %v2964_v3 = vmul.f32 %v6420_v28, %v6416_v53 }
0x1dc1   :  { %v2966_v19 = vpack.c.bf16 %v2964_v3, %v2964_v3 }
0x1dc2   :  { %v6422_v30 = vpop.eup %6421 }
0x1dc3   :  { %5988 = vmatmul.mubr.msk.bf16.vlgmr.msra.gmra.mxu0 %vm231_vm2, %v2966_v19  ;;  %v2965_v4 = vmul.f32 %v6422_v30, %v6418_v18 }
0x1dc4   :  { %5998 = vmatpush3.bf16.xpose.msra.mxu0 %v3070_v40  ;;  %5999 = vmatprep.mubr.msk.bf16.mxu0 %vm6518_vm0, %v6517_v1 }
0x1dc5   :  { %v2967_v7 = vpack.c.bf16 %v2965_v4, %v2965_v4  ;;  %6009 = vmatprep.subr.bf16.mxu0 %v6517_v1 }
0x1dc7   :  { %5994 = vmatmul.mubr.msk.bf16.vlgmr.msra.gmra.mxu1 %vm231_vm2, %v2967_v7 }
0x1dc8   :  { %6004 = vmatpush3.bf16.xpose.msra.mxu1 %v3122_v10  ;;  %6005 = vmatprep.mubr.msk.bf16.mxu1 %vm6518_vm0, %v6517_v1 }
0x1dc9   :  { %6015 = vmatprep.subr.bf16.mxu1 %v6517_v1 }
0x1dcb   :  { %6000 = vmatmul.mubr.msk.bf16.vlgmr.msra.gmra.mxu0 %vm231_vm2, %v3062_v11 }
0x1dcc   :  { %6011 = vmatprep.mubr.msk.bf16.mxu0 %vm6518_vm0, %v6517_v1 }
0x1dcf   :  { %6006 = vmatmul.mubr.msk.bf16.vlgmr.msra.gmra.mxu1 %vm231_vm2, %v3114_v33 }
0x1dd0   :  { %6017 = vmatprep.mubr.msk.bf16.mxu1 %vm6518_vm0, %v6517_v1 }
0x1e83   :  { %v7229_v34 = vpop.f32.mrf.mxu0 }
0x1e85   :  { %v5989_v35 = vpop.f32.mrf.mxu0 }
0x1e87   :  { %v3011_v36 = vpop.f32.mrf.mxu0  ;;  %v7231_v13 = vpop.f32.mrf.mxu1 }
0x1e89   :  { %v5990_v37 = vpop.f32.mrf.mxu0  ;;  %v5995_v38 = vpop.f32.mrf.mxu1 }
0x1e8b   :  { %v3057_v41 = vpop.f32.mrf.mxu1  ;;  %v3106_v20 = vpop.f32.mrf.mxu0 }
0x1e8c   :  { %v3164_v39 = vsel %vm231_vm2, %v3106_v20, -inf }
0x1e8d   :  { %3165 = vmax.xlane.f32.xlu0 %v3164_v39  ;;  %v5996_v42 = vpop.f32.mrf.mxu1  ;;  %v6001_v31 = vpop.f32.mrf.mxu0 }
0x1e8f   :  { %v3109_v43 = vpop.f32.mrf.mxu0  ;;  %v3158_v44 = vpop.f32.mrf.mxu1 }
0x1e90   :  { %v3167_v45 = vsel %vm231_vm2, %v3158_v44, -inf }
0x1e91   :  { %v6002_v46 = vpop.f32.mrf.mxu0  ;;  %3168 = vmax.xlane.f32.xlu1 %v3167_v45  ;;  %v6007_v52 = vpop.f32.mrf.mxu1 }
0x1e93   :  { %v3161_v60 = vpop.f32.mrf.mxu1 }
0x1e95   :  { %v6008_v29 = vpop.f32.mrf.mxu1 }
0x1ea2   :  { %3238 = vrot.lane.b32.xlu1 %v7183_v55, %s6519_s12 }
0x1ea6   :  { %3288 = vrot.lane.b32.xlu1 %v7169_v27, %s6520_s15 }
0x1eaa   :  { %3338 = vrot.lane.b32.xlu1 %v7173_v49, %s6520_s15 }
0x1eae   :  { %3336 = vrot.lane.b32.xlu1 %v7191_v57, %s6520_s15 }
0x1f16   :  { %v3166_v56 = vpop.xlane.xlu0 %3165 }
0x1f17   :  { %v3170_v61 = vsub.f32 %v3106_v20, %v3166_v56 }
0x1f19   :  { %v3172_v62 = vmul.f32 1.442695, %v3170_v61 }
0x1f1a   :  { %v3169_v0 = vpop.xlane.xlu1 %3168 }
0x1f1b   :  { %6423 = vpow2.f32 %v3172_v62  ;;  %v3171_v2 = vsub.f32 %v3158_v44, %v3169_v0 }
0x1f1d   :  { %v3174_v5 = vmul.f32 1.442695, %v3171_v2 }
0x1f1e   :  { %v3239_v16 = vpop.permute.xlu1 %3238 }
0x1f1f   :  { %6425 = vpow2.f32 %v3174_v5  ;;  %v3244_v6 = vsel %vm351_vm3, %v3239_v16, 0 }
0x1f20   :  { %6016 = vmatpush3.bf16.msra.mxu1 %v3244_v6 }
0x1f21   :  { %6027 = vmatprep.subr.bf16.mxu1 %v6517_v1 }
0x1f22   :  { %v3289_v51 = vpop.permute.xlu1 %3288 }
0x1f23   :  { %v3294_v21 = vsel %vm231_vm2, %v3289_v51, 0 }
0x1f26   :  { %v3339_v25 = vpop.permute.xlu1 %3338 }
0x1f27   :  { %v3344_v28 = vsel %vm231_vm2, %v3339_v25, 0 }
0x1f28   :  { %v6424_v8 = vpop.eup %6423 }
0x1f29   :  { %v3176_v9 = vsel %vm231_vm2, %v6424_v8, 0.0 }
0x1f2a   :  { %3177 = vadd.xlane.f32.xlu0 %v3176_v9  ;;  %v3337_v24 = vpop.permute.xlu1 %3336 }
0x1f2c   :  { %v6426_v12 = vpop.eup %6425 }
0x1f2d   :  { %v3179_v14 = vsel %vm231_vm2, %v6426_v12, 0.0 }
0x1f2e   :  { %3180 = vadd.xlane.f32.xlu0 %v3179_v14 }
0x1f44   :  { %3189 = vrot.lane.b32.xlu0 %v7176_v50, %s6519_s12 }
0x1f48   :  { %3286 = vrot.lane.b32.xlu0 %v7180_v63, %s6520_s15 }
0x1fb3   :  { %v3178_v15 = vpop.xlane.xlu0 %3177 }
0x1fb4   :  { %6427 = vrcp.f32 %v3178_v15 }
0x1fb7   :  { %v3181_v47 = vpop.xlane.xlu0 %3180 }
0x1fb8   :  { %6429 = vrcp.f32 %v3181_v47 }
0x1fbb   :  { %v3190_v17 = vpop.permute.xlu0 %3189 }
0x1fbc   :  { %v3195_v23 = vsel %vm351_vm3, %v3190_v17, 0 }
0x1fbd   :  { %6010 = vmatpush3.bf16.msra.mxu0 %v3195_v23 }
0x1fbe   :  { %6021 = vmatprep.subr.bf16.mxu0 %v6517_v1 }
0x1fbf   :  { %v3287_v3 = vpop.permute.xlu0 %3286 }
0x1fc1   :  { %v6428_v48 = vpop.eup %6427 }
0x1fc2   :  { %v3184_v53 = vmul.f32 %v6428_v48, %v6424_v8 }
0x1fc4   :  { %v3186_v54 = vpack.c.bf16 %v3184_v53, %v3184_v53 }
0x1fc5   :  { %v6430_v18 = vpop.eup %6429 }
0x1fc6   :  { %6012 = vmatmul.mubr.msk.bf16.vlgmr.msra.gmra.mxu0 %vm231_vm2, %v3186_v54  ;;  %v3185_v22 = vmul.f32 %v6430_v18, %v6426_v12 }
0x1fc7   :  { %6022 = vmatpush3.bf16.xpose.msra.mxu0 %v3294_v21  ;;  %6023 = vmatprep.mubr.msk.bf16.mxu0 %vm6518_vm0, %v6517_v1 }
0x1fc8   :  { %v3187_v26 = vpack.c.bf16 %v3185_v22, %v3185_v22  ;;  %6033 = vmatprep.subr.bf16.mxu0 %v6517_v1 }
0x1fca   :  { %6018 = vmatmul.mubr.msk.bf16.vlgmr.msra.gmra.mxu1 %vm231_vm2, %v3187_v26 }
0x1fcb   :  { %6028 = vmatpush3.bf16.xpose.msra.mxu1 %v3344_v28  ;;  %6029 = vmatprep.mubr.msk.bf16.mxu1 %vm6518_vm0, %v6517_v1 }
0x1fcc   :  { %6039 = vmatprep.subr.bf16.mxu1 %v6517_v1 }
0x1fce   :  { %6024 = vmatmul.mubr.msk.bf16.vlgmr.msra.gmra.mxu0 %vm231_vm2, %v3287_v3 }
0x1fcf   :  { %6035 = vmatprep.mubr.msk.bf16.mxu0 %vm6518_vm0, %v6517_v1 }
0x1fd2   :  { %6030 = vmatmul.mubr.msk.bf16.vlgmr.msra.gmra.mxu1 %vm231_vm2, %v3337_v24 }
0x1fd3   :  { %6041 = vmatprep.mubr.msk.bf16.mxu1 %vm6518_vm0, %v6517_v1 }
0x2086   :  { %v7269_v19 = vpop.f32.mrf.mxu0 }
0x2088   :  { %v6013_v30 = vpop.f32.mrf.mxu0 }
0x208a   :  { %v3234_v40 = vpop.f32.mrf.mxu0  ;;  %v7271_v4 = vpop.f32.mrf.mxu1 }
0x208b   :  { %v6265_v7 = vpack.i.bf16 %v7271_v4, %v7269_v19 }
0x208c   :  { %v6014_v10 = vpop.f32.mrf.mxu0  ;;  %v6019_v11 = vpop.f32.mrf.mxu1 }
0x208e   :  { %v3283_v33 = vpop.f32.mrf.mxu1  ;;  %v3330_v35 = vpop.f32.mrf.mxu0 }
0x208f   :  { %v3386_v36 = vsel %vm231_vm2, %v3330_v35, -inf }
0x2090   :  { %3387 = vmax.xlane.f32.xlu0 %v3386_v36  ;;  %v6020_v37 = vpop.f32.mrf.mxu1  ;;  %v6025_v38 = vpop.f32.mrf.mxu0 }
0x2092   :  { %v3333_v41 = vpop.f32.mrf.mxu0  ;;  %v3380_v20 = vpop.f32.mrf.mxu1 }
0x2093   :  { %v3389_v39 = vsel %vm231_vm2, %v3380_v20, -inf }
0x2094   :  { %v6026_v42 = vpop.f32.mrf.mxu0  ;;  %3390 = vmax.xlane.f32.xlu1 %v3389_v39  ;;  %v6031_v31 = vpop.f32.mrf.mxu1 }
0x2096   :  { %v3383_v43 = vpop.f32.mrf.mxu1 }
0x2098   :  { %v6032_v44 = vpop.f32.mrf.mxu1 }
0x20a5   :  { %3458 = vrot.lane.b32.xlu1 %v7183_v55, %s6520_s15 }
0x20a9   :  { %3508 = vrot.lane.b32.xlu1 %v7169_v27, %s6521_s16 }
0x20ad   :  { %3558 = vrot.lane.b32.xlu1 %v7173_v49, %s6521_s16 }
0x20b1   :  { %3556 = vrot.lane.b32.xlu1 %v7191_v57, %s6521_s16 }
0x2119   :  { %v3388_v45 = vpop.xlane.xlu0 %3387 }
0x211a   :  { %v3392_v46 = vsub.f32 %v3330_v35, %v3388_v45 }
0x211c   :  { %v3394_v52 = vmul.f32 1.442695, %v3392_v46 }
0x211d   :  { %v3391_v60 = vpop.xlane.xlu1 %3390 }
0x211e   :  { %6431 = vpow2.f32 %v3394_v52  ;;  %v3393_v29 = vsub.f32 %v3380_v20, %v3391_v60 }
0x2120   :  { %v3396_v56 = vmul.f32 1.442695, %v3393_v29 }
0x2121   :  { %v3459_v61 = vpop.permute.xlu1 %3458 }
0x2122   :  { %6433 = vpow2.f32 %v3396_v56  ;;  %v3464_v62 = vsel %vm351_vm3, %v3459_v61, 0 }
0x2123   :  { %6040 = vmatpush3.bf16.msra.mxu1 %v3464_v62 }
0x2124   :  { %6051 = vmatprep.subr.bf16.mxu1 %v6517_v1 }
0x2125   :  { %v3509_v9 = vpop.permute.xlu1 %3508 }
0x2126   :  { %v3514_v47 = vsel %vm231_vm2, %v3509_v9, 0 }
0x212b   :  { %v6432_v27 = vpop.eup %6431 }
0x212c   :  { %v3398_v49 = vsel %vm231_vm2, %v6432_v27, 0.0 }
0x212d   :  { %3399 = vadd.xlane.f32.xlu0 %v3398_v49 }
0x212f   :  { %v6434_v0 = vpop.eup %6433 }
0x2130   :  { %v3401_v57 = vsel %vm231_vm2, %v6434_v0, 0.0 }
0x2131   :  { %3402 = vadd.xlane.f32.xlu0 %v3401_v57  ;;  %v6323_v57 = vld [vmem:[%s7677_s2 + $0xd8] sm:$0xff]  }
0x2147   :  { %3410 = vrot.lane.b32.xlu0 %v7176_v50, %s6520_s15 }
0x214b   :  { %3506 = vrot.lane.b32.xlu0 %v7180_v63, %s6521_s16  ;;  %v3559_v63 = vpop.permute.xlu1 %3558 }
0x214c   :  { %v3564_v48 = vsel %vm231_vm2, %v3559_v63, 0 }
0x214f   :  { %v3557_v53 = vpop.permute.xlu1 %3556 }
0x21b6   :  { %v3400_v2 = vpop.xlane.xlu0 %3399 }
0x21b7   :  { %6435 = vrcp.f32 %v3400_v2  ;;  %v6324_v2 = vld [vmem:[%s7677_s2 + $0xd0] sm:$0xff]  }
0x21ba   :  { %v3403_v5 = vpop.xlane.xlu0 %3402 }
0x21bb   :  { %6437 = vrcp.f32 %v3403_v5 }
0x21be   :  { %v3411_v16 = vpop.permute.xlu0 %3410 }
0x21bf   :  { %v3416_v6 = vsel %vm351_vm3, %v3411_v16, 0 }
0x21c0   :  { %6034 = vmatpush3.bf16.msra.mxu0 %v3416_v6 }
0x21c1   :  { %6045 = vmatprep.subr.bf16.mxu0 %v6517_v1 }
0x21c2   :  { %v3507_v51 = vpop.permute.xlu0 %3506 }
0x21c4   :  { %v6436_v8 = vpop.eup %6435 }
0x21c5   :  { %v3406_v12 = vmul.f32 %v6436_v8, %v6432_v27 }
0x21c7   :  { %v3408_v14 = vpack.c.bf16 %v3406_v12, %v3406_v12 }
0x21c8   :  { %v6438_v15 = vpop.eup %6437 }
0x21c9   :  { %v3407_v17 = vmul.f32 %v6438_v15, %v6434_v0  ;;  %6036 = vmatmul.mubr.msk.bf16.vlgmr.msra.gmra.mxu0 %vm231_vm2, %v3408_v14 }
0x21ca   :  { %6046 = vmatpush3.bf16.xpose.msra.mxu0 %v3514_v47  ;;  %6047 = vmatprep.mubr.msk.bf16.mxu0 %vm6518_vm0, %v6517_v1 }
0x21cb   :  { %v3409_v23 = vpack.c.bf16 %v3407_v17, %v3407_v17  ;;  %6057 = vmatprep.subr.bf16.mxu0 %v6517_v1 }
0x21cd   :  { %6042 = vmatmul.mubr.msk.bf16.vlgmr.msra.gmra.mxu1 %vm231_vm2, %v3409_v23 }
0x21ce   :  { %6052 = vmatpush3.bf16.xpose.msra.mxu1 %v3564_v48  ;;  %6053 = vmatprep.mubr.msk.bf16.mxu1 %vm6518_vm0, %v6517_v1 }
0x21cf   :  { %6063 = vmatprep.subr.bf16.mxu1 %v6517_v1 }
0x21d1   :  { %6048 = vmatmul.mubr.msk.bf16.vlgmr.msra.gmra.mxu0 %vm231_vm2, %v3507_v51 }
0x21d2   :  { %6059 = vmatprep.mubr.msk.bf16.mxu0 %vm6518_vm0, %v6517_v1 }
0x21d5   :  { %6054 = vmatmul.mubr.msk.bf16.vlgmr.msra.gmra.mxu1 %vm231_vm2, %v3557_v53 }
0x21d6   :  { %6065 = vmatprep.mubr.msk.bf16.mxu1 %vm6518_vm0, %v6517_v1 }
0x2289   :  { %v3452_v54 = vpop.f32.mrf.mxu0 }
0x228b   :  { %v6037_v18 = vpop.f32.mrf.mxu0 }
0x228d   :  { %v3455_v21 = vpop.f32.mrf.mxu0  ;;  %v3500_v22 = vpop.f32.mrf.mxu1 }
0x228e   :  { %v6270_v41 = vpack.i.bf16 %v3500_v22, %v3452_v54 }
0x228f   :  { %v6038_v25 = vpop.f32.mrf.mxu0  ;;  %v6043_v26 = vpop.f32.mrf.mxu1 }
0x2291   :  { %v3503_v28 = vpop.f32.mrf.mxu1  ;;  %v3550_v3 = vpop.f32.mrf.mxu0 }
0x2292   :  { %v3606_v24 = vsel %vm231_vm2, %v3550_v3, -inf }
0x2293   :  { %3607 = vmax.xlane.f32.xlu0 %v3606_v24  ;;  %v6044_v30 = vpop.f32.mrf.mxu1  ;;  %v6049_v40 = vpop.f32.mrf.mxu0 }
0x2295   :  { %v3553_v10 = vpop.f32.mrf.mxu0  ;;  %v3600_v11 = vpop.f32.mrf.mxu1 }
0x2296   :  { %v3609_v33 = vsel %vm231_vm2, %v3600_v11, -inf }
0x2297   :  { %v6050_v35 = vpop.f32.mrf.mxu0  ;;  %3610 = vmax.xlane.f32.xlu1 %v3609_v33  ;;  %v6055_v36 = vpop.f32.mrf.mxu1 }
0x2299   :  { %v3603_v37 = vpop.f32.mrf.mxu1 }
0x229b   :  { %v6056_v38 = vpop.f32.mrf.mxu1 }
0x22a8   :  { %3678 = vrot.lane.b32.xlu1 %v7183_v55, %s6521_s16 }
0x22ac   :  { %6266 = vrot.lane.b32.xlu1 %v6265_v7, %s6522_s17 }
0x22b0   :  { %6271 = vrot.lane.b32.xlu1 %v6270_v41, %s6523_s18 }
0x231c   :  { %v3608_v20 = vpop.xlane.xlu0 %3607 }
0x231d   :  { %v3612_v39 = vsub.f32 %v3550_v3, %v3608_v20 }
0x231f   :  { %v3614_v42 = vmul.f32 1.442695, %v3612_v39 }
0x2320   :  { %v3611_v31 = vpop.xlane.xlu1 %3610 }
0x2321   :  { %6439 = vpow2.f32 %v3614_v42  ;;  %v3613_v43 = vsub.f32 %v3600_v11, %v3611_v31 }
0x2323   :  { %v3616_v44 = vmul.f32 1.442695, %v3613_v43 }
0x2324   :  { %v3679_v45 = vpop.permute.xlu1 %3678 }
0x2325   :  { %6441 = vpow2.f32 %v3616_v44  ;;  %v3684_v46 = vsel %vm351_vm3, %v3679_v45, 0 }
0x2326   :  { %6064 = vmatpush3.bf16.msra.mxu1 %v3684_v46 }
0x2327   :  { %6077 = vmatprep.subr.bf16.mxu1 %v6517_v1 }
0x2328   :  { %v6267_v17 = vpop.permute.xlu1 %6266 }
0x2329   :  { %v6269_v23 = vunpack.i.h.bf16 %v6267_v17  ;;  %v6268_v48 = vunpack.i.l.bf16 %v6267_v17 }
0x232b   :  { %v3751_v18 = vsel %vm231_vm2, %v7231_v13, %v6269_v23  ;;  %v3750_v21 = vsel %vm231_vm2, %v7229_v34, %v6268_v48  ;;  %v5427_v34 = vld [vmem:[%s7679_s4 + $0x13] ss:$0 sm:$0xff] }
0x232c   :  { %v6272_v63 = vpop.permute.xlu1 %6271 }
0x232d   :  { %v6274_v51 = vunpack.i.h.bf16 %v6272_v63  ;;  %v6273_v53 = vunpack.i.l.bf16 %v6272_v63 }
0x232e   :  { %v6440_v55 = vpop.eup %6439 }
0x232f   :  { %v3618_v19 = vsel %vm231_vm2, %v6440_v55, 0.0  ;;  %v3752_v26 = vsel %vm1133_vm4, %v3750_v21, %v6273_v53  ;;  %v3753_v28 = vsel %vm1133_vm4, %v3751_v18, %v6274_v51  ;;  %v5433_v21 = vld [vmem:[%s7679_s4 + $0x14] ss:$0 sm:$0xff] }
0x2330   :  { %3619 = vadd.xlane.f32.xlu0 %v3618_v19  ;;  %v6326_v19 = vld [vmem:[%s7677_s2 + $0xf0] sm:$0xff]  }
0x2332   :  { %v6442_v4 = vpop.eup %6441 }
0x2333   :  { %v3621_v7 = vsel %vm231_vm2, %v6442_v4, 0.0 }
0x2334   :  { %3622 = vadd.xlane.f32.xlu0 %v3621_v7  ;;  %v6328_v7 = vld [vmem:[%s7677_s2 + $0xe0] sm:$0xff]  }
0x234a   :  { %3630 = vrot.lane.b32.xlu0 %v7176_v50, %s6521_s16 }
0x23b9   :  { %v3620_v52 = vpop.xlane.xlu0 %3619 }
0x23ba   :  { %6443 = vrcp.f32 %v3620_v52 }
0x23bd   :  { %v3623_v60 = vpop.xlane.xlu0 %3622 }
0x23be   :  { %6445 = vrcp.f32 %v3623_v60 }
0x23c1   :  { %v3631_v29 = vpop.permute.xlu0 %3630 }
0x23c2   :  { %v3636_v56 = vsel %vm351_vm3, %v3631_v29, 0 }
0x23c3   :  { %6058 = vmatpush3.bf16.msra.mxu0 %v3636_v56 }
0x23c4   :  { %6069 = vmatprep.subr.bf16.mxu0 %v6517_v1 }
0x23c7   :  { %v6444_v61 = vpop.eup %6443 }
0x23c8   :  { %v3626_v62 = vmul.f32 %v6444_v61, %v6440_v55 }
0x23ca   :  { %v3628_v27 = vpack.c.bf16 %v3626_v62, %v3626_v62 }
0x23cb   :  { %v6446_v49 = vpop.eup %6445 }
0x23cc   :  { %v3627_v0 = vmul.f32 %v6446_v49, %v6442_v4  ;;  %6060 = vmatmul.mubr.msk.bf16.vlgmr.msra.gmra.mxu0 %vm231_vm2, %v3628_v27  ;;  %v6327_v4 = vld [vmem:[%s7677_s2 + $0xe8] sm:$0xff]  }
0x23cd   :  { %6073 = vmatprep.mubr.msk.bf16.mxu0 %vm6518_vm0, %v6517_v1  ;;  %6070 = vmatpush3.bf16.msra.mxu0 %v6323_v57 }
0x23ce   :  { %v3629_v50 = vpack.c.bf16 %v3627_v0, %v3627_v0  ;;  %6071 = vmatprep.subr.bf16.mxu0 %v6517_v1  ;;  %v5431_v0 = vld [vmem:[%s7679_s4 + $0x18] ss:$0 sm:$0xff] }
0x23d0   :  { %6066 = vmatmul.mubr.msk.bf16.vlgmr.msra.gmra.mxu1 %vm231_vm2, %v3629_v50 }
0x23d1   :  { %6081 = vmatprep.mubr.msk.bf16.mxu1 %vm6518_vm0, %v6517_v1  ;;  %6072 = vmatpush3.bf16.msra.mxu0 %v6324_v2 }
0x23d2   :  { %6085 = vmatprep.subr.bf16.mxu0 %v6517_v1  ;;  %6078 = vmatpush3.bf16.msra.mxu1 %v6327_v4 }
0x23d3   :  { %6079 = vmatprep.subr.bf16.mxu1 %v6517_v1 }
0x23d6   :  { %6080 = vmatpush3.bf16.msra.mxu1 %v6328_v7 }
0x23d7   :  { %6093 = vmatprep.subr.bf16.mxu1 %v6517_v1 }
0x248c   :  { %v3672_v5 = vpop.f32.mrf.mxu0 }
0x248e   :  { %v6061_v16 = vpop.f32.mrf.mxu0 }
0x2490   :  { %v3675_v6 = vpop.f32.mrf.mxu0  ;;  %v3720_v8 = vpop.f32.mrf.mxu1 }
0x2491   :  { %v6275_v9 = vpack.i.bf16 %v3720_v8, %v3672_v5  ;;  %v5432_v5 = vld [vmem:[%s7679_s4 + $0x19] ss:$0 sm:$0xff] }
0x2492   :  { %v6062_v12 = vpop.f32.mrf.mxu0  ;;  %v6067_v14 = vpop.f32.mrf.mxu1 }
0x2493   :  { %6276 = vrot.lane.b32.xlu0 %v6275_v9, %s6524_s23  ;;  %v6329_v9 = vld [vmem:[%s7677_s2 + $0x108] sm:$0xff]   ;;  %v6330_v14 = vld [vmem:[%s7677_s2 + $0x100] sm:$0xff]  }
0x2494   :  { %v3723_v15 = vpop.f32.mrf.mxu1 }
0x2495   :  { %v5437_v15 = vld [vmem:[%s7679_s4 + $0x15] ss:$0 sm:$0xff] }
0x2496   :  { %v6068_v47 = vpop.f32.mrf.mxu1 }
0x2505   :  { %v6277_v54 = vpop.permute.xlu0 %6276 }
0x2506   :  { %v6279_v22 = vunpack.i.h.bf16 %v6277_v54  ;;  %v6278_v25 = vunpack.i.l.bf16 %v6277_v54 }
0x2508   :  { %v3755_v3 = vsel %vm1136_vm5, %v3753_v28, %v6279_v22  ;;  %v3754_v24 = vsel %vm1136_vm5, %v3752_v26, %v6278_v25 }
0x2509   :  { %v3756_v30 = vpack.c.bf16 %v3755_v3, %v3754_v24 }
0x250b   :  { %6074 = vmatmul.mubr.msk.bf16.vlgmr.msra.gmra.mxu0 %vm64_vm1, %v3756_v30 }
0x250c   :  { %6089 = vmatprep.mubr.msk.bf16.mxu0 %vm6518_vm0, %v6517_v1 }
0x25cb   :  { %v3810_v13 = vpop.f32.mrf.mxu0 }
0x25cc   :  { %v3811_v40 = vadd.f32 %v5427_v34, %v3810_v13 }
0x25cd   :  { %v6075_v10 = vpop.f32.mrf.mxu0 }
0x25ce   :  { %v3817_v11 = vadd.f32 %v3811_v40, %v7137_v58 }
0x25cf   :  { %v3813_v33 = vpop.f32.mrf.mxu0 }
0x25d0   :  { %v3814_v35 = vadd.f32 %v5427_v34, %v3813_v33  ;;  %v3821_v36 = vsel %vm64_vm1, %v3817_v11, 0.0 }
0x25d1   :  { %3822 = vadd.xlane.f32.xlu1 %v3821_v36  ;;  %v6076_v37 = vpop.f32.mrf.mxu0  ;;  %v5441_v36 = vld [vmem:[%s7679_s4 + $0x16] ss:$0 sm:$0xff] }
0x25d2   :  { %v3818_v38 = vadd.f32 %v3814_v35, %v7139_v59  ;;  %v6325_v59 = vld [vmem:[%s7677_s2 + $0xf8] sm:$0xff]  }
0x25d3   :  { %6086 = vmatpush3.bf16.msra.mxu0 %v6325_v59 }
0x25d4   :  { %v3824_v41 = vsel %vm64_vm1, %v3818_v38, 0.0  ;;  %6087 = vmatprep.subr.bf16.mxu0 %v6517_v1 }
0x25d5   :  { %3825 = vadd.xlane.f32.xlu0 %v3824_v41 }
0x25d7   :  { %6088 = vmatpush3.bf16.msra.mxu0 %v6326_v19 }
0x25d8   :  { %6101 = vmatprep.subr.bf16.mxu0 %v6517_v1 }
0x25da   :  { %6090 = vmatmul.mubr.msk.bf16.vlgmr.msra.gmra.mxu0 %vm64_vm1, %v6824_v32 }
0x25db   :  { %6103 = vmatprep.mubr.msk.bf16.mxu0 %vm6518_vm0, %v6517_v1 }
0x265a   :  { %v3823_v20 = vpop.xlane.xlu1 %3822 }
0x265b   :  { %v3827_v39 = vmul.f32 0.03125, %v3823_v20 }
0x265d   :  { %v3829_v42 = vsub.f32 %v3817_v11, %v3827_v39 }
0x265e   :  { %v3826_v31 = vpop.xlane.xlu0 %3825 }
0x265f   :  { %v3828_v43 = vmul.f32 0.03125, %v3826_v31  ;;  %v3831_v44 = vmul.f32 %v3829_v42, %v3829_v42 }
0x2661   :  { %v3830_v45 = vsub.f32 %v3818_v38, %v3828_v43  ;;  %v3833_v58 = vsel %vm64_vm1, %v3831_v44, 0.0 }
0x2662   :  { %3834 = vadd.xlane.f32.xlu0 %v3833_v58 }
0x2663   :  { %v3832_v46 = vmul.f32 %v3830_v45, %v3830_v45 }
0x2665   :  { %v3836_v55 = vsel %vm64_vm1, %v3832_v46, 0.0 }
0x2666   :  { %3837 = vadd.xlane.f32.xlu0 %v3836_v55 }
0x269a   :  { %v3990_v47 = vpop.f32.mrf.mxu0 }
0x269b   :  { %v3991_v63 = vadd.f32 %v5437_v15, %v3990_v47 }
0x269c   :  { %v6091_v17 = vpop.f32.mrf.mxu0 }
0x269d   :  { %v7413_v53 = vpack.c.bf16 %v3991_v63, %v3991_v63 }
0x269e   :  { %v3993_v23 = vpop.f32.mrf.mxu0 }
0x269f   :  { %v3994_v48 = vadd.f32 %v5437_v15, %v3993_v23 }
0x26a0   :  { %v6092_v51 = vpop.f32.mrf.mxu0 }
0x26a1   :  { %v7415_v54 = vpack.c.bf16 %v3994_v48, %v3994_v48 }
0x26a3   :  { %v4112_v18 = vsel %vm231_vm2, %v7415_v54, 0 }
0x26eb   :  { %v3835_v52 = vpop.xlane.xlu0 %3834 }
0x26ec   :  { %v3839_v60 = vmul.f32 0.03125, %v3835_v52 }
0x26ee   :  { %v3841_v29 = vadd.f32 1e-05, %v3839_v60 }
0x26ef   :  { %v3838_v56 = vpop.xlane.xlu0 %3837 }
0x26f0   :  { %6447 = vrsqrt.f32 %v3841_v29  ;;  %v3840_v61 = vmul.f32 0.03125, %v3838_v56 }
0x26f2   :  { %v3842_v62 = vadd.f32 1e-05, %v3840_v61 }
0x26f4   :  { %6449 = vrsqrt.f32 %v3842_v62 }
0x26fd   :  { %v6448_v27 = vpop.eup %6447 }
0x26fe   :  { %v3845_v49 = vmul.f32 %v6448_v27, %v3829_v42 }
0x2700   :  { %v3851_v57 = vmul.f32 %v5431_v0, %v3845_v49 }
0x2701   :  { %v6450_v50 = vpop.eup %6449 }
0x2702   :  { %v3846_v2 = vmul.f32 %v6450_v50, %v3830_v45  ;;  %v7389_v6 = vadd.f32 %v5432_v5, %v3851_v57 }
0x2704   :  { %v3852_v16 = vmul.f32 %v5431_v0, %v3846_v2 }
0x2706   :  { %v7391_v8 = vadd.f32 %v5432_v5, %v3852_v16 }
0x2708   :  { %v3859_v12 = vpack.c.bf16 %v7391_v8, %v7389_v6 }
0x270a   :  { %6082 = vmatmul.mubr.msk.bf16.vlgmr.msra.gmra.mxu1 %vm64_vm1, %v3859_v12 }
0x270b   :  { %6094 = vmatpush3.bf16.msra.mxu1 %v6329_v9  ;;  %6097 = vmatprep.mubr.msk.bf16.mxu1 %vm6518_vm0, %v6517_v1 }
0x270c   :  { %6095 = vmatprep.subr.bf16.mxu1 %v6517_v1 }
0x270f   :  { %6096 = vmatpush3.bf16.msra.mxu1 %v6330_v14 }
0x2710   :  { %6107 = vmatprep.subr.bf16.mxu1 %v6517_v1 }
0x2712   :  { %6098 = vmatmul.mubr.msk.bf16.vlgmr.msra.gmra.mxu1 %vm64_vm1, %v6824_v32  ;;  %v4066_v32 = vsel %vm231_vm2, %v7413_v53, 0 }
0x2713   :  { %6109 = vmatprep.mubr.msk.bf16.mxu1 %vm6518_vm0, %v6517_v1  ;;  %6102 = vmatpush3.bf16.xpose.msra.mxu0 %v4066_v32 }
0x2714   :  { %6108 = vmatpush3.bf16.xpose.msra.mxu1 %v4112_v18  ;;  %6113 = vmatprep.subr.bf16.mxu0 %v6517_v1 }
0x2715   :  { %6119 = vmatprep.subr.bf16.mxu1 %v6517_v1 }
0x27ca   :  { %v3933_v22 = vpop.f32.mrf.mxu1 }
0x27cb   :  { %v3934_v25 = vadd.f32 %v5433_v21, %v3933_v22 }
0x27cc   :  { %v6083_v26 = vpop.f32.mrf.mxu1 }
0x27cd   :  { %v4054_v28 = vmul.f32 0.35355338, %v3934_v25 }
0x27ce   :  { %v3936_v3 = vpop.f32.mrf.mxu1 }
0x27cf   :  { %v7426_v24 = vpack.c.bf16 %v4054_v28, %v4054_v28  ;;  %v3937_v30 = vadd.f32 %v5433_v21, %v3936_v3 }
0x27d0   :  { %v6084_v34 = vpop.f32.mrf.mxu1 }
0x27d1   :  { %v4055_v13 = vmul.f32 0.35355338, %v3937_v30  ;;  %6104 = vmatmul.mubr.msk.bf16.vlgmr.msra.gmra.mxu0 %vm231_vm2, %v7426_v24 }
0x27d2   :  { %v4047_v40 = vpop.f32.mrf.mxu1  ;;  %6115 = vmatprep.mubr.msk.bf16.mxu0 %vm6518_vm0, %v6517_v1 }
0x27d3   :  { %v7432_v10 = vpack.c.bf16 %v4055_v13, %v4055_v13  ;;  %v4048_v37 = vadd.f32 %v5441_v36, %v4047_v40 }
0x27d4   :  { %v6099_v11 = vpop.f32.mrf.mxu1 }
0x27d5   :  { %6110 = vmatmul.mubr.msk.bf16.vlgmr.msra.gmra.mxu1 %vm231_vm2, %v7432_v10  ;;  %v7441_v41 = vpack.c.bf16 %v4048_v37, %v4048_v37 }
0x27d6   :  { %v4050_v33 = vpop.f32.mrf.mxu1  ;;  %6121 = vmatprep.mubr.msk.bf16.mxu1 %vm6518_vm0, %v6517_v1 }
0x27d7   :  { %v4051_v38 = vadd.f32 %v5441_v36, %v4050_v33  ;;  %v4182_v39 = vsel %vm351_vm3, %v7441_v41, 0 }
0x27d8   :  { %v6100_v35 = vpop.f32.mrf.mxu1  ;;  %6114 = vmatpush3.bf16.msra.mxu0 %v4182_v39 }
0x27d9   :  { %v7443_v20 = vpack.c.bf16 %v4051_v38, %v4051_v38  ;;  %6125 = vmatprep.subr.bf16.mxu0 %v6517_v1 }
0x27db   :  { %v4228_v42 = vsel %vm351_vm3, %v7443_v20, 0 }
0x27dc   :  { %6120 = vmatpush3.bf16.msra.mxu1 %v4228_v42 }
0x27dd   :  { %6131 = vmatprep.subr.bf16.mxu1 %v6517_v1 }
0x2891   :  { %v4102_v31 = vpop.f32.mrf.mxu0 }
0x2892   :  { %v4154_v43 = vsel %vm231_vm2, %v4102_v31, -inf }
0x2893   :  { %4155 = vmax.xlane.f32.xlu1 %v4154_v43  ;;  %v6105_v44 = vpop.f32.mrf.mxu0 }
0x2895   :  { %v4105_v45 = vpop.f32.mrf.mxu0  ;;  %v4148_v58 = vpop.f32.mrf.mxu1 }
0x2896   :  { %v4157_v46 = vsel %vm231_vm2, %v4148_v58, -inf }
0x2897   :  { %v6106_v55 = vpop.f32.mrf.mxu0  ;;  %4158 = vmax.xlane.f32.xlu0 %v4157_v46  ;;  %v6111_v59 = vpop.f32.mrf.mxu1 }
0x2899   :  { %v4151_v19 = vpop.f32.mrf.mxu1 }
0x289b   :  { %v6112_v4 = vpop.f32.mrf.mxu1 }
0x28a4   :  { %4274 = vrot.lane.b32.xlu1 %v7413_v53, %s6519_s12 }
0x291c   :  { %v4156_v7 = vpop.xlane.xlu1 %4155 }
0x291d   :  { %v4160_v52 = vsub.f32 %v4102_v31, %v4156_v7 }
0x291f   :  { %v4162_v60 = vmul.f32 1.442695, %v4160_v52 }
0x2920   :  { %v4159_v29 = vpop.xlane.xlu0 %4158  ;;  %v4275_v50 = vpop.permute.xlu1 %4274 }
0x2921   :  { %6451 = vpow2.f32 %v4162_v60  ;;  %v4161_v56 = vsub.f32 %v4148_v58, %v4159_v29  ;;  %v4280_v14 = vsel %vm231_vm2, %v4275_v50, 0 }
0x2923   :  { %v4164_v61 = vmul.f32 1.442695, %v4161_v56 }
0x2925   :  { %6453 = vpow2.f32 %v4164_v61 }
0x292e   :  { %v6452_v62 = vpop.eup %6451 }
0x292f   :  { %v4166_v27 = vsel %vm231_vm2, %v6452_v62, 0.0 }
0x2930   :  { %4167 = vadd.xlane.f32.xlu1 %v4166_v27 }
0x2932   :  { %v6454_v49 = vpop.eup %6453 }
0x2933   :  { %v4169_v0 = vsel %vm231_vm2, %v6454_v49, 0.0 }
0x2934   :  { %4170 = vadd.xlane.f32.xlu0 %v4169_v0 }
0x2941   :  { %4271 = vrot.lane.b32.xlu1 %v7426_v24, %s6519_s12 }
0x2945   :  { %4323 = vrot.lane.b32.xlu1 %v7432_v10, %s6519_s12 }
0x294a   :  { %4326 = vrot.lane.b32.xlu0 %v7415_v54, %s6519_s12 }
0x29b9   :  { %v4168_v57 = vpop.xlane.xlu1 %4167 }
0x29ba   :  { %6455 = vrcp.f32 %v4168_v57 }
0x29bd   :  { %v4171_v2 = vpop.xlane.xlu0 %4170  ;;  %v4272_v23 = vpop.permute.xlu1 %4271 }
0x29be   :  { %6457 = vrcp.f32 %v4171_v2 }
0x29c1   :  { %v4327_v47 = vpop.permute.xlu0 %4326  ;;  %v4324_v48 = vpop.permute.xlu1 %4323 }
0x29c2   :  { %v4332_v63 = vsel %vm231_vm2, %v4327_v47, 0 }
0x29c7   :  { %v6456_v5 = vpop.eup %6455 }
0x29c8   :  { %v4174_v16 = vmul.f32 %v6456_v5, %v6452_v62 }
0x29ca   :  { %v4176_v9 = vpack.c.bf16 %v4174_v16, %v4174_v16 }
0x29cb   :  { %v6458_v12 = vpop.eup %6457 }
0x29cc   :  { %v4175_v15 = vmul.f32 %v6458_v12, %v6454_v49  ;;  %6116 = vmatmul.mubr.msk.bf16.vlgmr.msra.gmra.mxu0 %vm231_vm2, %v4176_v9 }
0x29cd   :  { %6126 = vmatpush3.bf16.xpose.msra.mxu0 %v4280_v14  ;;  %6127 = vmatprep.mubr.msk.bf16.mxu0 %vm6518_vm0, %v6517_v1 }
0x29ce   :  { %v4177_v17 = vpack.c.bf16 %v4175_v15, %v4175_v15  ;;  %6137 = vmatprep.subr.bf16.mxu0 %v6517_v1 }
0x29d0   :  { %6122 = vmatmul.mubr.msk.bf16.vlgmr.msra.gmra.mxu1 %vm231_vm2, %v4177_v17 }
0x29d1   :  { %6132 = vmatpush3.bf16.xpose.msra.mxu1 %v4332_v63  ;;  %6133 = vmatprep.mubr.msk.bf16.mxu1 %vm6518_vm0, %v6517_v1 }
0x29d2   :  { %6143 = vmatprep.subr.bf16.mxu1 %v6517_v1 }
0x29d4   :  { %6128 = vmatmul.mubr.msk.bf16.vlgmr.msra.gmra.mxu0 %vm231_vm2, %v4272_v23 }
0x29d5   :  { %6139 = vmatprep.mubr.msk.bf16.mxu0 %vm6518_vm0, %v6517_v1 }
0x29d8   :  { %6134 = vmatmul.mubr.msk.bf16.vlgmr.msra.gmra.mxu1 %vm231_vm2, %v4324_v48 }
0x29d9   :  { %6145 = vmatprep.mubr.msk.bf16.mxu1 %vm6518_vm0, %v6517_v1 }
0x2a8c   :  { %v7479_v51 = vpop.f32.mrf.mxu0 }
0x2a8e   :  { %v6117_v32 = vpop.f32.mrf.mxu0 }
0x2a90   :  { %v4221_v18 = vpop.f32.mrf.mxu0  ;;  %v7481_v21 = vpop.f32.mrf.mxu1 }
0x2a92   :  { %v6118_v22 = vpop.f32.mrf.mxu0  ;;  %v6123_v25 = vpop.f32.mrf.mxu1 }
0x2a94   :  { %v4267_v26 = vpop.f32.mrf.mxu1  ;;  %v4316_v28 = vpop.f32.mrf.mxu0 }
0x2a95   :  { %v4374_v3 = vsel %vm231_vm2, %v4316_v28, -inf }
0x2a96   :  { %4375 = vmax.xlane.f32.xlu1 %v4374_v3  ;;  %v6124_v30 = vpop.f32.mrf.mxu1  ;;  %v6129_v34 = vpop.f32.mrf.mxu0 }
0x2a98   :  { %v4319_v13 = vpop.f32.mrf.mxu0  ;;  %v4368_v40 = vpop.f32.mrf.mxu1 }
0x2a99   :  { %v4377_v11 = vsel %vm231_vm2, %v4368_v40, -inf }
0x2a9a   :  { %v6130_v33 = vpop.f32.mrf.mxu0  ;;  %4378 = vmax.xlane.f32.xlu0 %v4377_v11  ;;  %v6135_v35 = vpop.f32.mrf.mxu1 }
0x2a9c   :  { %v4371_v36 = vpop.f32.mrf.mxu1 }
0x2a9e   :  { %v6136_v37 = vpop.f32.mrf.mxu1 }
0x2aa7   :  { %4399 = vrot.lane.b32.xlu1 %v7441_v41, %s6519_s12 }
0x2aab   :  { %4498 = vrot.lane.b32.xlu1 %v7413_v53, %s6520_s15 }
0x2aaf   :  { %4548 = vrot.lane.b32.xlu1 %v7415_v54, %s6520_s15 }
0x2ab3   :  { %4496 = vrot.lane.b32.xlu1 %v7426_v24, %s6520_s15 }
0x2b1f   :  { %v4376_v38 = vpop.xlane.xlu1 %4375 }
0x2b20   :  { %v4380_v39 = vsub.f32 %v4316_v28, %v4376_v38 }
0x2b22   :  { %v4382_v42 = vmul.f32 1.442695, %v4380_v39 }
0x2b23   :  { %v4400_v31 = vpop.permute.xlu1 %4399  ;;  %v4379_v43 = vpop.xlane.xlu0 %4378 }
0x2b24   :  { %6459 = vpow2.f32 %v4382_v42  ;;  %v4405_v44 = vsel %vm351_vm3, %v4400_v31, 0  ;;  %v4381_v45 = vsub.f32 %v4368_v40, %v4379_v43 }
0x2b25   :  { %6138 = vmatpush3.bf16.msra.mxu0 %v4405_v44 }
0x2b26   :  { %v4384_v58 = vmul.f32 1.442695, %v4381_v45  ;;  %6149 = vmatprep.subr.bf16.mxu0 %v6517_v1 }
0x2b27   :  { %v4499_v56 = vpop.permute.xlu1 %4498 }
0x2b28   :  { %6461 = vpow2.f32 %v4384_v58  ;;  %v4504_v49 = vsel %vm231_vm2, %v4499_v56, 0 }
0x2b2b   :  { %v4549_v50 = vpop.permute.xlu1 %4548 }
0x2b2c   :  { %v4554_v2 = vsel %vm231_vm2, %v4549_v50, 0 }
0x2b2f   :  { %v4497_v5 = vpop.permute.xlu1 %4496 }
0x2b31   :  { %v6460_v46 = vpop.eup %6459 }
0x2b32   :  { %v4386_v55 = vsel %vm231_vm2, %v6460_v46, 0.0 }
0x2b33   :  { %4387 = vadd.xlane.f32.xlu0 %v4386_v55 }
0x2b35   :  { %v6462_v59 = vpop.eup %6461 }
0x2b36   :  { %v4389_v19 = vsel %vm231_vm2, %v6462_v59, 0.0 }
0x2b37   :  { %4390 = vadd.xlane.f32.xlu0 %v4389_v19 }
0x2b4d   :  { %4448 = vrot.lane.b32.xlu0 %v7443_v20, %s6519_s12 }
0x2b51   :  { %4546 = vrot.lane.b32.xlu0 %v7432_v10, %s6520_s15 }
0x2bbc   :  { %v4388_v4 = vpop.xlane.xlu0 %4387 }
0x2bbd   :  { %6463 = vrcp.f32 %v4388_v4 }
0x2bc0   :  { %v4391_v7 = vpop.xlane.xlu0 %4390 }
0x2bc1   :  { %6465 = vrcp.f32 %v4391_v7 }
0x2bc4   :  { %v4449_v52 = vpop.permute.xlu0 %4448 }
0x2bc5   :  { %v4454_v60 = vsel %vm351_vm3, %v4449_v52, 0 }
0x2bc6   :  { %6144 = vmatpush3.bf16.msra.mxu1 %v4454_v60 }
0x2bc7   :  { %6155 = vmatprep.subr.bf16.mxu1 %v6517_v1 }
0x2bc8   :  { %v4547_v16 = vpop.permute.xlu0 %4546 }
0x2bca   :  { %v6464_v29 = vpop.eup %6463 }
0x2bcb   :  { %v4394_v61 = vmul.f32 %v6464_v29, %v6460_v46 }
0x2bcd   :  { %v4396_v62 = vpack.c.bf16 %v4394_v61, %v4394_v61 }
0x2bce   :  { %v6466_v27 = vpop.eup %6465 }
0x2bcf   :  { %v4395_v0 = vmul.f32 %v6466_v27, %v6462_v59  ;;  %6140 = vmatmul.mubr.msk.bf16.vlgmr.msra.gmra.mxu0 %vm231_vm2, %v4396_v62 }
0x2bd0   :  { %6150 = vmatpush3.bf16.xpose.msra.mxu0 %v4504_v49  ;;  %6151 = vmatprep.mubr.msk.bf16.mxu0 %vm6518_vm0, %v6517_v1 }
0x2bd1   :  { %v4397_v57 = vpack.c.bf16 %v4395_v0, %v4395_v0  ;;  %6161 = vmatprep.subr.bf16.mxu0 %v6517_v1 }
0x2bd3   :  { %6146 = vmatmul.mubr.msk.bf16.vlgmr.msra.gmra.mxu1 %vm231_vm2, %v4397_v57 }
0x2bd4   :  { %6156 = vmatpush3.bf16.xpose.msra.mxu1 %v4554_v2  ;;  %6157 = vmatprep.mubr.msk.bf16.mxu1 %vm6518_vm0, %v6517_v1 }
0x2bd5   :  { %6167 = vmatprep.subr.bf16.mxu1 %v6517_v1 }
0x2bd7   :  { %6152 = vmatmul.mubr.msk.bf16.vlgmr.msra.gmra.mxu0 %vm231_vm2, %v4497_v5 }
0x2bd8   :  { %6163 = vmatprep.mubr.msk.bf16.mxu0 %vm6518_vm0, %v6517_v1 }
0x2bdb   :  { %6158 = vmatmul.mubr.msk.bf16.vlgmr.msra.gmra.mxu1 %vm231_vm2, %v4547_v16 }
0x2bdc   :  { %6169 = vmatprep.mubr.msk.bf16.mxu1 %vm6518_vm0, %v6517_v1 }
0x2c8f   :  { %v7519_v9 = vpop.f32.mrf.mxu0 }
0x2c91   :  { %v6141_v12 = vpop.f32.mrf.mxu0 }
0x2c93   :  { %v4444_v14 = vpop.f32.mrf.mxu0  ;;  %v7521_v15 = vpop.f32.mrf.mxu1 }
0x2c94   :  { %v6280_v47 = vpack.i.bf16 %v7521_v15, %v7519_v9 }
0x2c95   :  { %v6142_v17 = vpop.f32.mrf.mxu0  ;;  %v6147_v63 = vpop.f32.mrf.mxu1 }
0x2c97   :  { %v4493_v23 = vpop.f32.mrf.mxu1  ;;  %v4540_v48 = vpop.f32.mrf.mxu0 }
0x2c98   :  { %v4596_v32 = vsel %vm231_vm2, %v4540_v48, -inf }
0x2c99   :  { %4597 = vmax.xlane.f32.xlu1 %v4596_v32  ;;  %v6148_v18 = vpop.f32.mrf.mxu1  ;;  %v6153_v22 = vpop.f32.mrf.mxu0 }
0x2c9b   :  { %v4543_v25 = vpop.f32.mrf.mxu0  ;;  %v4590_v26 = vpop.f32.mrf.mxu1 }
0x2c9c   :  { %v4599_v28 = vsel %vm231_vm2, %v4590_v26, -inf }
0x2c9d   :  { %v6154_v3 = vpop.f32.mrf.mxu0  ;;  %4600 = vmax.xlane.f32.xlu0 %v4599_v28  ;;  %v6159_v30 = vpop.f32.mrf.mxu1 }
0x2c9f   :  { %v4593_v34 = vpop.f32.mrf.mxu1 }
0x2ca1   :  { %v6160_v13 = vpop.f32.mrf.mxu1 }
0x2caa   :  { %4620 = vrot.lane.b32.xlu1 %v7441_v41, %s6520_s15 }
0x2cae   :  { %4718 = vrot.lane.b32.xlu1 %v7413_v53, %s6521_s16 }
0x2cb2   :  { %4768 = vrot.lane.b32.xlu1 %v7415_v54, %s6521_s16 }
0x2cb6   :  { %4716 = vrot.lane.b32.xlu1 %v7426_v24, %s6521_s16 }
0x2d22   :  { %v4598_v40 = vpop.xlane.xlu1 %4597 }
0x2d23   :  { %v4602_v11 = vsub.f32 %v4540_v48, %v4598_v40 }
0x2d25   :  { %v4604_v33 = vmul.f32 1.442695, %v4602_v11 }
0x2d26   :  { %v4621_v35 = vpop.permute.xlu1 %4620  ;;  %v4601_v36 = vpop.xlane.xlu0 %4600 }
0x2d27   :  { %6467 = vpow2.f32 %v4604_v33  ;;  %v4626_v37 = vsel %vm351_vm3, %v4621_v35, 0  ;;  %v4603_v38 = vsub.f32 %v4590_v26, %v4601_v36 }
0x2d28   :  { %6162 = vmatpush3.bf16.msra.mxu0 %v4626_v37 }
0x2d29   :  { %v4606_v39 = vmul.f32 1.442695, %v4603_v38  ;;  %6173 = vmatprep.subr.bf16.mxu0 %v6517_v1 }
0x2d2a   :  { %v4719_v46 = vpop.permute.xlu1 %4718 }
0x2d2b   :  { %6469 = vpow2.f32 %v4606_v39  ;;  %v4724_v4 = vsel %vm231_vm2, %v4719_v46, 0 }
0x2d34   :  { %v6468_v53 = vpop.eup %6467 }
0x2d35   :  { %v4608_v54 = vsel %vm231_vm2, %v6468_v53, 0.0 }
0x2d36   :  { %4609 = vadd.xlane.f32.xlu0 %v4608_v54 }
0x2d38   :  { %v6470_v42 = vpop.eup %6469 }
0x2d39   :  { %v4611_v24 = vsel %vm231_vm2, %v6470_v42, 0.0 }
0x2d3a   :  { %4612 = vadd.xlane.f32.xlu0 %v4611_v24  ;;  %v6332_v24 = vld [vmem:[%s7677_s2 + $0x110] sm:$0xff]  }
0x2d50   :  { %4668 = vrot.lane.b32.xlu0 %v7443_v20, %s6520_s15 }
0x2d54   :  { %4766 = vrot.lane.b32.xlu0 %v7432_v10, %s6521_s16  ;;  %v4769_v10 = vpop.permute.xlu1 %4768 }
0x2d55   :  { %v4774_v60 = vsel %vm231_vm2, %v4769_v10, 0 }
0x2d58   :  { %v4717_v29 = vpop.permute.xlu1 %4716 }
0x2dbf   :  { %v4610_v31 = vpop.xlane.xlu0 %4609 }
0x2dc0   :  { %6471 = vrcp.f32 %v4610_v31 }
0x2dc3   :  { %v4613_v43 = vpop.xlane.xlu0 %4612 }
0x2dc4   :  { %6473 = vrcp.f32 %v4613_v43 }
0x2dc7   :  { %v4669_v44 = vpop.permute.xlu0 %4668 }
0x2dc8   :  { %v4674_v45 = vsel %vm351_vm3, %v4669_v44, 0 }
0x2dc9   :  { %6168 = vmatpush3.bf16.msra.mxu1 %v4674_v45 }
0x2dca   :  { %6179 = vmatprep.subr.bf16.mxu1 %v6517_v1 }
0x2dcb   :  { %v4767_v56 = vpop.permute.xlu0 %4766 }
0x2dcd   :  { %v6472_v58 = vpop.eup %6471 }
0x2dce   :  { %v4616_v55 = vmul.f32 %v6472_v58, %v6468_v53 }
0x2dd0   :  { %v4618_v59 = vpack.c.bf16 %v4616_v55, %v4616_v55 }
0x2dd1   :  { %v6474_v19 = vpop.eup %6473 }
0x2dd2   :  { %v4617_v7 = vmul.f32 %v6474_v19, %v6470_v42  ;;  %6164 = vmatmul.mubr.msk.bf16.vlgmr.msra.gmra.mxu0 %vm231_vm2, %v4618_v59  ;;  %v6331_v42 = vld [vmem:[%s7677_s2 + $0x118] sm:$0xff]  }
0x2dd3   :  { %6174 = vmatpush3.bf16.xpose.msra.mxu0 %v4724_v4  ;;  %6175 = vmatprep.mubr.msk.bf16.mxu0 %vm6518_vm0, %v6517_v1 }
0x2dd4   :  { %v4619_v52 = vpack.c.bf16 %v4617_v7, %v4617_v7  ;;  %6185 = vmatprep.subr.bf16.mxu0 %v6517_v1 }
0x2dd6   :  { %6170 = vmatmul.mubr.msk.bf16.vlgmr.msra.gmra.mxu1 %vm231_vm2, %v4619_v52 }
0x2dd7   :  { %6180 = vmatpush3.bf16.xpose.msra.mxu1 %v4774_v60  ;;  %6181 = vmatprep.mubr.msk.bf16.mxu1 %vm6518_vm0, %v6517_v1 }
0x2dd8   :  { %6191 = vmatprep.subr.bf16.mxu1 %v6517_v1 }
0x2dda   :  { %6176 = vmatmul.mubr.msk.bf16.vlgmr.msra.gmra.mxu0 %vm231_vm2, %v4717_v29 }
0x2ddb   :  { %6187 = vmatprep.mubr.msk.bf16.mxu0 %vm6518_vm0, %v6517_v1 }
0x2dde   :  { %6182 = vmatmul.mubr.msk.bf16.vlgmr.msra.gmra.mxu1 %vm231_vm2, %v4767_v56 }
0x2ddf   :  { %6193 = vmatprep.mubr.msk.bf16.mxu1 %vm6518_vm0, %v6517_v1 }
0x2e92   :  { %v4662_v61 = vpop.f32.mrf.mxu0 }
0x2e94   :  { %v6165_v62 = vpop.f32.mrf.mxu0 }
0x2e96   :  { %v4665_v27 = vpop.f32.mrf.mxu0  ;;  %v4710_v49 = vpop.f32.mrf.mxu1 }
0x2e97   :  { %v6285_v22 = vpack.i.bf16 %v4710_v49, %v4662_v61 }
0x2e98   :  { %v6166_v0 = vpop.f32.mrf.mxu0  ;;  %v6171_v50 = vpop.f32.mrf.mxu1 }
0x2e9a   :  { %v4713_v57 = vpop.f32.mrf.mxu1  ;;  %v4760_v2 = vpop.f32.mrf.mxu0 }
0x2e9b   :  { %v4816_v5 = vsel %vm231_vm2, %v4760_v2, -inf }
0x2e9c   :  { %4817 = vmax.xlane.f32.xlu1 %v4816_v5  ;;  %v6172_v16 = vpop.f32.mrf.mxu1  ;;  %v6177_v12 = vpop.f32.mrf.mxu0 }
0x2e9e   :  { %v4763_v14 = vpop.f32.mrf.mxu0  ;;  %v4810_v17 = vpop.f32.mrf.mxu1 }
0x2e9f   :  { %v4819_v63 = vsel %vm231_vm2, %v4810_v17, -inf }
0x2ea0   :  { %v6178_v23 = vpop.f32.mrf.mxu0  ;;  %4820 = vmax.xlane.f32.xlu0 %v4819_v63  ;;  %v6183_v48 = vpop.f32.mrf.mxu1 }
0x2ea2   :  { %v4813_v32 = vpop.f32.mrf.mxu1 }
0x2ea4   :  { %v6184_v18 = vpop.f32.mrf.mxu1 }
0x2ead   :  { %4840 = vrot.lane.b32.xlu1 %v7441_v41, %s6521_s16 }
0x2eb1   :  { %6281 = vrot.lane.b32.xlu1 %v6280_v47, %s6522_s17 }
0x2eb5   :  { %6286 = vrot.lane.b32.xlu1 %v6285_v22, %s6523_s18 }
0x2f25   :  { %v4818_v25 = vpop.xlane.xlu1 %4817 }
0x2f26   :  { %v4822_v26 = vsub.f32 %v4760_v2, %v4818_v25 }
0x2f28   :  { %v4824_v28 = vmul.f32 1.442695, %v4822_v26 }
0x2f29   :  { %v4841_v3 = vpop.permute.xlu1 %4840  ;;  %v4821_v30 = vpop.xlane.xlu0 %4820 }
0x2f2a   :  { %6475 = vpow2.f32 %v4824_v28  ;;  %v4846_v34 = vsel %vm351_vm3, %v4841_v3, 0  ;;  %v4823_v13 = vsub.f32 %v4810_v17, %v4821_v30 }
0x2f2b   :  { %6186 = vmatpush3.bf16.msra.mxu0 %v4846_v34 }
0x2f2c   :  { %v4826_v40 = vmul.f32 1.442695, %v4823_v13  ;;  %6197 = vmatprep.subr.bf16.mxu0 %v6517_v1 }
0x2f2d   :  { %v6282_v4 = vpop.permute.xlu1 %6281 }
0x2f2e   :  { %6477 = vpow2.f32 %v4826_v40  ;;  %v6284_v10 = vunpack.i.h.bf16 %v6282_v4  ;;  %v6283_v52 = vunpack.i.l.bf16 %v6282_v4 }
0x2f30   :  { %v4961_v61 = vsel %vm231_vm2, %v7481_v21, %v6284_v10  ;;  %v4960_v62 = vsel %vm231_vm2, %v7479_v51, %v6283_v52  ;;  %v5461_v51 = vld [vmem:[%s7679_s4 + $0x17] ss:$0 sm:$0xff] }
0x2f31   :  { %v6287_v7 = vpop.permute.xlu1 %6286 }
0x2f32   :  { %v6289_v60 = vunpack.i.h.bf16 %v6287_v7  ;;  %v6288_v29 = vunpack.i.l.bf16 %v6287_v7 }
0x2f34   :  { %v4963_v0 = vsel %vm1133_vm4, %v4961_v61, %v6289_v60  ;;  %v4962_v50 = vsel %vm1133_vm4, %v4960_v62, %v6288_v29 }
0x2f37   :  { %v6476_v41 = vpop.eup %6475 }
0x2f38   :  { %v4828_v9 = vsel %vm231_vm2, %v6476_v41, 0.0 }
0x2f39   :  { %4829 = vadd.xlane.f32.xlu0 %v4828_v9  ;;  %v6335_v9 = vld [vmem:[%s7677_s2 + $0x138] sm:$0xff]  }
0x2f3b   :  { %v6478_v15 = vpop.eup %6477 }
0x2f3c   :  { %v4831_v47 = vsel %vm231_vm2, %v6478_v15, 0.0 }
0x2f3d   :  { %4832 = vadd.xlane.f32.xlu0 %v4831_v47 }
0x2f53   :  { %4888 = vrot.lane.b32.xlu0 %v7443_v20, %s6521_s16 }
0x2fc2   :  { %v4830_v11 = vpop.xlane.xlu0 %4829 }
0x2fc3   :  { %6479 = vrcp.f32 %v4830_v11 }
0x2fc6   :  { %v4833_v33 = vpop.xlane.xlu0 %4832 }
0x2fc7   :  { %6481 = vrcp.f32 %v4833_v33 }
0x2fca   :  { %v4889_v35 = vpop.permute.xlu0 %4888 }
0x2fcb   :  { %v4894_v36 = vsel %vm351_vm3, %v4889_v35, 0 }
0x2fcc   :  { %6192 = vmatpush3.bf16.msra.mxu1 %v4894_v36 }
0x2fcd   :  { %6205 = vmatprep.subr.bf16.mxu1 %v6517_v1 }
0x2fd0   :  { %v6480_v37 = vpop.eup %6479 }
0x2fd1   :  { %v4836_v38 = vmul.f32 %v6480_v37, %v6476_v41  ;;  %v6334_v41 = vld [vmem:[%s7678_s3 + $0x10] sm:$0xff]  }
0x2fd3   :  { %v4838_v39 = vpack.c.bf16 %v4836_v38, %v4836_v38 }
0x2fd4   :  { %v6482_v53 = vpop.eup %6481 }
0x2fd5   :  { %v4837_v54 = vmul.f32 %v6482_v53, %v6478_v15  ;;  %6188 = vmatmul.mubr.msk.bf16.vlgmr.msra.gmra.mxu0 %vm231_vm2, %v4838_v39  ;;  %v5465_v39 = vld [vmem:[%s7679_s4 + $0x1a] ss:$0 sm:$0xff] }
0x2fd6   :  { %6201 = vmatprep.mubr.msk.bf16.mxu0 %vm6518_vm0, %v6517_v1  ;;  %6198 = vmatpush3.bf16.msra.mxu0 %v6331_v42  ;;  %v5466_v42 = vld [vmem:[%s7679_s4 + $0x1b] ss:$0 sm:$0xff] }
0x2fd7   :  { %v4839_v20 = vpack.c.bf16 %v4837_v54, %v4837_v54  ;;  %6199 = vmatprep.subr.bf16.mxu0 %v6517_v1 }
0x2fd9   :  { %6194 = vmatmul.mubr.msk.bf16.vlgmr.msra.gmra.mxu1 %vm231_vm2, %v4839_v20 }
0x2fda   :  { %6209 = vmatprep.mubr.msk.bf16.mxu1 %vm6518_vm0, %v6517_v1  ;;  %6200 = vmatpush3.bf16.msra.mxu0 %v6332_v24 }
0x2fdb   :  { %6213 = vmatprep.subr.bf16.mxu0 %v6517_v1 }
0x3095   :  { %v4882_v31 = vpop.f32.mrf.mxu0 }
0x3097   :  { %v6189_v43 = vpop.f32.mrf.mxu0 }
0x3099   :  { %v4885_v44 = vpop.f32.mrf.mxu0  ;;  %v4930_v45 = vpop.f32.mrf.mxu1 }
0x309a   :  { %v6290_v58 = vpack.i.bf16 %v4930_v45, %v4882_v31  ;;  %v6336_v45 = vld [vmem:[%s7677_s2 + $0x130] sm:$0xff]  }
0x309b   :  { %v6190_v46 = vpop.f32.mrf.mxu0  ;;  %v6195_v55 = vpop.f32.mrf.mxu1 }
0x309c   :  { %6291 = vrot.lane.b32.xlu1 %v6290_v58, %s6524_s23  ;;  %v6337_v58 = vld [vmem:[%s7677_s2 + $0x128] sm:$0xff]   ;;  %v6338_v46 = vld [vmem:[%s7677_s2 + $0x120] sm:$0xff]   ;;  %v5467_v55 = vld [vmem:[%s7679_s4 + $0x1e] ss:$0 sm:$0xff] }
0x309d   :  { %v4933_v59 = vpop.f32.mrf.mxu1 }
0x309f   :  { %v6196_v19 = vpop.f32.mrf.mxu1 }
0x310e   :  { %v6292_v56 = vpop.permute.xlu1 %6291 }
0x310f   :  { %v6294_v27 = vunpack.i.h.bf16 %v6292_v56  ;;  %v6293_v49 = vunpack.i.l.bf16 %v6292_v56 }
0x3111   :  { %v4965_v57 = vsel %vm1136_vm5, %v4963_v0, %v6294_v27  ;;  %v4964_v2 = vsel %vm1136_vm5, %v4962_v50, %v6293_v49 }
0x3112   :  { %v4966_v5 = vpack.c.bf16 %v4965_v57, %v4964_v2 }
0x3114   :  { %6202 = vmatmul.mubr.msk.bf16.vlgmr.msra.gmra.mxu0 %vm64_vm1, %v4966_v5 }
0x3115   :  { %6221 = vmatprep.mubr.msk.bf16.mxu0 %vm6518_vm0, %v6517_v1  ;;  %6214 = vmatpush3.bf16.msra.mxu0 %v6335_v9 }
0x3116   :  { %6215 = vmatprep.subr.bf16.mxu0 %v6517_v1 }
0x3119   :  { %6216 = vmatpush3.bf16.msra.mxu0 %v6336_v45 }
0x311a   :  { %6217 = vmatprep.subr.bf16.mxu0 %v6517_v1 }
0x311d   :  { %6218 = vmatpush3.bf16.msra.mxu0 %v6337_v58 }
0x311e   :  { %6219 = vmatprep.subr.bf16.mxu0 %v6517_v1 }
0x3121   :  { %6220 = vmatpush3.bf16.msra.mxu0 %v6338_v46 }
0x31d4   :  { %v5020_v21 = vpop.f32.mrf.mxu0 }
0x31d5   :  { %v5021_v16 = vadd.f32 %v5461_v51, %v5020_v21 }
0x31d6   :  { %v6203_v12 = vpop.f32.mrf.mxu0 }
0x31d7   :  { %v5027_v14 = vadd.f32 %v5021_v16, %v7389_v6 }
0x31d8   :  { %v5023_v17 = vpop.f32.mrf.mxu0 }
0x31d9   :  { %v5024_v63 = vadd.f32 %v5461_v51, %v5023_v17  ;;  %v5031_v23 = vsel %vm64_vm1, %v5027_v14, 0.0 }
0x31da   :  { %5032 = vadd.xlane.f32.xlu0 %v5031_v23  ;;  %v6204_v48 = vpop.f32.mrf.mxu0 }
0x31db   :  { %v5028_v32 = vadd.f32 %v5024_v63, %v7391_v8  ;;  %v6333_v8 = vld [vmem:[%s7678_s3 + $0x18] sm:$0xff]  }
0x31dc   :  { %6206 = vmatpush3.bf16.msra.mxu1 %v6333_v8 }
0x31dd   :  { %v5034_v18 = vsel %vm64_vm1, %v5028_v32, 0.0  ;;  %6207 = vmatprep.subr.bf16.mxu1 %v6517_v1  ;;  %v5471_v1 = vld [vmem:[%s7679_s4 + $0x1f] ss:$0 sm:$0xff] }
0x31de   :  { %5035 = vadd.xlane.f32.xlu1 %v5034_v18 }
0x31e0   :  { %6208 = vmatpush3.bf16.msra.mxu1 %v6334_v41 }
0x3263   :  { %v5033_v22 = vpop.xlane.xlu0 %5032 }
0x3264   :  { %v5037_v25 = vmul.f32 0.03125, %v5033_v22 }
0x3266   :  { %v5039_v26 = vsub.f32 %v5027_v14, %v5037_v25 }
0x3267   :  { %v5036_v28 = vpop.xlane.xlu1 %5035 }
0x3268   :  { %v5038_v3 = vmul.f32 0.03125, %v5036_v28  ;;  %v5041_v30 = vmul.f32 %v5039_v26, %v5039_v26 }
0x326a   :  { %v5040_v34 = vsub.f32 %v5028_v32, %v5038_v3  ;;  %v5043_v6 = vsel %vm64_vm1, %v5041_v30, 0.0 }
0x326b   :  { %5044 = vadd.xlane.f32.xlu0 %v5043_v6  ;;  %v5477_v6 = vld [vmem:[%s7679_s4 + $0x1c] ss:$0 sm:$0xff] }
0x326c   :  { %v5042_v13 = vmul.f32 %v5040_v34, %v5040_v34 }
0x326e   :  { %v5046_v40 = vsel %vm64_vm1, %v5042_v13, 0.0 }
0x326f   :  { %5047 = vadd.xlane.f32.xlu0 %v5046_v40  ;;  %v5478_v40 = vld [vmem:[%s7679_s4 + $0x1d] ss:$0 sm:$0xff] }
0x32f4   :  { %v5045_v15 = vpop.xlane.xlu0 %5044 }
0x32f5   :  { %v5049_v47 = vmul.f32 0.03125, %v5045_v15 }
0x32f7   :  { %v5051_v11 = vadd.f32 1e-05, %v5049_v47 }
0x32f8   :  { %v5048_v33 = vpop.xlane.xlu0 %5047 }
0x32f9   :  { %6483 = vrsqrt.f32 %v5051_v11  ;;  %v5050_v35 = vmul.f32 0.03125, %v5048_v33 }
0x32fb   :  { %v5052_v36 = vadd.f32 1e-05, %v5050_v35 }
0x32fd   :  { %6485 = vrsqrt.f32 %v5052_v36 }
0x3306   :  { %v6484_v37 = vpop.eup %6483 }
0x3307   :  { %v5055_v38 = vmul.f32 %v6484_v37, %v5039_v26 }
0x3309   :  { %v5061_v54 = vmul.f32 %v5465_v39, %v5055_v38 }
0x330a   :  { %v6486_v53 = vpop.eup %6485 }
0x330b   :  { %v5056_v20 = vmul.f32 %v6486_v53, %v5040_v34  ;;  %v5067_v31 = vadd.f32 %v5466_v42, %v5061_v54 }
0x330d   :  { %v5062_v24 = vmul.f32 %v5465_v39, %v5056_v20 }
0x330f   :  { %v5068_v43 = vadd.f32 %v5466_v42, %v5062_v24 }
0x3311   :  { %v5069_v44 = vpack.c.bf16 %v5068_v43, %v5067_v31 }
0x3313   :  { %6210 = vmatmul.mubr.msk.bf16.vlgmr.msra.gmra.mxu1 %vm64_vm1, %v5069_v44 }
0x33d3   :  { %v5128_v59 = vpop.f32.mrf.mxu1 }
0x33d4   :  { %v5129_v4 = vadd.f32 %v5467_v55, %v5128_v59 }
0x33d5   :  { %v6211_v19 = vpop.f32.mrf.mxu1 }
0x33d6   :  { %v5135_v60 = vmax.f32 %v5129_v4, 0.0  ;;  %v5479_v19 = vld [vmem:[%s7679_s4 + $0x20] ss:$0 sm:$0xff] }
0x33d7   :  { %v5131_v7 = vpop.f32.mrf.mxu1 }
0x33d8   :  { %v5132_v10 = vadd.f32 %v5467_v55, %v5131_v7  ;;  %v5480_v7 = vld [vmem:[%s7679_s4 + $0x21] ss:$0 sm:$0xff] }
0x33d9   :  { %v6212_v52 = vpop.f32.mrf.mxu1 }
0x33da   :  { %v5136_v29 = vmax.f32 %v5132_v10, 0.0 }
0x33dc   :  { %v5137_v56 = vpack.c.bf16 %v5136_v29, %v5135_v60 }
0x33de   :  { %6222 = vmatmul.mubr.msk.bf16.vlgmr.msra.gmra.mxu0 %vm2562_vm6, %v5137_v56 }
0x349e   :  { %v5212_v61 = vpop.f32.mrf.mxu0 }
0x349f   :  { %v5213_v62 = vadd.f32 %v5471_v1, %v5212_v61 }
0x34a0   :  { %v6223_v27 = vpop.f32.mrf.mxu0 }
0x34a1   :  { %v5219_v49 = vadd.f32 %v5213_v62, %v5067_v31 }
0x34a2   :  { %v5215_v0 = vpop.f32.mrf.mxu0 }
0x34a3   :  { %v5216_v50 = vadd.f32 %v5471_v1, %v5215_v0  ;;  %v5223_v57 = vsel %vm64_vm1, %v5219_v49, 0.0 }
0x34a4   :  { %5224 = vadd.xlane.f32.xlu0 %v5223_v57  ;;  %v6224_v2 = vpop.f32.mrf.mxu0 }
0x34a5   :  { %v5220_v5 = vadd.f32 %v5216_v50, %v5068_v43 }
0x34a7   :  { %v5226_v51 = vsel %vm64_vm1, %v5220_v5, 0.0 }
0x34a8   :  { %5227 = vadd.xlane.f32.xlu1 %v5226_v51 }
0x352d   :  { %v5225_v21 = vpop.xlane.xlu0 %5224 }
0x352e   :  { %v5229_v16 = vmul.f32 0.03125, %v5225_v21 }
0x3530   :  { %v5231_v12 = vsub.f32 %v5219_v49, %v5229_v16 }
0x3531   :  { %v5228_v14 = vpop.xlane.xlu1 %5227 }
0x3532   :  { %v5230_v17 = vmul.f32 0.03125, %v5228_v14  ;;  %v5233_v63 = vmul.f32 %v5231_v12, %v5231_v12 }
0x3534   :  { %v5232_v23 = vsub.f32 %v5220_v5, %v5230_v17  ;;  %v5235_v48 = vsel %vm64_vm1, %v5233_v63, 0.0 }
0x3535   :  { %5236 = vadd.xlane.f32.xlu0 %v5235_v48 }
0x3536   :  { %v5234_v32 = vmul.f32 %v5232_v23, %v5232_v23 }
0x3538   :  { %v5238_v18 = vsel %vm64_vm1, %v5234_v32, 0.0 }
0x3539   :  { %5239 = vadd.xlane.f32.xlu1 %v5238_v18 }
0x35be   :  { %v5237_v22 = vpop.xlane.xlu0 %5236 }
0x35bf   :  { %v5241_v25 = vmul.f32 0.03125, %v5237_v22 }
0x35c1   :  { %v5243_v26 = vadd.f32 1e-05, %v5241_v25 }
0x35c2   :  { %v5240_v28 = vpop.xlane.xlu1 %5239 }
0x35c3   :  { %6487 = vrsqrt.f32 %v5243_v26  ;;  %v5242_v3 = vmul.f32 0.03125, %v5240_v28 }
0x35c5   :  { %v5244_v30 = vadd.f32 1e-05, %v5242_v3 }
0x35c7   :  { %6489 = vrsqrt.f32 %v5244_v30 }
0x35d0   :  { %v6488_v34 = vpop.eup %6487 }
0x35d1   :  { %v5247_v13 = vmul.f32 %v6488_v34, %v5231_v12 }
0x35d3   :  { %v5253_v8 = vmul.f32 %v5477_v6, %v5247_v13 }
0x35d4   :  { %v6490_v41 = vpop.eup %6489 }
0x35d5   :  { %v5259_v9 = vadd.f32 %v5478_v40, %v5253_v8  ;;  %v5248_v15 = vmul.f32 %v6490_v41, %v5232_v23 }
0x35d7   :  { %v5263_v47 = vsel %vm64_vm1, %v5259_v9, 0.0  ;;  %v5254_v11 = vmul.f32 %v5477_v6, %v5248_v15 }
0x35d8   :  { %5264 = vadd.xlane.f32.xlu0 %v5263_v47 }
0x35d9   :  { %v5260_v33 = vadd.f32 %v5478_v40, %v5254_v11 }
0x35db   :  { %v5266_v35 = vsel %vm64_vm1, %v5260_v33, 0.0 }
0x35dc   :  { %5267 = vadd.xlane.f32.xlu1 %v5266_v35 }
0x3661   :  { %v5265_v36 = vpop.xlane.xlu0 %5264 }
0x3662   :  { %v5269_v37 = vmul.f32 0.03125, %v5265_v36 }
0x3664   :  { %v5271_v38 = vsub.f32 %v5259_v9, %v5269_v37 }
0x3665   :  { %v5268_v39 = vpop.xlane.xlu1 %5267 }
0x3666   :  { %v5270_v53 = vmul.f32 0.03125, %v5268_v39  ;;  %v5273_v54 = vmul.f32 %v5271_v38, %v5271_v38 }
0x3668   :  { %v5272_v20 = vsub.f32 %v5260_v33, %v5270_v53  ;;  %v5275_v42 = vsel %vm64_vm1, %v5273_v54, 0.0 }
0x3669   :  { %5276 = vadd.xlane.f32.xlu0 %v5275_v42 }
0x366a   :  { %v5274_v24 = vmul.f32 %v5272_v20, %v5272_v20 }
0x366c   :  { %v5278_v31 = vsel %vm64_vm1, %v5274_v24, 0.0 }
0x366d   :  { %5279 = vadd.xlane.f32.xlu1 %v5278_v31 }
0x36f2   :  { %v5277_v43 = vpop.xlane.xlu0 %5276 }
0x36f3   :  { %v5281_v44 = vmul.f32 0.03125, %v5277_v43 }
0x36f5   :  { %v5283_v45 = vadd.f32 1e-05, %v5281_v44 }
0x36f6   :  { %v5280_v58 = vpop.xlane.xlu1 %5279 }
0x36f7   :  { %6491 = vrsqrt.f32 %v5283_v45  ;;  %v5282_v46 = vmul.f32 0.03125, %v5280_v58 }
0x36f9   :  { %v5284_v55 = vadd.f32 1e-05, %v5282_v46 }
0x36fb   :  { %6493 = vrsqrt.f32 %v5284_v55 }
0x3704   :  { %v6492_v59 = vpop.eup %6491 }
0x3705   :  { %v5287_v4 = vmul.f32 %v6492_v59, %v5271_v38 }
0x3707   :  { %v5293_v10 = vmul.f32 %v5479_v19, %v5287_v4 }
0x3708   :  { %v6494_v52 = vpop.eup %6493 }
0x3709   :  { %v5288_v60 = vmul.f32 %v6494_v52, %v5272_v20  ;;  %v5299_v29 = vadd.f32 %v5480_v7, %v5293_v10 }
0x370b   :  { %v5294_v56 = vmul.f32 %v5479_v19, %v5288_v60  ;;  %5301 = vst.msk [vmem:[#allocation2] sm:$0xff] %vm64_vm1, %v5299_v29 }
0x370d   :  { %v5300_v1 = vadd.f32 %v5480_v7, %v5294_v56 }
0x370f   :  { %5302 = vst.msk [vmem:[#allocation2 + $0x8] sm:$0xff] %vm64_vm1, %v5300_v1 }
0x3710   :  { %6506 = shalt.err (!%p6503_p4)
}
0x3711   :  { %s6526_s4 = smov 128  }
0x3712   :  { %5314 = dma.vmem_to_hbm [thread:$0]  %s5309_s25, 256, %s7680_s5, [#allocation3], %s6526_s4, %s6526_s4, %s6522_s17  }
0x3713   :  { %6515 = dma.done.wait [#allocation3], 256  }
0x3714   :  { %6516 = vsyncadd [#allocation3], 4294967040 }
0x3715   :  { %5318 = vsyncpa [#allocation3], 1 }

</bundles_post_ra>
